<compile_context>
chip_gen: v7x
topology: tpu7x:2x2x1
jax: 0.10.0
libtpu: 0.0.40
codegen_flags: <defaults>
</compile_context>

<pallas_src>
import jax
import jax.numpy as jnp
from jax import lax
from jax.experimental import pallas as pl
from jax.experimental.pallas import tpu as pltpu

# ----------------------------- config --------------------------------------
B = 2              # batch
BP = 8             # batch padded to the 8-sublane tile (recurrence scratches)
VOCAB = 24         # vocab_size
WIN = 16           # win_size (sequence length)
EMBED = 8          # embedding_dim
HIDDEN = 16        # hidden_dim
OUT = 8            # out_dim (per-encoder output width)
PLM_DIM = 32       # surrogate "BERT" hidden size
LSTM_H1 = 2 * HIDDEN       # per-direction hidden, lstm1 (hidden_dim * 2)
LSTM_H2 = OUT // 2         # per-direction hidden, lstm2 (out_dim // 2)
H1C = 2 * LSTM_H1          # combined (fwd|bwd) state width, layer 1 = 64
H2C = 2 * LSTM_H2          # combined state width, layer 2 = 8
G1 = 4 * H1C               # combined gate width, layer 1 = 256
G2 = 4 * H2C               # combined gate width, layer 2 = 32
COMBINED = 3 * OUT         # actual fused width (cnn + plm + bi-lstm) = 24
L1 = WIN - 2               # after conv1
L2 = L1 - 2                # after conv2
LP = L2 - 2                # after AvgPool1d(3, stride=1)  (stride=1 is explicit in torch)
CNN_FLAT = LP * HIDDEN     # 160


# ----------------------- packed-operand slab layouts -------------------------
def _ru16(n):
    return ((n + 15) // 16) * 16


_WSPECS = (                      # name, rows, cols   (bf16 weight slab, 16-aligned rows)
    ("ew1",  2 * VOCAB, G1),     # [embl @ wih1_fwd ; embl @ wih1_bwd]     (48, 256)
    ("whh1", H1C, G1),           # combined recurrent matrix, layer 1      (64, 256)
    ("w2",   H1C, 2 * G2),       # [wih2_fwd | wih2_bwd]                   (64, 64)
    ("whh2", H2C, G2),           # combined recurrent matrix, layer 2      (8, 32)
    ("cw1",  3 * VOCAB, HIDDEN), # emb- & BN-folded conv1 taps             (72, 16)
    ("cw2",  3 * HIDDEN, HIDDEN),# BN-folded conv2 taps                    (48, 16)
    ("clw",  CNN_FLAT, OUT),     # flatten + Linear                        (160, 8)
    ("pw",   3 * VOCAB, OUT),    # PLM 'same' conv taps (emb & BN folded)  (72, 8)
    ("dw1",  COMBINED, 32),
    ("dw2",  32, 5),
    ("dw3",  5, 1),
)
WOFF = {}
_r = 0
for _name, _rows, _cols in _WSPECS:
    WOFF[_name] = (_r, _rows, _cols)
    _r += _ru16(_rows)
W_ROWS = _ru16(_r)
W_COLS = G1                       # 256 lanes

_BSPECS = (                       # name, width   (f32 bias slab, one bias per row)
    ("b1", G1), ("b2", 2 * G2), ("ct1", HIDDEN), ("ct2", HIDDEN),
    ("clb", OUT), ("pt", OUT), ("db1", 32), ("db2", 5), ("db3", 1),
)
BOFF = {n: (i, c) for i, (n, c) in enumerate(_BSPECS)}
B_ROWS, B_COLS = 16, G1


# --------------------------- the fused kernel --------------------------------
def _slamnet_kernel(ids3_ref, idstm_ref, idsrev_ref, wslab_ref, bslab_ref, o_ref,
                    xg1_scr, o1f_scr, o1b_scr, xg2f_scr, xg2b_scr):
    f32, bf16 = jnp.float32, jnp.bfloat16
    dn3 = (((2,), (0,)), ((), ()))          # (B, L, K) . (K, N) -> (B, L, N)

    def W(name):                             # bf16 weight from the packed slab
        r, n, c = WOFF[name]
        return wslab_ref[r:r + n, 0:c]

    def BV(name):                            # (1, c) f32 bias row
        i, c = BOFF[name]
        return bslab_ref[i:i + 1, 0:c]

    # ---- embedding gathers as one-hot compares (tables folded into weights) ----
    iota3 = lax.broadcasted_iota(jnp.int32, (B, WIN, VOCAB), 2)
    oh3 = (ids3_ref[...] == iota3).astype(f32)                       # (B, W, V)
    iota2 = lax.broadcasted_iota(jnp.int32, (WIN * BP, VOCAB), 1)
    oh_tm = (idstm_ref[...] == iota2).astype(f32)                    # time-major, padded batch
    oh_rev = (idsrev_ref[...] == iota2).astype(f32)                  # reversed-time

    # ============================ CNN encoder ===============================
    # conv1 (embedding + BN scale folded, 3 taps lane-concatenated -> ONE matmul)
    lhs1 = jnp.concatenate(
        [oh3[:, 0:L1, :], oh3[:, 1:L1 + 1, :], oh3[:, 2:L1 + 2, :]], axis=2).astype(bf16)
    h = lax.dot_general(lhs1, W("cw1"), dn3, preferred_element_type=f32)
    h = jnp.maximum(h + BV("ct1"), 0.0)                              # BN shift + ReLU

    # conv2 (3 taps -> ONE matmul)
    lhs2 = jnp.concatenate(
        [h[:, 0:L2, :], h[:, 1:L2 + 1, :], h[:, 2:L2 + 2, :]], axis=2).astype(bf16)
    h2 = lax.dot_general(lhs2, W("cw2"), dn3, preferred_element_type=f32)
    h2 = jnp.maximum(h2 + BV("ct2"), 0.0)

    # AvgPool1d(3, stride=1)
    p = (h2[:, 0:LP, :] + h2[:, 1:LP + 1, :] + h2[:, 2:LP + 2, :]) * (1.0 / 3.0)

    # flatten + Linear as ONE (B, 160) @ (160, 8) matmul; the flatten is a lane concat
    # (no in-kernel reshape needed; clw is repacked at prepare time to match).
    p_flat = jnp.concatenate([p[:, l, :] for l in range(LP)], axis=1).astype(bf16)
    cnn_feat = jnp.maximum(
        jnp.dot(p_flat, W("clw"), preferred_element_type=f32) + BV("clb"), 0.0)   # (B, OUT)

    # ============================ PLM encoder ===============================
    # surrogate-BERT embedding folded into the 'same' conv; zero padding == zero one-hot.
    zpad = jnp.zeros((B, 1, VOCAB), f32)
    ohp = jnp.concatenate([zpad, oh3, zpad], axis=1)                 # (B, W+2, V)
    lhsp = jnp.concatenate(
        [ohp[:, 0:WIN, :], ohp[:, 1:WIN + 1, :], ohp[:, 2:WIN + 2, :]], axis=2).astype(bf16)
    yp = lax.dot_general(lhsp, W("pw"), dn3, preferred_element_type=f32)
    yp = jnp.maximum(yp + BV("pt"), 0.0)
    plm_feat = jnp.sum(yp, axis=1) * (1.0 / WIN)                     # (B, OUT)

    # ============================ BiLSTM encoder =============================
    # layer-1 x @ W_ih for BOTH directions in ONE matmul (embedding folded into ew1)
    lhs_x1 = jnp.concatenate([oh_tm, oh_rev], axis=1).astype(bf16)   # (W*BP, 2V)
    xg1_scr[...] = jnp.dot(lhs_x1, W("ew1"), preferred_element_type=f32) + BV("b1")

    # layer-1 recurrence: combined fwd|bwd cell, gate layout [i | f | o | g]
    whh1 = W("whh1")                                                 # (H1C, G1) bf16
    h1 = jnp.zeros((BP, H1C), bf16)
    c1 = jnp.zeros((BP, H1C), f32)
    for s in range(WIN):
        xg = xg1_scr[s * BP:(s + 1) * BP, :]                         # aligned (8, 256) tile
        gates = xg if s == 0 else xg + jnp.dot(h1, whh1, preferred_element_type=f32)
        sg = jax.nn.sigmoid(gates[:, 0:3 * H1C])                     # i | f | o
        g = jnp.tanh(gates[:, 3 * H1C:4 * H1C])                      # cell gate only
        c1 = sg[:, H1C:2 * H1C] * c1 + sg[:, 0:H1C] * g
        hf = sg[:, 2 * H1C:3 * H1C] * jnp.tanh(c1)
        o1f_scr[s * BP:(s + 1) * BP, :] = hf[:, 0:LSTM_H1]           # fwd state @ time s
        o1b_scr[(WIN - 1 - s) * BP:(WIN - s) * BP, :] = hf[:, LSTM_H1:H1C]  # bwd @ time W-1-s
        h1 = hf.astype(bf16)

    # layer-2 x @ W_ih for both directions in ONE matmul, split once in bulk
    lhs_x2 = jnp.concatenate([o1f_scr[...], o1b_scr[...]], axis=1).astype(bf16)  # (W*BP, H1C)
    xg2 = jnp.dot(lhs_x2, W("w2"), preferred_element_type=f32) + BV("b2")        # (W*BP, 2*G2)
    xg2f_scr[...] = xg2[:, 0:G2]
    xg2b_scr[...] = xg2[:, G2:2 * G2]

    # layer-2 recurrence, temporal mean reduced on the fly
    whh2 = W("whh2")                                                 # (H2C, G2) bf16
    h2s = jnp.zeros((BP, H2C), bf16)
    c2 = jnp.zeros((BP, H2C), f32)
    acc = jnp.zeros((BP, H2C), f32)
    for s in range(WIN):
        tb = WIN - 1 - s
        xg = xg2f_scr[s * BP:(s + 1) * BP, :] + xg2b_scr[tb * BP:(tb + 1) * BP, :]
        gates = xg if s == 0 else xg + jnp.dot(h2s, whh2, preferred_element_type=f32)
        sg = jax.nn.sigmoid(gates[:, 0:3 * H2C])
        g = jnp.tanh(gates[:, 3 * H2C:4 * H2C])
        c2 = sg[:, H2C:2 * H2C] * c2 + sg[:, 0:H2C] * g
        hf = sg[:, 2 * H2C:3 * H2C] * jnp.tanh(c2)
        acc = acc + hf
        h2s = hf.astype(bf16)
    lstm_feat = acc[0:B, :] * (1.0 / WIN)                            # (B, OUT)

    # ============================ decoder ===================================
    # Attention over the length-1 fused sequence is the identity (softmax == 1), so the
    # context equals the fused features; fc1 runs on the lane-concatenated fused vector.
    fused = jnp.concatenate([cnn_feat, plm_feat, lstm_feat], axis=1).astype(bf16)  # (B, 24)
    d1 = jnp.maximum(jnp.dot(fused, W("dw1"), preferred_element_type=f32) + BV("db1"), 0.0)
    d2 = jnp.maximum(
        jnp.dot(d1.astype(bf16), W("dw2"), preferred_element_type=f32) + BV("db2"), 0.0)
    logit = jnp.dot(d2.astype(bf16), W("dw3"), preferred_element_type=f32) + BV("db3")
    o_ref[...] = jax.nn.sigmoid(logit)


# ------------------------------ parameters ----------------------------------
def init_params(key):
    keys = iter(jax.random.split(key, 48))

    def u(shape, a=0.1):
        return jax.random.uniform(next(keys), shape, jnp.float32, -a, a)

    def bn(c):
        gamma = 1.0 + u((c,), 0.5)
        beta = u((c,), 0.1)
        mean = jnp.zeros((c,), jnp.float32)
        var = jnp.ones((c,), jnp.float32)
        scale = gamma / jnp.sqrt(var + 1e-5)
        shift = beta - mean * scale
        return scale, shift

    cnn = dict(emb=u((VOCAB, EMBED), 0.5),
               w1=u((3, EMBED, HIDDEN)), b1=u((HIDDEN,)),
               w2=u((3, HIDDEN, HIDDEN)), b2=u((HIDDEN,)),
               lw=u((HIDDEN * LP, OUT)), lb=u((OUT,)))
    cnn['s1'], cnn['t1'] = bn(HIDDEN)
    cnn['s2'], cnn['t2'] = bn(HIDDEN)

    plm = dict(emb=u((VOCAB, PLM_DIM), 0.5),
               w1=u((3, PLM_DIM, OUT)), b1=u((OUT,)))
    plm['s1'], plm['t1'] = bn(OUT)

    def lstm_dir(in_dim, H):
        # torch per-direction gate layout [i|f|g|o]; b = b_ih + b_hh pre-folded.
        return dict(wih=u((in_dim, 4 * H)), whh=u((H, 4 * H)), b=u((1, 4 * H)))

    lstm = dict(emb=u((VOCAB, EMBED), 0.5),
                l1f=lstm_dir(EMBED, LSTM_H1), l1b=lstm_dir(EMBED, LSTM_H1),
                l2f=lstm_dir(H1C, LSTM_H2), l2b=lstm_dir(H1C, LSTM_H2))

    dec = dict(w_omega=u((COMBINED, COMBINED)), u_omega=u((COMBINED, 1)),  # inert (seq len 1)
               w1=u((COMBINED, 32)), b1=u((32,)),
               w2=u((32, 5)), b2=u((5,)),
               w3=u((5, 1)), b3=u((1,)))
    return dict(cnn=cnn, plm=plm, lstm=lstm, dec=dec)


def _combine_dirs(pf, pb, H):
    """Pack a bidirectional LSTM layer into one combined-direction cell.

    Per-direction torch gate order is [i|f|g|o]; the combined layout is
    [i_f i_b | f_f f_b | o_f o_b | g_f g_b] (cell gate LAST, width 8H) with state
    [h_f | h_b] (2H), so one matmul + sigmoid on 3/4 + tanh on 1/4 updates both dirs.
    """
    reord = (0, 1, 3, 2)          # src gate (i,f,g,o) -> dest block (i,f,o,g)

    def scat(w, d):
        out = jnp.zeros((w.shape[0], 8 * H), w.dtype)
        for g in range(4):
            dst = (2 * reord[g] + d) * H
            out = out.at[:, dst:dst + H].set(w[:, g * H:(g + 1) * H])
        return out

    wih_fc, wih_bc = scat(pf['wih'], 0), scat(pb['wih'], 1)
    whh_c = jnp.concatenate([scat(pf['whh'], 0), scat(pb['whh'], 1)], axis=0)
    b_c = scat(pf['b'], 0) + scat(pb['b'], 1)
    return wih_fc, wih_bc, whh_c, b_c


def prepare_params(p):
    """One-time (outside jit) repack into the two kernel slabs."""
    cnn, plm, lstm, dec = p['cnn'], p['plm'], p['lstm'], p['dec']

    # CNN: fold embedding into conv1 taps, BN scale into weight cols, conv bias into shift.
    cw1 = jnp.concatenate([cnn['emb'] @ cnn['w1'][k] for k in range(3)], axis=0)
    cw1 = cw1 * cnn['s1'][None, :]
    ct1 = cnn['b1'] * cnn['s1'] + cnn['t1']
    cw2 = jnp.concatenate([cnn['w2'][k] for k in range(3)], axis=0) * cnn['s2'][None, :]
    ct2 = cnn['b2'] * cnn['s2'] + cnn['t2']
    # torch channel-major flatten (flat = c*LP + l) -> our lane-concat order (l*HIDDEN + c)
    clw = cnn['lw'].reshape(HIDDEN, LP, OUT).transpose(1, 0, 2).reshape(CNN_FLAT, OUT)

    # PLM: fold surrogate-BERT table + BN into the 'same' conv.
    pw = jnp.concatenate([plm['emb'] @ plm['w1'][k] for k in range(3)], axis=0)
    pw = pw * plm['s1'][None, :]
    pt = plm['b1'] * plm['s1'] + plm['t1']

    # LSTM: combine directions (gate reorder), fold embedding into layer-1 W_ih.
    w1fc, w1bc, whh1, b1 = _combine_dirs(lstm['l1f'], lstm['l1b'], LSTM_H1)
    ew1 = jnp.concatenate([lstm['emb'] @ w1fc, lstm['emb'] @ w1bc], axis=0)   # (2V, G1)
    w2fc, w2bc, whh2, b2 = _combine_dirs(lstm['l2f'], lstm['l2b'], LSTM_H2)
    w2 = jnp.concatenate([w2fc, w2bc], axis=1)                                 # (H1C, 2*G2)
    b2e = jnp.concatenate([b2, jnp.zeros_like(b2)], axis=1)                    # bias once (fwd half)

    # ---- bf16 weight slab ----
    wslab = jnp.zeros((W_ROWS, W_COLS), jnp.float32)
    for name, mat in (("ew1", ew1), ("whh1", whh1), ("w2", w2), ("whh2", whh2),
                      ("cw1", cw1), ("cw2", cw2), ("clw", clw), ("pw", pw),
                      ("dw1", dec['w1']), ("dw2", dec['w2']), ("dw3", dec['w3'])):
        r, n, c = WOFF[name]
        assert mat.shape == (n, c), (name, mat.shape, (n, c))
        wslab = wslab.at[r:r + n, 0:c].set(mat)

    # ---- f32 bias slab ----
    bslab = jnp.zeros((B_ROWS, B_COLS), jnp.float32)
    for name, vec in (("b1", b1), ("b2", b2e), ("ct1", ct1), ("ct2", ct2),
                      ("clb", cnn['lb']), ("pt", pt), ("db1", dec['b1']),
                      ("db2", dec['b2']), ("db3", dec['b3'])):
        i, c = BOFF[name]
        vec = vec.reshape(-1)
        assert vec.shape[0] == c, (name, vec.shape, c)
        bslab = bslab.at[i, 0:c].set(vec)

    return dict(wslab=wslab.astype(jnp.bfloat16), bslab=bslab)


# ------------------------------ forward --------------------------------------
@jax.jit
def slamnet_forward(prep, input_ids, attention_mask):
    del attention_mask  # surrogate PLM branch ignores the mask (see TODO at top)
    ids = input_ids.astype(jnp.int32)
    ids3 = ids[:, :, None]                                            # (B, W, 1)
    ids_t = jnp.transpose(ids)                                        # (W, B) time-major
    pad = jnp.zeros((WIN, BP - B), jnp.int32)                         # padded batch rows
    ids_tm = jnp.concatenate([ids_t, pad], axis=1).reshape(WIN * BP, 1)
    ids_rev = jnp.concatenate([ids_t[::-1], pad], axis=1).reshape(WIN * BP, 1)

    return pl.pallas_call(
        _slamnet_kernel,
        out_shape=jax.ShapeDtypeStruct((B, 1), jnp.float32),
        scratch_shapes=[
            pltpu.VMEM((WIN * BP, G1), jnp.float32),       # layer-1 x@W_ih (both dirs)
            pltpu.VMEM((WIN * BP, LSTM_H1), jnp.float32),  # layer-1 fwd hidden states
            pltpu.VMEM((WIN * BP, LSTM_H1), jnp.float32),  # layer-1 bwd hidden states
            pltpu.VMEM((WIN * BP, G2), jnp.float32),       # layer-2 x@W_ih, fwd-dir cols
            pltpu.VMEM((WIN * BP, G2), jnp.float32),       # layer-2 x@W_ih, bwd-dir cols
        ],
    )(ids3, ids_tm, ids_rev, prep['wslab'], prep['bslab'])


# --------------------------------- main --------------------------------------
if __name__ == "__main__":
    key = jax.random.PRNGKey(0)
    pkey, dkey = jax.random.split(key)
    params = init_params(pkey)
    prep = prepare_params(params)

    input_ids = jax.random.randint(dkey, (B, WIN), 0, VOCAB, dtype=jnp.int32)
    attention_mask = jnp.ones((B, WIN), dtype=jnp.int32)

    probs = slamnet_forward(prep, input_ids, attention_mask)
    probs = jax.block_until_ready(probs)

    assert probs.shape == (B, 1)
    assert bool(jnp.all(jnp.isfinite(probs)))
    assert bool(jnp.all((probs >= 0.0) & (probs <= 1.0)))
    print("KERNEL_OK")
</pallas_src>

<mosaic_0001>
module attributes {stable_mosaic.version = 11 : i64} {
  func.func @_slamnet_kernel(%arg0: memref<2x16x1xi32, #tpu.memory_space<vmem>>, %arg1: memref<128x1xi32, #tpu.memory_space<vmem>>, %arg2: memref<128x1xi32, #tpu.memory_space<vmem>>, %arg3: memref<640x256xbf16, #tpu.memory_space<vmem>>, %arg4: memref<16x256xf32, #tpu.memory_space<vmem>>, %arg5: memref<2x1xf32, #tpu.memory_space<vmem>>, %arg6: memref<128x256xf32, #tpu.memory_space<vmem>>, %arg7: memref<128x32xf32, #tpu.memory_space<vmem>>, %arg8: memref<128x32xf32, #tpu.memory_space<vmem>>, %arg9: memref<128x32xf32, #tpu.memory_space<vmem>>, %arg10: memref<128x32xf32, #tpu.memory_space<vmem>>) attributes {dimension_semantics = [], scalar_prefetch = 0 : i64, scratch_operands = 5 : i64, tpu.core_type = #tpu.core_type<tc>} {
    %0 = tpu.iota {dimensions = array<i32: 2>} : vector<2x16x24xi32>
    %c0 = arith.constant 0 : index
    %c0_0 = arith.constant 0 : index
    %c0_1 = arith.constant 0 : index
    %1 = vector.load %arg0[%c0, %c0_0, %c0_1] : memref<2x16x1xi32, #tpu.memory_space<vmem>>, vector<2x16x1xi32>
    %2 = vector.broadcast %1 : vector<2x16x1xi32> to vector<2x16x24xi32>
    %3 = arith.cmpi eq, %2, %0 : vector<2x16x24xi32>
    %4 = arith.extui %3 : vector<2x16x24xi1> to vector<2x16x24xi32>
    %5 = arith.sitofp %4 : vector<2x16x24xi32> to vector<2x16x24xf32>
    %6 = tpu.iota {dimensions = array<i32: 1>} : vector<128x24xi32>
    %c0_2 = arith.constant 0 : index
    %c0_3 = arith.constant 0 : index
    %7 = vector.load %arg1[%c0_2, %c0_3] : memref<128x1xi32, #tpu.memory_space<vmem>>, vector<128x1xi32>
    %8 = vector.broadcast %7 : vector<128x1xi32> to vector<128x24xi32>
    %9 = arith.cmpi eq, %8, %6 : vector<128x24xi32>
    %10 = arith.extui %9 : vector<128x24xi1> to vector<128x24xi32>
    %11 = arith.sitofp %10 : vector<128x24xi32> to vector<128x24xf32>
    %c0_4 = arith.constant 0 : index
    %c0_5 = arith.constant 0 : index
    %12 = vector.load %arg2[%c0_4, %c0_5] : memref<128x1xi32, #tpu.memory_space<vmem>>, vector<128x1xi32>
    %13 = vector.broadcast %12 : vector<128x1xi32> to vector<128x24xi32>
    %14 = arith.cmpi eq, %13, %6 : vector<128x24xi32>
    %15 = arith.extui %14 : vector<128x24xi1> to vector<128x24xi32>
    %16 = arith.sitofp %15 : vector<128x24xi32> to vector<128x24xf32>
    %17 = vector.extract_strided_slice %5 {offsets = [0, 0, 0], sizes = [2, 14, 24], strides = [1, 1, 1]} : vector<2x16x24xf32> to vector<2x14x24xf32>
    %18 = vector.extract_strided_slice %5 {offsets = [0, 1, 0], sizes = [2, 14, 24], strides = [1, 1, 1]} : vector<2x16x24xf32> to vector<2x14x24xf32>
    %19 = vector.extract_strided_slice %5 {offsets = [0, 2, 0], sizes = [2, 14, 24], strides = [1, 1, 1]} : vector<2x16x24xf32> to vector<2x14x24xf32>
    %20 = tpu.concatenate %17, %18, %19 in 2 : vector<2x14x24xf32>, vector<2x14x24xf32>, vector<2x14x24xf32> -> vector<2x14x72xf32>
    %21 = arith.truncf %20 : vector<2x14x72xf32> to vector<2x14x72xbf16>
    %c192 = arith.constant 192 : index
    %c0_6 = arith.constant 0 : index
    %22 = vector.load %arg3[%c192, %c0_6] : memref<640x256xbf16, #tpu.memory_space<vmem>>, vector<72x16xbf16>
    %cst = arith.constant dense<0.000000e+00> : vector<2x14x16xf32>
    %23 = tpu.matmul %21, %22, %cst {dimension_numbers = #tpu.dot_dimension_numbers<[2], [0], [0, 1], [1], [0, 0, 0, 1, 1, 1], [], []>} : vector<2x14x72xbf16>, vector<72x16xbf16>, vector<2x14x16xf32> -> vector<2x14x16xf32>
    %c2 = arith.constant 2 : index
    %c0_7 = arith.constant 0 : index
    %24 = vector.load %arg4[%c2, %c0_7] : memref<16x256xf32, #tpu.memory_space<vmem>>, vector<1x16xf32>
    %25 = vector.shape_cast %24 : vector<1x16xf32> to vector<1x1x16xf32>
    %26 = vector.broadcast %25 : vector<1x1x16xf32> to vector<2x14x16xf32>
    %27 = arith.addf %23, %26 : vector<2x14x16xf32>
    %cst_8 = arith.constant 0.000000e+00 : f32
    %28 = vector.broadcast %cst_8 : f32 to vector<2x14x16xf32>
    %29 = arith.maximumf %27, %28 : vector<2x14x16xf32>
    %30 = vector.extract_strided_slice %29 {offsets = [0, 0, 0], sizes = [2, 12, 16], strides = [1, 1, 1]} : vector<2x14x16xf32> to vector<2x12x16xf32>
    %31 = vector.extract_strided_slice %29 {offsets = [0, 1, 0], sizes = [2, 12, 16], strides = [1, 1, 1]} : vector<2x14x16xf32> to vector<2x12x16xf32>
    %32 = vector.extract_strided_slice %29 {offsets = [0, 2, 0], sizes = [2, 12, 16], strides = [1, 1, 1]} : vector<2x14x16xf32> to vector<2x12x16xf32>
    %33 = tpu.concatenate %30, %31, %32 in 2 : vector<2x12x16xf32>, vector<2x12x16xf32>, vector<2x12x16xf32> -> vector<2x12x48xf32>
    %34 = arith.truncf %33 : vector<2x12x48xf32> to vector<2x12x48xbf16>
    %c272 = arith.constant 272 : index
    %c0_9 = arith.constant 0 : index
    %35 = vector.load %arg3[%c272, %c0_9] : memref<640x256xbf16, #tpu.memory_space<vmem>>, vector<48x16xbf16>
    %cst_10 = arith.constant dense<0.000000e+00> : vector<2x12x16xf32>
    %36 = tpu.matmul %34, %35, %cst_10 {dimension_numbers = #tpu.dot_dimension_numbers<[2], [0], [0, 1], [1], [0, 0, 0, 1, 1, 1], [], []>} : vector<2x12x48xbf16>, vector<48x16xbf16>, vector<2x12x16xf32> -> vector<2x12x16xf32>
    %c3 = arith.constant 3 : index
    %c0_11 = arith.constant 0 : index
    %37 = vector.load %arg4[%c3, %c0_11] : memref<16x256xf32, #tpu.memory_space<vmem>>, vector<1x16xf32>
    %38 = vector.shape_cast %37 : vector<1x16xf32> to vector<1x1x16xf32>
    %39 = vector.broadcast %38 : vector<1x1x16xf32> to vector<2x12x16xf32>
    %40 = arith.addf %36, %39 : vector<2x12x16xf32>
    %cst_12 = arith.constant 0.000000e+00 : f32
    %41 = vector.broadcast %cst_12 : f32 to vector<2x12x16xf32>
    %42 = arith.maximumf %40, %41 : vector<2x12x16xf32>
    %43 = vector.extract_strided_slice %42 {offsets = [0, 0, 0], sizes = [2, 10, 16], strides = [1, 1, 1]} : vector<2x12x16xf32> to vector<2x10x16xf32>
    %44 = vector.extract_strided_slice %42 {offsets = [0, 1, 0], sizes = [2, 10, 16], strides = [1, 1, 1]} : vector<2x12x16xf32> to vector<2x10x16xf32>
    %45 = arith.addf %43, %44 : vector<2x10x16xf32>
    %46 = vector.extract_strided_slice %42 {offsets = [0, 2, 0], sizes = [2, 10, 16], strides = [1, 1, 1]} : vector<2x12x16xf32> to vector<2x10x16xf32>
    %47 = arith.addf %45, %46 : vector<2x10x16xf32>
    %cst_13 = arith.constant 0.333333343 : f32
    %48 = vector.broadcast %cst_13 : f32 to vector<2x10x16xf32>
    %49 = arith.mulf %47, %48 : vector<2x10x16xf32>
    %50 = vector.extract_strided_slice %49 {offsets = [0, 0, 0], sizes = [2, 1, 16], strides = [1, 1, 1]} : vector<2x10x16xf32> to vector<2x1x16xf32>
    %51 = vector.shape_cast %50 : vector<2x1x16xf32> to vector<2x16xf32>
    %52 = vector.extract_strided_slice %49 {offsets = [0, 1, 0], sizes = [2, 1, 16], strides = [1, 1, 1]} : vector<2x10x16xf32> to vector<2x1x16xf32>
    %53 = vector.shape_cast %52 : vector<2x1x16xf32> to vector<2x16xf32>
    %54 = vector.extract_strided_slice %49 {offsets = [0, 2, 0], sizes = [2, 1, 16], strides = [1, 1, 1]} : vector<2x10x16xf32> to vector<2x1x16xf32>
    %55 = vector.shape_cast %54 : vector<2x1x16xf32> to vector<2x16xf32>
    %56 = vector.extract_strided_slice %49 {offsets = [0, 3, 0], sizes = [2, 1, 16], strides = [1, 1, 1]} : vector<2x10x16xf32> to vector<2x1x16xf32>
    %57 = vector.shape_cast %56 : vector<2x1x16xf32> to vector<2x16xf32>
    %58 = vector.extract_strided_slice %49 {offsets = [0, 4, 0], sizes = [2, 1, 16], strides = [1, 1, 1]} : vector<2x10x16xf32> to vector<2x1x16xf32>
    %59 = vector.shape_cast %58 : vector<2x1x16xf32> to vector<2x16xf32>
    %60 = vector.extract_strided_slice %49 {offsets = [0, 5, 0], sizes = [2, 1, 16], strides = [1, 1, 1]} : vector<2x10x16xf32> to vector<2x1x16xf32>
    %61 = vector.shape_cast %60 : vector<2x1x16xf32> to vector<2x16xf32>
    %62 = vector.extract_strided_slice %49 {offsets = [0, 6, 0], sizes = [2, 1, 16], strides = [1, 1, 1]} : vector<2x10x16xf32> to vector<2x1x16xf32>
    %63 = vector.shape_cast %62 : vector<2x1x16xf32> to vector<2x16xf32>
    %64 = vector.extract_strided_slice %49 {offsets = [0, 7, 0], sizes = [2, 1, 16], strides = [1, 1, 1]} : vector<2x10x16xf32> to vector<2x1x16xf32>
    %65 = vector.shape_cast %64 : vector<2x1x16xf32> to vector<2x16xf32>
    %66 = vector.extract_strided_slice %49 {offsets = [0, 8, 0], sizes = [2, 1, 16], strides = [1, 1, 1]} : vector<2x10x16xf32> to vector<2x1x16xf32>
    %67 = vector.shape_cast %66 : vector<2x1x16xf32> to vector<2x16xf32>
    %68 = vector.extract_strided_slice %49 {offsets = [0, 9, 0], sizes = [2, 1, 16], strides = [1, 1, 1]} : vector<2x10x16xf32> to vector<2x1x16xf32>
    %69 = vector.shape_cast %68 : vector<2x1x16xf32> to vector<2x16xf32>
    %70 = tpu.concatenate %51, %53, %55, %57, %59, %61, %63, %65, %67, %69 in 1 : vector<2x16xf32>, vector<2x16xf32>, vector<2x16xf32>, vector<2x16xf32>, vector<2x16xf32>, vector<2x16xf32>, vector<2x16xf32>, vector<2x16xf32>, vector<2x16xf32>, vector<2x16xf32> -> vector<2x160xf32>
    %71 = arith.truncf %70 : vector<2x160xf32> to vector<2x160xbf16>
    %c320 = arith.constant 320 : index
    %c0_14 = arith.constant 0 : index
    %72 = vector.load %arg3[%c320, %c0_14] : memref<640x256xbf16, #tpu.memory_space<vmem>>, vector<160x8xbf16>
    %cst_15 = arith.constant dense<0.000000e+00> : vector<2x8xf32>
    %73 = tpu.matmul %71, %72, %cst_15 {dimension_numbers = #tpu.dot_dimension_numbers<[1], [0], [0], [1], [0, 0, 1, 1], [], []>} : vector<2x160xbf16>, vector<160x8xbf16>, vector<2x8xf32> -> vector<2x8xf32>
    %c4 = arith.constant 4 : index
    %c0_16 = arith.constant 0 : index
    %74 = vector.load %arg4[%c4, %c0_16] : memref<16x256xf32, #tpu.memory_space<vmem>>, vector<1x8xf32>
    %75 = vector.broadcast %74 : vector<1x8xf32> to vector<2x8xf32>
    %76 = arith.addf %73, %75 : vector<2x8xf32>
    %cst_17 = arith.constant 0.000000e+00 : f32
    %77 = vector.broadcast %cst_17 : f32 to vector<2x8xf32>
    %78 = arith.maximumf %76, %77 : vector<2x8xf32>
    %cst_18 = arith.constant 0.000000e+00 : f32
    %79 = vector.broadcast %cst_18 : f32 to vector<2x1x24xf32>
    %80 = tpu.concatenate %79, %5, %79 in 1 : vector<2x1x24xf32>, vector<2x16x24xf32>, vector<2x1x24xf32> -> vector<2x18x24xf32>
    %81 = vector.extract_strided_slice %80 {offsets = [0, 0, 0], sizes = [2, 16, 24], strides = [1, 1, 1]} : vector<2x18x24xf32> to vector<2x16x24xf32>
    %82 = vector.extract_strided_slice %80 {offsets = [0, 1, 0], sizes = [2, 16, 24], strides = [1, 1, 1]} : vector<2x18x24xf32> to vector<2x16x24xf32>
    %83 = vector.extract_strided_slice %80 {offsets = [0, 2, 0], sizes = [2, 16, 24], strides = [1, 1, 1]} : vector<2x18x24xf32> to vector<2x16x24xf32>
    %84 = tpu.concatenate %81, %82, %83 in 2 : vector<2x16x24xf32>, vector<2x16x24xf32>, vector<2x16x24xf32> -> vector<2x16x72xf32>
    %85 = arith.truncf %84 : vector<2x16x72xf32> to vector<2x16x72xbf16>
    %c480 = arith.constant 480 : index
    %c0_19 = arith.constant 0 : index
    %86 = vector.load %arg3[%c480, %c0_19] : memref<640x256xbf16, #tpu.memory_space<vmem>>, vector<72x8xbf16>
    %cst_20 = arith.constant dense<0.000000e+00> : vector<2x16x8xf32>
    %87 = tpu.matmul %85, %86, %cst_20 {dimension_numbers = #tpu.dot_dimension_numbers<[2], [0], [0, 1], [1], [0, 0, 0, 1, 1, 1], [], []>} : vector<2x16x72xbf16>, vector<72x8xbf16>, vector<2x16x8xf32> -> vector<2x16x8xf32>
    %c5 = arith.constant 5 : index
    %c0_21 = arith.constant 0 : index
    %88 = vector.load %arg4[%c5, %c0_21] : memref<16x256xf32, #tpu.memory_space<vmem>>, vector<1x8xf32>
    %89 = vector.shape_cast %88 : vector<1x8xf32> to vector<1x1x8xf32>
    %90 = vector.broadcast %89 : vector<1x1x8xf32> to vector<2x16x8xf32>
    %91 = arith.addf %87, %90 : vector<2x16x8xf32>
    %cst_22 = arith.constant 0.000000e+00 : f32
    %92 = vector.broadcast %cst_22 : f32 to vector<2x16x8xf32>
    %93 = arith.maximumf %91, %92 : vector<2x16x8xf32>
    %cst_23 = arith.constant dense<0.000000e+00> : vector<2x8xf32>
    %94 = vector.multi_reduction <add>, %93, %cst_23 [1] : vector<2x16x8xf32> to vector<2x8xf32>
    %cst_24 = arith.constant 6.250000e-02 : f32
    %95 = vector.broadcast %cst_24 : f32 to vector<2x8xf32>
    %96 = arith.mulf %94, %95 : vector<2x8xf32>
    %97 = tpu.concatenate %11, %16 in 1 : vector<128x24xf32>, vector<128x24xf32> -> vector<128x48xf32>
    %98 = arith.truncf %97 : vector<128x48xf32> to vector<128x48xbf16>
    %c0_25 = arith.constant 0 : index
    %c0_26 = arith.constant 0 : index
    %99 = vector.load %arg3[%c0_25, %c0_26] : memref<640x256xbf16, #tpu.memory_space<vmem>>, vector<48x256xbf16>
    %cst_27 = arith.constant dense<0.000000e+00> : vector<128x256xf32>
    %100 = tpu.matmul %98, %99, %cst_27 {dimension_numbers = #tpu.dot_dimension_numbers<[1], [0], [0], [1], [0, 0, 1, 1], [], []>} : vector<128x48xbf16>, vector<48x256xbf16>, vector<128x256xf32> -> vector<128x256xf32>
    %c0_28 = arith.constant 0 : index
    %c0_29 = arith.constant 0 : index
    %101 = vector.load %arg4[%c0_28, %c0_29] : memref<16x256xf32, #tpu.memory_space<vmem>>, vector<1x256xf32>
    %102 = vector.broadcast %101 : vector<1x256xf32> to vector<128x256xf32>
    %103 = arith.addf %100, %102 : vector<128x256xf32>
    %c0_30 = arith.constant 0 : index
    %c0_31 = arith.constant 0 : index
    %104 = vector.load %arg6[%c0_30, %c0_31] : memref<128x256xf32, #tpu.memory_space<vmem>>, vector<128x256xf32>
    tpu.vector_store %arg6[%c0_30, %c0_31], %103 {strides = array<i32>} : memref<128x256xf32, #tpu.memory_space<vmem>>, vector<128x256xf32>,
    %c48 = arith.constant 48 : index
    %c0_32 = arith.constant 0 : index
    %105 = vector.load %arg3[%c48, %c0_32] : memref<640x256xbf16, #tpu.memory_space<vmem>>, vector<64x256xbf16>
    %cst_33 = arith.constant 0.000000e+00 : f32
    %106 = vector.broadcast %cst_33 : f32 to vector<8x64xf32>
    %c0_34 = arith.constant 0 : index
    %c0_35 = arith.constant 0 : index
    %107 = vector.load %arg6[%c0_34, %c0_35] : memref<128x256xf32, #tpu.memory_space<vmem>>, vector<8x256xf32>
    %108 = vector.extract_strided_slice %107 {offsets = [0, 0], sizes = [8, 192], strides = [1, 1]} : vector<8x256xf32> to vector<8x192xf32>
    %109 = arith.negf %108 : vector<8x192xf32>
    %110 = math.exp %109 : vector<8x192xf32>
    %cst_36 = arith.constant 1.000000e+00 : f32
    %111 = vector.broadcast %cst_36 : f32 to vector<8x192xf32>
    %112 = arith.addf %111, %110 : vector<8x192xf32>
    %113 = arith.divf %111, %112 : vector<8x192xf32>
    %114 = vector.extract_strided_slice %107 {offsets = [0, 192], sizes = [8, 64], strides = [1, 1]} : vector<8x256xf32> to vector<8x64xf32>
    %115 = math.tanh %114 : vector<8x64xf32>
    %116 = vector.extract_strided_slice %113 {offsets = [0, 64], sizes = [8, 64], strides = [1, 1]} : vector<8x192xf32> to vector<8x64xf32>
    %117 = arith.mulf %116, %106 : vector<8x64xf32>
    %118 = vector.extract_strided_slice %113 {offsets = [0, 0], sizes = [8, 64], strides = [1, 1]} : vector<8x192xf32> to vector<8x64xf32>
    %119 = arith.mulf %118, %115 : vector<8x64xf32>
    %120 = arith.addf %117, %119 : vector<8x64xf32>
    %121 = vector.extract_strided_slice %113 {offsets = [0, 128], sizes = [8, 64], strides = [1, 1]} : vector<8x192xf32> to vector<8x64xf32>
    %122 = math.tanh %120 : vector<8x64xf32>
    %123 = arith.mulf %121, %122 : vector<8x64xf32>
    %124 = vector.extract_strided_slice %123 {offsets = [0, 0], sizes = [8, 32], strides = [1, 1]} : vector<8x64xf32> to vector<8x32xf32>
    %c0_37 = arith.constant 0 : index
    %c0_38 = arith.constant 0 : index
    %125 = vector.load %arg7[%c0_37, %c0_38] : memref<128x32xf32, #tpu.memory_space<vmem>>, vector<8x32xf32>
    tpu.vector_store %arg7[%c0_37, %c0_38], %124 {strides = array<i32>} : memref<128x32xf32, #tpu.memory_space<vmem>>, vector<8x32xf32>,
    %126 = vector.extract_strided_slice %123 {offsets = [0, 32], sizes = [8, 32], strides = [1, 1]} : vector<8x64xf32> to vector<8x32xf32>
    %c120 = arith.constant 120 : index
    %c0_39 = arith.constant 0 : index
    %127 = vector.load %arg8[%c120, %c0_39] : memref<128x32xf32, #tpu.memory_space<vmem>>, vector<8x32xf32>
    tpu.vector_store %arg8[%c120, %c0_39], %126 {strides = array<i32>} : memref<128x32xf32, #tpu.memory_space<vmem>>, vector<8x32xf32>,
    %128 = arith.truncf %123 : vector<8x64xf32> to vector<8x64xbf16>
    %c8 = arith.constant 8 : index
    %c0_40 = arith.constant 0 : index
    %129 = vector.load %arg6[%c8, %c0_40] : memref<128x256xf32, #tpu.memory_space<vmem>>, vector<8x256xf32>
    %cst_41 = arith.constant dense<0.000000e+00> : vector<8x256xf32>
    %130 = tpu.matmul %128, %105, %cst_41 {dimension_numbers = #tpu.dot_dimension_numbers<[1], [0], [0], [1], [0, 0, 1, 1], [], []>} : vector<8x64xbf16>, vector<64x256xbf16>, vector<8x256xf32> -> vector<8x256xf32>
    %131 = arith.addf %129, %130 : vector<8x256xf32>
    %132 = vector.extract_strided_slice %131 {offsets = [0, 0], sizes = [8, 192], strides = [1, 1]} : vector<8x256xf32> to vector<8x192xf32>
    %133 = arith.negf %132 : vector<8x192xf32>
    %134 = math.exp %133 : vector<8x192xf32>
    %cst_42 = arith.constant 1.000000e+00 : f32
    %135 = vector.broadcast %cst_42 : f32 to vector<8x192xf32>
    %136 = arith.addf %135, %134 : vector<8x192xf32>
    %137 = arith.divf %135, %136 : vector<8x192xf32>
    %138 = vector.extract_strided_slice %131 {offsets = [0, 192], sizes = [8, 64], strides = [1, 1]} : vector<8x256xf32> to vector<8x64xf32>
    %139 = math.tanh %138 : vector<8x64xf32>
    %140 = vector.extract_strided_slice %137 {offsets = [0, 64], sizes = [8, 64], strides = [1, 1]} : vector<8x192xf32> to vector<8x64xf32>
    %141 = arith.mulf %140, %120 : vector<8x64xf32>
    %142 = vector.extract_strided_slice %137 {offsets = [0, 0], sizes = [8, 64], strides = [1, 1]} : vector<8x192xf32> to vector<8x64xf32>
    %143 = arith.mulf %142, %139 : vector<8x64xf32>
    %144 = arith.addf %141, %143 : vector<8x64xf32>
    %145 = vector.extract_strided_slice %137 {offsets = [0, 128], sizes = [8, 64], strides = [1, 1]} : vector<8x192xf32> to vector<8x64xf32>
    %146 = math.tanh %144 : vector<8x64xf32>
    %147 = arith.mulf %145, %146 : vector<8x64xf32>
    %148 = vector.extract_strided_slice %147 {offsets = [0, 0], sizes = [8, 32], strides = [1, 1]} : vector<8x64xf32> to vector<8x32xf32>
    %c8_43 = arith.constant 8 : index
    %c0_44 = arith.constant 0 : index
    %149 = vector.load %arg7[%c8_43, %c0_44] : memref<128x32xf32, #tpu.memory_space<vmem>>, vector<8x32xf32>
    tpu.vector_store %arg7[%c8_43, %c0_44], %148 {strides = array<i32>} : memref<128x32xf32, #tpu.memory_space<vmem>>, vector<8x32xf32>,
    %150 = vector.extract_strided_slice %147 {offsets = [0, 32], sizes = [8, 32], strides = [1, 1]} : vector<8x64xf32> to vector<8x32xf32>
    %c112 = arith.constant 112 : index
    %c0_45 = arith.constant 0 : index
    %151 = vector.load %arg8[%c112, %c0_45] : memref<128x32xf32, #tpu.memory_space<vmem>>, vector<8x32xf32>
    tpu.vector_store %arg8[%c112, %c0_45], %150 {strides = array<i32>} : memref<128x32xf32, #tpu.memory_space<vmem>>, vector<8x32xf32>,
    %152 = arith.truncf %147 : vector<8x64xf32> to vector<8x64xbf16>
    %c16 = arith.constant 16 : index
    %c0_46 = arith.constant 0 : index
    %153 = vector.load %arg6[%c16, %c0_46] : memref<128x256xf32, #tpu.memory_space<vmem>>, vector<8x256xf32>
    %cst_47 = arith.constant dense<0.000000e+00> : vector<8x256xf32>
    %154 = tpu.matmul %152, %105, %cst_47 {dimension_numbers = #tpu.dot_dimension_numbers<[1], [0], [0], [1], [0, 0, 1, 1], [], []>} : vector<8x64xbf16>, vector<64x256xbf16>, vector<8x256xf32> -> vector<8x256xf32>
    %155 = arith.addf %153, %154 : vector<8x256xf32>
    %156 = vector.extract_strided_slice %155 {offsets = [0, 0], sizes = [8, 192], strides = [1, 1]} : vector<8x256xf32> to vector<8x192xf32>
    %157 = arith.negf %156 : vector<8x192xf32>
    %158 = math.exp %157 : vector<8x192xf32>
    %cst_48 = arith.constant 1.000000e+00 : f32
    %159 = vector.broadcast %cst_48 : f32 to vector<8x192xf32>
    %160 = arith.addf %159, %158 : vector<8x192xf32>
    %161 = arith.divf %159, %160 : vector<8x192xf32>
    %162 = vector.extract_strided_slice %155 {offsets = [0, 192], sizes = [8, 64], strides = [1, 1]} : vector<8x256xf32> to vector<8x64xf32>
    %163 = math.tanh %162 : vector<8x64xf32>
    %164 = vector.extract_strided_slice %161 {offsets = [0, 64], sizes = [8, 64], strides = [1, 1]} : vector<8x192xf32> to vector<8x64xf32>
    %165 = arith.mulf %164, %144 : vector<8x64xf32>
    %166 = vector.extract_strided_slice %161 {offsets = [0, 0], sizes = [8, 64], strides = [1, 1]} : vector<8x192xf32> to vector<8x64xf32>
    %167 = arith.mulf %166, %163 : vector<8x64xf32>
    %168 = arith.addf %165, %167 : vector<8x64xf32>
    %169 = vector.extract_strided_slice %161 {offsets = [0, 128], sizes = [8, 64], strides = [1, 1]} : vector<8x192xf32> to vector<8x64xf32>
    %170 = math.tanh %168 : vector<8x64xf32>
    %171 = arith.mulf %169, %170 : vector<8x64xf32>
    %172 = vector.extract_strided_slice %171 {offsets = [0, 0], sizes = [8, 32], strides = [1, 1]} : vector<8x64xf32> to vector<8x32xf32>
    %c16_49 = arith.constant 16 : index
    %c0_50 = arith.constant 0 : index
    %173 = vector.load %arg7[%c16_49, %c0_50] : memref<128x32xf32, #tpu.memory_space<vmem>>, vector<8x32xf32>
    tpu.vector_store %arg7[%c16_49, %c0_50], %172 {strides = array<i32>} : memref<128x32xf32, #tpu.memory_space<vmem>>, vector<8x32xf32>,
    %174 = vector.extract_strided_slice %171 {offsets = [0, 32], sizes = [8, 32], strides = [1, 1]} : vector<8x64xf32> to vector<8x32xf32>
    %c104 = arith.constant 104 : index
    %c0_51 = arith.constant 0 : index
    %175 = vector.load %arg8[%c104, %c0_51] : memref<128x32xf32, #tpu.memory_space<vmem>>, vector<8x32xf32>
    tpu.vector_store %arg8[%c104, %c0_51], %174 {strides = array<i32>} : memref<128x32xf32, #tpu.memory_space<vmem>>, vector<8x32xf32>,
    %176 = arith.truncf %171 : vector<8x64xf32> to vector<8x64xbf16>
    %c24 = arith.constant 24 : index
    %c0_52 = arith.constant 0 : index
    %177 = vector.load %arg6[%c24, %c0_52] : memref<128x256xf32, #tpu.memory_space<vmem>>, vector<8x256xf32>
    %cst_53 = arith.constant dense<0.000000e+00> : vector<8x256xf32>
    %178 = tpu.matmul %176, %105, %cst_53 {dimension_numbers = #tpu.dot_dimension_numbers<[1], [0], [0], [1], [0, 0, 1, 1], [], []>} : vector<8x64xbf16>, vector<64x256xbf16>, vector<8x256xf32> -> vector<8x256xf32>
    %179 = arith.addf %177, %178 : vector<8x256xf32>
    %180 = vector.extract_strided_slice %179 {offsets = [0, 0], sizes = [8, 192], strides = [1, 1]} : vector<8x256xf32> to vector<8x192xf32>
    %181 = arith.negf %180 : vector<8x192xf32>
    %182 = math.exp %181 : vector<8x192xf32>
    %cst_54 = arith.constant 1.000000e+00 : f32
    %183 = vector.broadcast %cst_54 : f32 to vector<8x192xf32>
    %184 = arith.addf %183, %182 : vector<8x192xf32>
    %185 = arith.divf %183, %184 : vector<8x192xf32>
    %186 = vector.extract_strided_slice %179 {offsets = [0, 192], sizes = [8, 64], strides = [1, 1]} : vector<8x256xf32> to vector<8x64xf32>
    %187 = math.tanh %186 : vector<8x64xf32>
    %188 = vector.extract_strided_slice %185 {offsets = [0, 64], sizes = [8, 64], strides = [1, 1]} : vector<8x192xf32> to vector<8x64xf32>
    %189 = arith.mulf %188, %168 : vector<8x64xf32>
    %190 = vector.extract_strided_slice %185 {offsets = [0, 0], sizes = [8, 64], strides = [1, 1]} : vector<8x192xf32> to vector<8x64xf32>
    %191 = arith.mulf %190, %187 : vector<8x64xf32>
    %192 = arith.addf %189, %191 : vector<8x64xf32>
    %193 = vector.extract_strided_slice %185 {offsets = [0, 128], sizes = [8, 64], strides = [1, 1]} : vector<8x192xf32> to vector<8x64xf32>
    %194 = math.tanh %192 : vector<8x64xf32>
    %195 = arith.mulf %193, %194 : vector<8x64xf32>
    %196 = vector.extract_strided_slice %195 {offsets = [0, 0], sizes = [8, 32], strides = [1, 1]} : vector<8x64xf32> to vector<8x32xf32>
    %c24_55 = arith.constant 24 : index
    %c0_56 = arith.constant 0 : index
    %197 = vector.load %arg7[%c24_55, %c0_56] : memref<128x32xf32, #tpu.memory_space<vmem>>, vector<8x32xf32>
    tpu.vector_store %arg7[%c24_55, %c0_56], %196 {strides = array<i32>} : memref<128x32xf32, #tpu.memory_space<vmem>>, vector<8x32xf32>,
    %198 = vector.extract_strided_slice %195 {offsets = [0, 32], sizes = [8, 32], strides = [1, 1]} : vector<8x64xf32> to vector<8x32xf32>
    %c96 = arith.constant 96 : index
    %c0_57 = arith.constant 0 : index
    %199 = vector.load %arg8[%c96, %c0_57] : memref<128x32xf32, #tpu.memory_space<vmem>>, vector<8x32xf32>
    tpu.vector_store %arg8[%c96, %c0_57], %198 {strides = array<i32>} : memref<128x32xf32, #tpu.memory_space<vmem>>, vector<8x32xf32>,
    %200 = arith.truncf %195 : vector<8x64xf32> to vector<8x64xbf16>
    %c32 = arith.constant 32 : index
    %c0_58 = arith.constant 0 : index
    %201 = vector.load %arg6[%c32, %c0_58] : memref<128x256xf32, #tpu.memory_space<vmem>>, vector<8x256xf32>
    %cst_59 = arith.constant dense<0.000000e+00> : vector<8x256xf32>
    %202 = tpu.matmul %200, %105, %cst_59 {dimension_numbers = #tpu.dot_dimension_numbers<[1], [0], [0], [1], [0, 0, 1, 1], [], []>} : vector<8x64xbf16>, vector<64x256xbf16>, vector<8x256xf32> -> vector<8x256xf32>
    %203 = arith.addf %201, %202 : vector<8x256xf32>
    %204 = vector.extract_strided_slice %203 {offsets = [0, 0], sizes = [8, 192], strides = [1, 1]} : vector<8x256xf32> to vector<8x192xf32>
    %205 = arith.negf %204 : vector<8x192xf32>
    %206 = math.exp %205 : vector<8x192xf32>
    %cst_60 = arith.constant 1.000000e+00 : f32
    %207 = vector.broadcast %cst_60 : f32 to vector<8x192xf32>
    %208 = arith.addf %207, %206 : vector<8x192xf32>
    %209 = arith.divf %207, %208 : vector<8x192xf32>
    %210 = vector.extract_strided_slice %203 {offsets = [0, 192], sizes = [8, 64], strides = [1, 1]} : vector<8x256xf32> to vector<8x64xf32>
    %211 = math.tanh %210 : vector<8x64xf32>
    %212 = vector.extract_strided_slice %209 {offsets = [0, 64], sizes = [8, 64], strides = [1, 1]} : vector<8x192xf32> to vector<8x64xf32>
    %213 = arith.mulf %212, %192 : vector<8x64xf32>
    %214 = vector.extract_strided_slice %209 {offsets = [0, 0], sizes = [8, 64], strides = [1, 1]} : vector<8x192xf32> to vector<8x64xf32>
    %215 = arith.mulf %214, %211 : vector<8x64xf32>
    %216 = arith.addf %213, %215 : vector<8x64xf32>
    %217 = vector.extract_strided_slice %209 {offsets = [0, 128], sizes = [8, 64], strides = [1, 1]} : vector<8x192xf32> to vector<8x64xf32>
    %218 = math.tanh %216 : vector<8x64xf32>
    %219 = arith.mulf %217, %218 : vector<8x64xf32>
    %220 = vector.extract_strided_slice %219 {offsets = [0, 0], sizes = [8, 32], strides = [1, 1]} : vector<8x64xf32> to vector<8x32xf32>
    %c32_61 = arith.constant 32 : index
    %c0_62 = arith.constant 0 : index
    %221 = vector.load %arg7[%c32_61, %c0_62] : memref<128x32xf32, #tpu.memory_space<vmem>>, vector<8x32xf32>
    tpu.vector_store %arg7[%c32_61, %c0_62], %220 {strides = array<i32>} : memref<128x32xf32, #tpu.memory_space<vmem>>, vector<8x32xf32>,
    %222 = vector.extract_strided_slice %219 {offsets = [0, 32], sizes = [8, 32], strides = [1, 1]} : vector<8x64xf32> to vector<8x32xf32>
    %c88 = arith.constant 88 : index
    %c0_63 = arith.constant 0 : index
    %223 = vector.load %arg8[%c88, %c0_63] : memref<128x32xf32, #tpu.memory_space<vmem>>, vector<8x32xf32>
    tpu.vector_store %arg8[%c88, %c0_63], %222 {strides = array<i32>} : memref<128x32xf32, #tpu.memory_space<vmem>>, vector<8x32xf32>,
    %224 = arith.truncf %219 : vector<8x64xf32> to vector<8x64xbf16>
    %c40 = arith.constant 40 : index
    %c0_64 = arith.constant 0 : index
    %225 = vector.load %arg6[%c40, %c0_64] : memref<128x256xf32, #tpu.memory_space<vmem>>, vector<8x256xf32>
    %cst_65 = arith.constant dense<0.000000e+00> : vector<8x256xf32>
    %226 = tpu.matmul %224, %105, %cst_65 {dimension_numbers = #tpu.dot_dimension_numbers<[1], [0], [0], [1], [0, 0, 1, 1], [], []>} : vector<8x64xbf16>, vector<64x256xbf16>, vector<8x256xf32> -> vector<8x256xf32>
    %227 = arith.addf %225, %226 : vector<8x256xf32>
    %228 = vector.extract_strided_slice %227 {offsets = [0, 0], sizes = [8, 192], strides = [1, 1]} : vector<8x256xf32> to vector<8x192xf32>
    %229 = arith.negf %228 : vector<8x192xf32>
    %230 = math.exp %229 : vector<8x192xf32>
    %cst_66 = arith.constant 1.000000e+00 : f32
    %231 = vector.broadcast %cst_66 : f32 to vector<8x192xf32>
    %232 = arith.addf %231, %230 : vector<8x192xf32>
    %233 = arith.divf %231, %232 : vector<8x192xf32>
    %234 = vector.extract_strided_slice %227 {offsets = [0, 192], sizes = [8, 64], strides = [1, 1]} : vector<8x256xf32> to vector<8x64xf32>
    %235 = math.tanh %234 : vector<8x64xf32>
    %236 = vector.extract_strided_slice %233 {offsets = [0, 64], sizes = [8, 64], strides = [1, 1]} : vector<8x192xf32> to vector<8x64xf32>
    %237 = arith.mulf %236, %216 : vector<8x64xf32>
    %238 = vector.extract_strided_slice %233 {offsets = [0, 0], sizes = [8, 64], strides = [1, 1]} : vector<8x192xf32> to vector<8x64xf32>
    %239 = arith.mulf %238, %235 : vector<8x64xf32>
    %240 = arith.addf %237, %239 : vector<8x64xf32>
    %241 = vector.extract_strided_slice %233 {offsets = [0, 128], sizes = [8, 64], strides = [1, 1]} : vector<8x192xf32> to vector<8x64xf32>
    %242 = math.tanh %240 : vector<8x64xf32>
    %243 = arith.mulf %241, %242 : vector<8x64xf32>
    %244 = vector.extract_strided_slice %243 {offsets = [0, 0], sizes = [8, 32], strides = [1, 1]} : vector<8x64xf32> to vector<8x32xf32>
    %c40_67 = arith.constant 40 : index
    %c0_68 = arith.constant 0 : index
    %245 = vector.load %arg7[%c40_67, %c0_68] : memref<128x32xf32, #tpu.memory_space<vmem>>, vector<8x32xf32>
    tpu.vector_store %arg7[%c40_67, %c0_68], %244 {strides = array<i32>} : memref<128x32xf32, #tpu.memory_space<vmem>>, vector<8x32xf32>,
    %246 = vector.extract_strided_slice %243 {offsets = [0, 32], sizes = [8, 32], strides = [1, 1]} : vector<8x64xf32> to vector<8x32xf32>
    %c80 = arith.constant 80 : index
    %c0_69 = arith.constant 0 : index
    %247 = vector.load %arg8[%c80, %c0_69] : memref<128x32xf32, #tpu.memory_space<vmem>>, vector<8x32xf32>
    tpu.vector_store %arg8[%c80, %c0_69], %246 {strides = array<i32>} : memref<128x32xf32, #tpu.memory_space<vmem>>, vector<8x32xf32>,
    %248 = arith.truncf %243 : vector<8x64xf32> to vector<8x64xbf16>
    %c48_70 = arith.constant 48 : index
    %c0_71 = arith.constant 0 : index
    %249 = vector.load %arg6[%c48_70, %c0_71] : memref<128x256xf32, #tpu.memory_space<vmem>>, vector<8x256xf32>
    %cst_72 = arith.constant dense<0.000000e+00> : vector<8x256xf32>
    %250 = tpu.matmul %248, %105, %cst_72 {dimension_numbers = #tpu.dot_dimension_numbers<[1], [0], [0], [1], [0, 0, 1, 1], [], []>} : vector<8x64xbf16>, vector<64x256xbf16>, vector<8x256xf32> -> vector<8x256xf32>
    %251 = arith.addf %249, %250 : vector<8x256xf32>
    %252 = vector.extract_strided_slice %251 {offsets = [0, 0], sizes = [8, 192], strides = [1, 1]} : vector<8x256xf32> to vector<8x192xf32>
    %253 = arith.negf %252 : vector<8x192xf32>
    %254 = math.exp %253 : vector<8x192xf32>
    %cst_73 = arith.constant 1.000000e+00 : f32
    %255 = vector.broadcast %cst_73 : f32 to vector<8x192xf32>
    %256 = arith.addf %255, %254 : vector<8x192xf32>
    %257 = arith.divf %255, %256 : vector<8x192xf32>
    %258 = vector.extract_strided_slice %251 {offsets = [0, 192], sizes = [8, 64], strides = [1, 1]} : vector<8x256xf32> to vector<8x64xf32>
    %259 = math.tanh %258 : vector<8x64xf32>
    %260 = vector.extract_strided_slice %257 {offsets = [0, 64], sizes = [8, 64], strides = [1, 1]} : vector<8x192xf32> to vector<8x64xf32>
    %261 = arith.mulf %260, %240 : vector<8x64xf32>
    %262 = vector.extract_strided_slice %257 {offsets = [0, 0], sizes = [8, 64], strides = [1, 1]} : vector<8x192xf32> to vector<8x64xf32>
    %263 = arith.mulf %262, %259 : vector<8x64xf32>
    %264 = arith.addf %261, %263 : vector<8x64xf32>
    %265 = vector.extract_strided_slice %257 {offsets = [0, 128], sizes = [8, 64], strides = [1, 1]} : vector<8x192xf32> to vector<8x64xf32>
    %266 = math.tanh %264 : vector<8x64xf32>
    %267 = arith.mulf %265, %266 : vector<8x64xf32>
    %268 = vector.extract_strided_slice %267 {offsets = [0, 0], sizes = [8, 32], strides = [1, 1]} : vector<8x64xf32> to vector<8x32xf32>
    %c48_74 = arith.constant 48 : index
    %c0_75 = arith.constant 0 : index
    %269 = vector.load %arg7[%c48_74, %c0_75] : memref<128x32xf32, #tpu.memory_space<vmem>>, vector<8x32xf32>
    tpu.vector_store %arg7[%c48_74, %c0_75], %268 {strides = array<i32>} : memref<128x32xf32, #tpu.memory_space<vmem>>, vector<8x32xf32>,
    %270 = vector.extract_strided_slice %267 {offsets = [0, 32], sizes = [8, 32], strides = [1, 1]} : vector<8x64xf32> to vector<8x32xf32>
    %c72 = arith.constant 72 : index
    %c0_76 = arith.constant 0 : index
    %271 = vector.load %arg8[%c72, %c0_76] : memref<128x32xf32, #tpu.memory_space<vmem>>, vector<8x32xf32>
    tpu.vector_store %arg8[%c72, %c0_76], %270 {strides = array<i32>} : memref<128x32xf32, #tpu.memory_space<vmem>>, vector<8x32xf32>,
    %272 = arith.truncf %267 : vector<8x64xf32> to vector<8x64xbf16>
    %c56 = arith.constant 56 : index
    %c0_77 = arith.constant 0 : index
    %273 = vector.load %arg6[%c56, %c0_77] : memref<128x256xf32, #tpu.memory_space<vmem>>, vector<8x256xf32>
    %cst_78 = arith.constant dense<0.000000e+00> : vector<8x256xf32>
    %274 = tpu.matmul %272, %105, %cst_78 {dimension_numbers = #tpu.dot_dimension_numbers<[1], [0], [0], [1], [0, 0, 1, 1], [], []>} : vector<8x64xbf16>, vector<64x256xbf16>, vector<8x256xf32> -> vector<8x256xf32>
    %275 = arith.addf %273, %274 : vector<8x256xf32>
    %276 = vector.extract_strided_slice %275 {offsets = [0, 0], sizes = [8, 192], strides = [1, 1]} : vector<8x256xf32> to vector<8x192xf32>
    %277 = arith.negf %276 : vector<8x192xf32>
    %278 = math.exp %277 : vector<8x192xf32>
    %cst_79 = arith.constant 1.000000e+00 : f32
    %279 = vector.broadcast %cst_79 : f32 to vector<8x192xf32>
    %280 = arith.addf %279, %278 : vector<8x192xf32>
    %281 = arith.divf %279, %280 : vector<8x192xf32>
    %282 = vector.extract_strided_slice %275 {offsets = [0, 192], sizes = [8, 64], strides = [1, 1]} : vector<8x256xf32> to vector<8x64xf32>
    %283 = math.tanh %282 : vector<8x64xf32>
    %284 = vector.extract_strided_slice %281 {offsets = [0, 64], sizes = [8, 64], strides = [1, 1]} : vector<8x192xf32> to vector<8x64xf32>
    %285 = arith.mulf %284, %264 : vector<8x64xf32>
    %286 = vector.extract_strided_slice %281 {offsets = [0, 0], sizes = [8, 64], strides = [1, 1]} : vector<8x192xf32> to vector<8x64xf32>
    %287 = arith.mulf %286, %283 : vector<8x64xf32>
    %288 = arith.addf %285, %287 : vector<8x64xf32>
    %289 = vector.extract_strided_slice %281 {offsets = [0, 128], sizes = [8, 64], strides = [1, 1]} : vector<8x192xf32> to vector<8x64xf32>
    %290 = math.tanh %288 : vector<8x64xf32>
    %291 = arith.mulf %289, %290 : vector<8x64xf32>
    %292 = vector.extract_strided_slice %291 {offsets = [0, 0], sizes = [8, 32], strides = [1, 1]} : vector<8x64xf32> to vector<8x32xf32>
    %c56_80 = arith.constant 56 : index
    %c0_81 = arith.constant 0 : index
    %293 = vector.load %arg7[%c56_80, %c0_81] : memref<128x32xf32, #tpu.memory_space<vmem>>, vector<8x32xf32>
    tpu.vector_store %arg7[%c56_80, %c0_81], %292 {strides = array<i32>} : memref<128x32xf32, #tpu.memory_space<vmem>>, vector<8x32xf32>,
    %294 = vector.extract_strided_slice %291 {offsets = [0, 32], sizes = [8, 32], strides = [1, 1]} : vector<8x64xf32> to vector<8x32xf32>
    %c64 = arith.constant 64 : index
    %c0_82 = arith.constant 0 : index
    %295 = vector.load %arg8[%c64, %c0_82] : memref<128x32xf32, #tpu.memory_space<vmem>>, vector<8x32xf32>
    tpu.vector_store %arg8[%c64, %c0_82], %294 {strides = array<i32>} : memref<128x32xf32, #tpu.memory_space<vmem>>, vector<8x32xf32>,
    %296 = arith.truncf %291 : vector<8x64xf32> to vector<8x64xbf16>
    %c64_83 = arith.constant 64 : index
    %c0_84 = arith.constant 0 : index
    %297 = vector.load %arg6[%c64_83, %c0_84] : memref<128x256xf32, #tpu.memory_space<vmem>>, vector<8x256xf32>
    %cst_85 = arith.constant dense<0.000000e+00> : vector<8x256xf32>
    %298 = tpu.matmul %296, %105, %cst_85 {dimension_numbers = #tpu.dot_dimension_numbers<[1], [0], [0], [1], [0, 0, 1, 1], [], []>} : vector<8x64xbf16>, vector<64x256xbf16>, vector<8x256xf32> -> vector<8x256xf32>
    %299 = arith.addf %297, %298 : vector<8x256xf32>
    %300 = vector.extract_strided_slice %299 {offsets = [0, 0], sizes = [8, 192], strides = [1, 1]} : vector<8x256xf32> to vector<8x192xf32>
    %301 = arith.negf %300 : vector<8x192xf32>
    %302 = math.exp %301 : vector<8x192xf32>
    %cst_86 = arith.constant 1.000000e+00 : f32
    %303 = vector.broadcast %cst_86 : f32 to vector<8x192xf32>
    %304 = arith.addf %303, %302 : vector<8x192xf32>
    %305 = arith.divf %303, %304 : vector<8x192xf32>
    %306 = vector.extract_strided_slice %299 {offsets = [0, 192], sizes = [8, 64], strides = [1, 1]} : vector<8x256xf32> to vector<8x64xf32>
    %307 = math.tanh %306 : vector<8x64xf32>
    %308 = vector.extract_strided_slice %305 {offsets = [0, 64], sizes = [8, 64], strides = [1, 1]} : vector<8x192xf32> to vector<8x64xf32>
    %309 = arith.mulf %308, %288 : vector<8x64xf32>
    %310 = vector.extract_strided_slice %305 {offsets = [0, 0], sizes = [8, 64], strides = [1, 1]} : vector<8x192xf32> to vector<8x64xf32>
    %311 = arith.mulf %310, %307 : vector<8x64xf32>
    %312 = arith.addf %309, %311 : vector<8x64xf32>
    %313 = vector.extract_strided_slice %305 {offsets = [0, 128], sizes = [8, 64], strides = [1, 1]} : vector<8x192xf32> to vector<8x64xf32>
    %314 = math.tanh %312 : vector<8x64xf32>
    %315 = arith.mulf %313, %314 : vector<8x64xf32>
    %316 = vector.extract_strided_slice %315 {offsets = [0, 0], sizes = [8, 32], strides = [1, 1]} : vector<8x64xf32> to vector<8x32xf32>
    %c64_87 = arith.constant 64 : index
    %c0_88 = arith.constant 0 : index
    %317 = vector.load %arg7[%c64_87, %c0_88] : memref<128x32xf32, #tpu.memory_space<vmem>>, vector<8x32xf32>
    tpu.vector_store %arg7[%c64_87, %c0_88], %316 {strides = array<i32>} : memref<128x32xf32, #tpu.memory_space<vmem>>, vector<8x32xf32>,
    %318 = vector.extract_strided_slice %315 {offsets = [0, 32], sizes = [8, 32], strides = [1, 1]} : vector<8x64xf32> to vector<8x32xf32>
    %c56_89 = arith.constant 56 : index
    %c0_90 = arith.constant 0 : index
    %319 = vector.load %arg8[%c56_89, %c0_90] : memref<128x32xf32, #tpu.memory_space<vmem>>, vector<8x32xf32>
    tpu.vector_store %arg8[%c56_89, %c0_90], %318 {strides = array<i32>} : memref<128x32xf32, #tpu.memory_space<vmem>>, vector<8x32xf32>,
    %320 = arith.truncf %315 : vector<8x64xf32> to vector<8x64xbf16>
    %c72_91 = arith.constant 72 : index
    %c0_92 = arith.constant 0 : index
    %321 = vector.load %arg6[%c72_91, %c0_92] : memref<128x256xf32, #tpu.memory_space<vmem>>, vector<8x256xf32>
    %cst_93 = arith.constant dense<0.000000e+00> : vector<8x256xf32>
    %322 = tpu.matmul %320, %105, %cst_93 {dimension_numbers = #tpu.dot_dimension_numbers<[1], [0], [0], [1], [0, 0, 1, 1], [], []>} : vector<8x64xbf16>, vector<64x256xbf16>, vector<8x256xf32> -> vector<8x256xf32>
    %323 = arith.addf %321, %322 : vector<8x256xf32>
    %324 = vector.extract_strided_slice %323 {offsets = [0, 0], sizes = [8, 192], strides = [1, 1]} : vector<8x256xf32> to vector<8x192xf32>
    %325 = arith.negf %324 : vector<8x192xf32>
    %326 = math.exp %325 : vector<8x192xf32>
    %cst_94 = arith.constant 1.000000e+00 : f32
    %327 = vector.broadcast %cst_94 : f32 to vector<8x192xf32>
    %328 = arith.addf %327, %326 : vector<8x192xf32>
    %329 = arith.divf %327, %328 : vector<8x192xf32>
    %330 = vector.extract_strided_slice %323 {offsets = [0, 192], sizes = [8, 64], strides = [1, 1]} : vector<8x256xf32> to vector<8x64xf32>
    %331 = math.tanh %330 : vector<8x64xf32>
    %332 = vector.extract_strided_slice %329 {offsets = [0, 64], sizes = [8, 64], strides = [1, 1]} : vector<8x192xf32> to vector<8x64xf32>
    %333 = arith.mulf %332, %312 : vector<8x64xf32>
    %334 = vector.extract_strided_slice %329 {offsets = [0, 0], sizes = [8, 64], strides = [1, 1]} : vector<8x192xf32> to vector<8x64xf32>
    %335 = arith.mulf %334, %331 : vector<8x64xf32>
    %336 = arith.addf %333, %335 : vector<8x64xf32>
    %337 = vector.extract_strided_slice %329 {offsets = [0, 128], sizes = [8, 64], strides = [1, 1]} : vector<8x192xf32> to vector<8x64xf32>
    %338 = math.tanh %336 : vector<8x64xf32>
    %339 = arith.mulf %337, %338 : vector<8x64xf32>
    %340 = vector.extract_strided_slice %339 {offsets = [0, 0], sizes = [8, 32], strides = [1, 1]} : vector<8x64xf32> to vector<8x32xf32>
    %c72_95 = arith.constant 72 : index
    %c0_96 = arith.constant 0 : index
    %341 = vector.load %arg7[%c72_95, %c0_96] : memref<128x32xf32, #tpu.memory_space<vmem>>, vector<8x32xf32>
    tpu.vector_store %arg7[%c72_95, %c0_96], %340 {strides = array<i32>} : memref<128x32xf32, #tpu.memory_space<vmem>>, vector<8x32xf32>,
    %342 = vector.extract_strided_slice %339 {offsets = [0, 32], sizes = [8, 32], strides = [1, 1]} : vector<8x64xf32> to vector<8x32xf32>
    %c48_97 = arith.constant 48 : index
    %c0_98 = arith.constant 0 : index
    %343 = vector.load %arg8[%c48_97, %c0_98] : memref<128x32xf32, #tpu.memory_space<vmem>>, vector<8x32xf32>
    tpu.vector_store %arg8[%c48_97, %c0_98], %342 {strides = array<i32>} : memref<128x32xf32, #tpu.memory_space<vmem>>, vector<8x32xf32>,
    %344 = arith.truncf %339 : vector<8x64xf32> to vector<8x64xbf16>
    %c80_99 = arith.constant 80 : index
    %c0_100 = arith.constant 0 : index
    %345 = vector.load %arg6[%c80_99, %c0_100] : memref<128x256xf32, #tpu.memory_space<vmem>>, vector<8x256xf32>
    %cst_101 = arith.constant dense<0.000000e+00> : vector<8x256xf32>
    %346 = tpu.matmul %344, %105, %cst_101 {dimension_numbers = #tpu.dot_dimension_numbers<[1], [0], [0], [1], [0, 0, 1, 1], [], []>} : vector<8x64xbf16>, vector<64x256xbf16>, vector<8x256xf32> -> vector<8x256xf32>
    %347 = arith.addf %345, %346 : vector<8x256xf32>
    %348 = vector.extract_strided_slice %347 {offsets = [0, 0], sizes = [8, 192], strides = [1, 1]} : vector<8x256xf32> to vector<8x192xf32>
    %349 = arith.negf %348 : vector<8x192xf32>
    %350 = math.exp %349 : vector<8x192xf32>
    %cst_102 = arith.constant 1.000000e+00 : f32
    %351 = vector.broadcast %cst_102 : f32 to vector<8x192xf32>
    %352 = arith.addf %351, %350 : vector<8x192xf32>
    %353 = arith.divf %351, %352 : vector<8x192xf32>
    %354 = vector.extract_strided_slice %347 {offsets = [0, 192], sizes = [8, 64], strides = [1, 1]} : vector<8x256xf32> to vector<8x64xf32>
    %355 = math.tanh %354 : vector<8x64xf32>
    %356 = vector.extract_strided_slice %353 {offsets = [0, 64], sizes = [8, 64], strides = [1, 1]} : vector<8x192xf32> to vector<8x64xf32>
    %357 = arith.mulf %356, %336 : vector<8x64xf32>
    %358 = vector.extract_strided_slice %353 {offsets = [0, 0], sizes = [8, 64], strides = [1, 1]} : vector<8x192xf32> to vector<8x64xf32>
    %359 = arith.mulf %358, %355 : vector<8x64xf32>
    %360 = arith.addf %357, %359 : vector<8x64xf32>
    %361 = vector.extract_strided_slice %353 {offsets = [0, 128], sizes = [8, 64], strides = [1, 1]} : vector<8x192xf32> to vector<8x64xf32>
    %362 = math.tanh %360 : vector<8x64xf32>
    %363 = arith.mulf %361, %362 : vector<8x64xf32>
    %364 = vector.extract_strided_slice %363 {offsets = [0, 0], sizes = [8, 32], strides = [1, 1]} : vector<8x64xf32> to vector<8x32xf32>
    %c80_103 = arith.constant 80 : index
    %c0_104 = arith.constant 0 : index
    %365 = vector.load %arg7[%c80_103, %c0_104] : memref<128x32xf32, #tpu.memory_space<vmem>>, vector<8x32xf32>
    tpu.vector_store %arg7[%c80_103, %c0_104], %364 {strides = array<i32>} : memref<128x32xf32, #tpu.memory_space<vmem>>, vector<8x32xf32>,
    %366 = vector.extract_strided_slice %363 {offsets = [0, 32], sizes = [8, 32], strides = [1, 1]} : vector<8x64xf32> to vector<8x32xf32>
    %c40_105 = arith.constant 40 : index
    %c0_106 = arith.constant 0 : index
    %367 = vector.load %arg8[%c40_105, %c0_106] : memref<128x32xf32, #tpu.memory_space<vmem>>, vector<8x32xf32>
    tpu.vector_store %arg8[%c40_105, %c0_106], %366 {strides = array<i32>} : memref<128x32xf32, #tpu.memory_space<vmem>>, vector<8x32xf32>,
    %368 = arith.truncf %363 : vector<8x64xf32> to vector<8x64xbf16>
    %c88_107 = arith.constant 88 : index
    %c0_108 = arith.constant 0 : index
    %369 = vector.load %arg6[%c88_107, %c0_108] : memref<128x256xf32, #tpu.memory_space<vmem>>, vector<8x256xf32>
    %cst_109 = arith.constant dense<0.000000e+00> : vector<8x256xf32>
    %370 = tpu.matmul %368, %105, %cst_109 {dimension_numbers = #tpu.dot_dimension_numbers<[1], [0], [0], [1], [0, 0, 1, 1], [], []>} : vector<8x64xbf16>, vector<64x256xbf16>, vector<8x256xf32> -> vector<8x256xf32>
    %371 = arith.addf %369, %370 : vector<8x256xf32>
    %372 = vector.extract_strided_slice %371 {offsets = [0, 0], sizes = [8, 192], strides = [1, 1]} : vector<8x256xf32> to vector<8x192xf32>
    %373 = arith.negf %372 : vector<8x192xf32>
    %374 = math.exp %373 : vector<8x192xf32>
    %cst_110 = arith.constant 1.000000e+00 : f32
    %375 = vector.broadcast %cst_110 : f32 to vector<8x192xf32>
    %376 = arith.addf %375, %374 : vector<8x192xf32>
    %377 = arith.divf %375, %376 : vector<8x192xf32>
    %378 = vector.extract_strided_slice %371 {offsets = [0, 192], sizes = [8, 64], strides = [1, 1]} : vector<8x256xf32> to vector<8x64xf32>
    %379 = math.tanh %378 : vector<8x64xf32>
    %380 = vector.extract_strided_slice %377 {offsets = [0, 64], sizes = [8, 64], strides = [1, 1]} : vector<8x192xf32> to vector<8x64xf32>
    %381 = arith.mulf %380, %360 : vector<8x64xf32>
    %382 = vector.extract_strided_slice %377 {offsets = [0, 0], sizes = [8, 64], strides = [1, 1]} : vector<8x192xf32> to vector<8x64xf32>
    %383 = arith.mulf %382, %379 : vector<8x64xf32>
    %384 = arith.addf %381, %383 : vector<8x64xf32>
    %385 = vector.extract_strided_slice %377 {offsets = [0, 128], sizes = [8, 64], strides = [1, 1]} : vector<8x192xf32> to vector<8x64xf32>
    %386 = math.tanh %384 : vector<8x64xf32>
    %387 = arith.mulf %385, %386 : vector<8x64xf32>
    %388 = vector.extract_strided_slice %387 {offsets = [0, 0], sizes = [8, 32], strides = [1, 1]} : vector<8x64xf32> to vector<8x32xf32>
    %c88_111 = arith.constant 88 : index
    %c0_112 = arith.constant 0 : index
    %389 = vector.load %arg7[%c88_111, %c0_112] : memref<128x32xf32, #tpu.memory_space<vmem>>, vector<8x32xf32>
    tpu.vector_store %arg7[%c88_111, %c0_112], %388 {strides = array<i32>} : memref<128x32xf32, #tpu.memory_space<vmem>>, vector<8x32xf32>,
    %390 = vector.extract_strided_slice %387 {offsets = [0, 32], sizes = [8, 32], strides = [1, 1]} : vector<8x64xf32> to vector<8x32xf32>
    %c32_113 = arith.constant 32 : index
    %c0_114 = arith.constant 0 : index
    %391 = vector.load %arg8[%c32_113, %c0_114] : memref<128x32xf32, #tpu.memory_space<vmem>>, vector<8x32xf32>
    tpu.vector_store %arg8[%c32_113, %c0_114], %390 {strides = array<i32>} : memref<128x32xf32, #tpu.memory_space<vmem>>, vector<8x32xf32>,
    %392 = arith.truncf %387 : vector<8x64xf32> to vector<8x64xbf16>
    %c96_115 = arith.constant 96 : index
    %c0_116 = arith.constant 0 : index
    %393 = vector.load %arg6[%c96_115, %c0_116] : memref<128x256xf32, #tpu.memory_space<vmem>>, vector<8x256xf32>
    %cst_117 = arith.constant dense<0.000000e+00> : vector<8x256xf32>
    %394 = tpu.matmul %392, %105, %cst_117 {dimension_numbers = #tpu.dot_dimension_numbers<[1], [0], [0], [1], [0, 0, 1, 1], [], []>} : vector<8x64xbf16>, vector<64x256xbf16>, vector<8x256xf32> -> vector<8x256xf32>
    %395 = arith.addf %393, %394 : vector<8x256xf32>
    %396 = vector.extract_strided_slice %395 {offsets = [0, 0], sizes = [8, 192], strides = [1, 1]} : vector<8x256xf32> to vector<8x192xf32>
    %397 = arith.negf %396 : vector<8x192xf32>
    %398 = math.exp %397 : vector<8x192xf32>
    %cst_118 = arith.constant 1.000000e+00 : f32
    %399 = vector.broadcast %cst_118 : f32 to vector<8x192xf32>
    %400 = arith.addf %399, %398 : vector<8x192xf32>
    %401 = arith.divf %399, %400 : vector<8x192xf32>
    %402 = vector.extract_strided_slice %395 {offsets = [0, 192], sizes = [8, 64], strides = [1, 1]} : vector<8x256xf32> to vector<8x64xf32>
    %403 = math.tanh %402 : vector<8x64xf32>
    %404 = vector.extract_strided_slice %401 {offsets = [0, 64], sizes = [8, 64], strides = [1, 1]} : vector<8x192xf32> to vector<8x64xf32>
    %405 = arith.mulf %404, %384 : vector<8x64xf32>
    %406 = vector.extract_strided_slice %401 {offsets = [0, 0], sizes = [8, 64], strides = [1, 1]} : vector<8x192xf32> to vector<8x64xf32>
    %407 = arith.mulf %406, %403 : vector<8x64xf32>
    %408 = arith.addf %405, %407 : vector<8x64xf32>
    %409 = vector.extract_strided_slice %401 {offsets = [0, 128], sizes = [8, 64], strides = [1, 1]} : vector<8x192xf32> to vector<8x64xf32>
    %410 = math.tanh %408 : vector<8x64xf32>
    %411 = arith.mulf %409, %410 : vector<8x64xf32>
    %412 = vector.extract_strided_slice %411 {offsets = [0, 0], sizes = [8, 32], strides = [1, 1]} : vector<8x64xf32> to vector<8x32xf32>
    %c96_119 = arith.constant 96 : index
    %c0_120 = arith.constant 0 : index
    %413 = vector.load %arg7[%c96_119, %c0_120] : memref<128x32xf32, #tpu.memory_space<vmem>>, vector<8x32xf32>
    tpu.vector_store %arg7[%c96_119, %c0_120], %412 {strides = array<i32>} : memref<128x32xf32, #tpu.memory_space<vmem>>, vector<8x32xf32>,
    %414 = vector.extract_strided_slice %411 {offsets = [0, 32], sizes = [8, 32], strides = [1, 1]} : vector<8x64xf32> to vector<8x32xf32>
    %c24_121 = arith.constant 24 : index
    %c0_122 = arith.constant 0 : index
    %415 = vector.load %arg8[%c24_121, %c0_122] : memref<128x32xf32, #tpu.memory_space<vmem>>, vector<8x32xf32>
    tpu.vector_store %arg8[%c24_121, %c0_122], %414 {strides = array<i32>} : memref<128x32xf32, #tpu.memory_space<vmem>>, vector<8x32xf32>,
    %416 = arith.truncf %411 : vector<8x64xf32> to vector<8x64xbf16>
    %c104_123 = arith.constant 104 : index
    %c0_124 = arith.constant 0 : index
    %417 = vector.load %arg6[%c104_123, %c0_124] : memref<128x256xf32, #tpu.memory_space<vmem>>, vector<8x256xf32>
    %cst_125 = arith.constant dense<0.000000e+00> : vector<8x256xf32>
    %418 = tpu.matmul %416, %105, %cst_125 {dimension_numbers = #tpu.dot_dimension_numbers<[1], [0], [0], [1], [0, 0, 1, 1], [], []>} : vector<8x64xbf16>, vector<64x256xbf16>, vector<8x256xf32> -> vector<8x256xf32>
    %419 = arith.addf %417, %418 : vector<8x256xf32>
    %420 = vector.extract_strided_slice %419 {offsets = [0, 0], sizes = [8, 192], strides = [1, 1]} : vector<8x256xf32> to vector<8x192xf32>
    %421 = arith.negf %420 : vector<8x192xf32>
    %422 = math.exp %421 : vector<8x192xf32>
    %cst_126 = arith.constant 1.000000e+00 : f32
    %423 = vector.broadcast %cst_126 : f32 to vector<8x192xf32>
    %424 = arith.addf %423, %422 : vector<8x192xf32>
    %425 = arith.divf %423, %424 : vector<8x192xf32>
    %426 = vector.extract_strided_slice %419 {offsets = [0, 192], sizes = [8, 64], strides = [1, 1]} : vector<8x256xf32> to vector<8x64xf32>
    %427 = math.tanh %426 : vector<8x64xf32>
    %428 = vector.extract_strided_slice %425 {offsets = [0, 64], sizes = [8, 64], strides = [1, 1]} : vector<8x192xf32> to vector<8x64xf32>
    %429 = arith.mulf %428, %408 : vector<8x64xf32>
    %430 = vector.extract_strided_slice %425 {offsets = [0, 0], sizes = [8, 64], strides = [1, 1]} : vector<8x192xf32> to vector<8x64xf32>
    %431 = arith.mulf %430, %427 : vector<8x64xf32>
    %432 = arith.addf %429, %431 : vector<8x64xf32>
    %433 = vector.extract_strided_slice %425 {offsets = [0, 128], sizes = [8, 64], strides = [1, 1]} : vector<8x192xf32> to vector<8x64xf32>
    %434 = math.tanh %432 : vector<8x64xf32>
    %435 = arith.mulf %433, %434 : vector<8x64xf32>
    %436 = vector.extract_strided_slice %435 {offsets = [0, 0], sizes = [8, 32], strides = [1, 1]} : vector<8x64xf32> to vector<8x32xf32>
    %c104_127 = arith.constant 104 : index
    %c0_128 = arith.constant 0 : index
    %437 = vector.load %arg7[%c104_127, %c0_128] : memref<128x32xf32, #tpu.memory_space<vmem>>, vector<8x32xf32>
    tpu.vector_store %arg7[%c104_127, %c0_128], %436 {strides = array<i32>} : memref<128x32xf32, #tpu.memory_space<vmem>>, vector<8x32xf32>,
    %438 = vector.extract_strided_slice %435 {offsets = [0, 32], sizes = [8, 32], strides = [1, 1]} : vector<8x64xf32> to vector<8x32xf32>
    %c16_129 = arith.constant 16 : index
    %c0_130 = arith.constant 0 : index
    %439 = vector.load %arg8[%c16_129, %c0_130] : memref<128x32xf32, #tpu.memory_space<vmem>>, vector<8x32xf32>
    tpu.vector_store %arg8[%c16_129, %c0_130], %438 {strides = array<i32>} : memref<128x32xf32, #tpu.memory_space<vmem>>, vector<8x32xf32>,
    %440 = arith.truncf %435 : vector<8x64xf32> to vector<8x64xbf16>
    %c112_131 = arith.constant 112 : index
    %c0_132 = arith.constant 0 : index
    %441 = vector.load %arg6[%c112_131, %c0_132] : memref<128x256xf32, #tpu.memory_space<vmem>>, vector<8x256xf32>
    %cst_133 = arith.constant dense<0.000000e+00> : vector<8x256xf32>
    %442 = tpu.matmul %440, %105, %cst_133 {dimension_numbers = #tpu.dot_dimension_numbers<[1], [0], [0], [1], [0, 0, 1, 1], [], []>} : vector<8x64xbf16>, vector<64x256xbf16>, vector<8x256xf32> -> vector<8x256xf32>
    %443 = arith.addf %441, %442 : vector<8x256xf32>
    %444 = vector.extract_strided_slice %443 {offsets = [0, 0], sizes = [8, 192], strides = [1, 1]} : vector<8x256xf32> to vector<8x192xf32>
    %445 = arith.negf %444 : vector<8x192xf32>
    %446 = math.exp %445 : vector<8x192xf32>
    %cst_134 = arith.constant 1.000000e+00 : f32
    %447 = vector.broadcast %cst_134 : f32 to vector<8x192xf32>
    %448 = arith.addf %447, %446 : vector<8x192xf32>
    %449 = arith.divf %447, %448 : vector<8x192xf32>
    %450 = vector.extract_strided_slice %443 {offsets = [0, 192], sizes = [8, 64], strides = [1, 1]} : vector<8x256xf32> to vector<8x64xf32>
    %451 = math.tanh %450 : vector<8x64xf32>
    %452 = vector.extract_strided_slice %449 {offsets = [0, 64], sizes = [8, 64], strides = [1, 1]} : vector<8x192xf32> to vector<8x64xf32>
    %453 = arith.mulf %452, %432 : vector<8x64xf32>
    %454 = vector.extract_strided_slice %449 {offsets = [0, 0], sizes = [8, 64], strides = [1, 1]} : vector<8x192xf32> to vector<8x64xf32>
    %455 = arith.mulf %454, %451 : vector<8x64xf32>
    %456 = arith.addf %453, %455 : vector<8x64xf32>
    %457 = vector.extract_strided_slice %449 {offsets = [0, 128], sizes = [8, 64], strides = [1, 1]} : vector<8x192xf32> to vector<8x64xf32>
    %458 = math.tanh %456 : vector<8x64xf32>
    %459 = arith.mulf %457, %458 : vector<8x64xf32>
    %460 = vector.extract_strided_slice %459 {offsets = [0, 0], sizes = [8, 32], strides = [1, 1]} : vector<8x64xf32> to vector<8x32xf32>
    %c112_135 = arith.constant 112 : index
    %c0_136 = arith.constant 0 : index
    %461 = vector.load %arg7[%c112_135, %c0_136] : memref<128x32xf32, #tpu.memory_space<vmem>>, vector<8x32xf32>
    tpu.vector_store %arg7[%c112_135, %c0_136], %460 {strides = array<i32>} : memref<128x32xf32, #tpu.memory_space<vmem>>, vector<8x32xf32>,
    %462 = vector.extract_strided_slice %459 {offsets = [0, 32], sizes = [8, 32], strides = [1, 1]} : vector<8x64xf32> to vector<8x32xf32>
    %c8_137 = arith.constant 8 : index
    %c0_138 = arith.constant 0 : index
    %463 = vector.load %arg8[%c8_137, %c0_138] : memref<128x32xf32, #tpu.memory_space<vmem>>, vector<8x32xf32>
    tpu.vector_store %arg8[%c8_137, %c0_138], %462 {strides = array<i32>} : memref<128x32xf32, #tpu.memory_space<vmem>>, vector<8x32xf32>,
    %464 = arith.truncf %459 : vector<8x64xf32> to vector<8x64xbf16>
    %c120_139 = arith.constant 120 : index
    %c0_140 = arith.constant 0 : index
    %465 = vector.load %arg6[%c120_139, %c0_140] : memref<128x256xf32, #tpu.memory_space<vmem>>, vector<8x256xf32>
    %cst_141 = arith.constant dense<0.000000e+00> : vector<8x256xf32>
    %466 = tpu.matmul %464, %105, %cst_141 {dimension_numbers = #tpu.dot_dimension_numbers<[1], [0], [0], [1], [0, 0, 1, 1], [], []>} : vector<8x64xbf16>, vector<64x256xbf16>, vector<8x256xf32> -> vector<8x256xf32>
    %467 = arith.addf %465, %466 : vector<8x256xf32>
    %468 = vector.extract_strided_slice %467 {offsets = [0, 0], sizes = [8, 192], strides = [1, 1]} : vector<8x256xf32> to vector<8x192xf32>
    %469 = arith.negf %468 : vector<8x192xf32>
    %470 = math.exp %469 : vector<8x192xf32>
    %cst_142 = arith.constant 1.000000e+00 : f32
    %471 = vector.broadcast %cst_142 : f32 to vector<8x192xf32>
    %472 = arith.addf %471, %470 : vector<8x192xf32>
    %473 = arith.divf %471, %472 : vector<8x192xf32>
    %474 = vector.extract_strided_slice %467 {offsets = [0, 192], sizes = [8, 64], strides = [1, 1]} : vector<8x256xf32> to vector<8x64xf32>
    %475 = math.tanh %474 : vector<8x64xf32>
    %476 = vector.extract_strided_slice %473 {offsets = [0, 64], sizes = [8, 64], strides = [1, 1]} : vector<8x192xf32> to vector<8x64xf32>
    %477 = arith.mulf %476, %456 : vector<8x64xf32>
    %478 = vector.extract_strided_slice %473 {offsets = [0, 0], sizes = [8, 64], strides = [1, 1]} : vector<8x192xf32> to vector<8x64xf32>
    %479 = arith.mulf %478, %475 : vector<8x64xf32>
    %480 = arith.addf %477, %479 : vector<8x64xf32>
    %481 = vector.extract_strided_slice %473 {offsets = [0, 128], sizes = [8, 64], strides = [1, 1]} : vector<8x192xf32> to vector<8x64xf32>
    %482 = math.tanh %480 : vector<8x64xf32>
    %483 = arith.mulf %481, %482 : vector<8x64xf32>
    %484 = vector.extract_strided_slice %483 {offsets = [0, 0], sizes = [8, 32], strides = [1, 1]} : vector<8x64xf32> to vector<8x32xf32>
    %c120_143 = arith.constant 120 : index
    %c0_144 = arith.constant 0 : index
    %485 = vector.load %arg7[%c120_143, %c0_144] : memref<128x32xf32, #tpu.memory_space<vmem>>, vector<8x32xf32>
    tpu.vector_store %arg7[%c120_143, %c0_144], %484 {strides = array<i32>} : memref<128x32xf32, #tpu.memory_space<vmem>>, vector<8x32xf32>,
    %486 = vector.extract_strided_slice %483 {offsets = [0, 32], sizes = [8, 32], strides = [1, 1]} : vector<8x64xf32> to vector<8x32xf32>
    %c0_145 = arith.constant 0 : index
    %c0_146 = arith.constant 0 : index
    %487 = vector.load %arg8[%c0_145, %c0_146] : memref<128x32xf32, #tpu.memory_space<vmem>>, vector<8x32xf32>
    tpu.vector_store %arg8[%c0_145, %c0_146], %486 {strides = array<i32>} : memref<128x32xf32, #tpu.memory_space<vmem>>, vector<8x32xf32>,
    %c0_147 = arith.constant 0 : index
    %c0_148 = arith.constant 0 : index
    %488 = vector.load %arg7[%c0_147, %c0_148] : memref<128x32xf32, #tpu.memory_space<vmem>>, vector<128x32xf32>
    %c0_149 = arith.constant 0 : index
    %c0_150 = arith.constant 0 : index
    %489 = vector.load %arg8[%c0_149, %c0_150] : memref<128x32xf32, #tpu.memory_space<vmem>>, vector<128x32xf32>
    %490 = tpu.concatenate %488, %489 in 1 : vector<128x32xf32>, vector<128x32xf32> -> vector<128x64xf32>
    %491 = arith.truncf %490 : vector<128x64xf32> to vector<128x64xbf16>
    %c112_151 = arith.constant 112 : index
    %c0_152 = arith.constant 0 : index
    %492 = vector.load %arg3[%c112_151, %c0_152] : memref<640x256xbf16, #tpu.memory_space<vmem>>, vector<64x64xbf16>
    %cst_153 = arith.constant dense<0.000000e+00> : vector<128x64xf32>
    %493 = tpu.matmul %491, %492, %cst_153 {dimension_numbers = #tpu.dot_dimension_numbers<[1], [0], [0], [1], [0, 0, 1, 1], [], []>} : vector<128x64xbf16>, vector<64x64xbf16>, vector<128x64xf32> -> vector<128x64xf32>
    %c1 = arith.constant 1 : index
    %c0_154 = arith.constant 0 : index
    %494 = vector.load %arg4[%c1, %c0_154] : memref<16x256xf32, #tpu.memory_space<vmem>>, vector<1x64xf32>
    %495 = vector.broadcast %494 : vector<1x64xf32> to vector<128x64xf32>
    %496 = arith.addf %493, %495 : vector<128x64xf32>
    %497 = vector.extract_strided_slice %496 {offsets = [0, 0], sizes = [128, 32], strides = [1, 1]} : vector<128x64xf32> to vector<128x32xf32>
    %c0_155 = arith.constant 0 : index
    %c0_156 = arith.constant 0 : index
    %498 = vector.load %arg9[%c0_155, %c0_156] : memref<128x32xf32, #tpu.memory_space<vmem>>, vector<128x32xf32>
    tpu.vector_store %arg9[%c0_155, %c0_156], %497 {strides = array<i32>} : memref<128x32xf32, #tpu.memory_space<vmem>>, vector<128x32xf32>,
    %499 = vector.extract_strided_slice %496 {offsets = [0, 32], sizes = [128, 32], strides = [1, 1]} : vector<128x64xf32> to vector<128x32xf32>
    %c0_157 = arith.constant 0 : index
    %c0_158 = arith.constant 0 : index
    %500 = vector.load %arg10[%c0_157, %c0_158] : memref<128x32xf32, #tpu.memory_space<vmem>>, vector<128x32xf32>
    tpu.vector_store %arg10[%c0_157, %c0_158], %499 {strides = array<i32>} : memref<128x32xf32, #tpu.memory_space<vmem>>, vector<128x32xf32>,
    %c176 = arith.constant 176 : index
    %c0_159 = arith.constant 0 : index
    %501 = vector.load %arg3[%c176, %c0_159] : memref<640x256xbf16, #tpu.memory_space<vmem>>, vector<8x32xbf16>
    %cst_160 = arith.constant 0.000000e+00 : f32
    %502 = vector.broadcast %cst_160 : f32 to vector<8x8xf32>
    %cst_161 = arith.constant 0.000000e+00 : f32
    %503 = vector.broadcast %cst_161 : f32 to vector<8x8xf32>
    %c0_162 = arith.constant 0 : index
    %c0_163 = arith.constant 0 : index
    %504 = vector.load %arg9[%c0_162, %c0_163] : memref<128x32xf32, #tpu.memory_space<vmem>>, vector<8x32xf32>
    %c120_164 = arith.constant 120 : index
    %c0_165 = arith.constant 0 : index
    %505 = vector.load %arg10[%c120_164, %c0_165] : memref<128x32xf32, #tpu.memory_space<vmem>>, vector<8x32xf32>
    %506 = arith.addf %504, %505 : vector<8x32xf32>
    %507 = vector.extract_strided_slice %506 {offsets = [0, 0], sizes = [8, 24], strides = [1, 1]} : vector<8x32xf32> to vector<8x24xf32>
    %508 = arith.negf %507 : vector<8x24xf32>
    %509 = math.exp %508 : vector<8x24xf32>
    %cst_166 = arith.constant 1.000000e+00 : f32
    %510 = vector.broadcast %cst_166 : f32 to vector<8x24xf32>
    %511 = arith.addf %510, %509 : vector<8x24xf32>
    %512 = arith.divf %510, %511 : vector<8x24xf32>
    %513 = vector.extract_strided_slice %506 {offsets = [0, 24], sizes = [8, 8], strides = [1, 1]} : vector<8x32xf32> to vector<8x8xf32>
    %514 = math.tanh %513 : vector<8x8xf32>
    %515 = vector.extract_strided_slice %512 {offsets = [0, 8], sizes = [8, 8], strides = [1, 1]} : vector<8x24xf32> to vector<8x8xf32>
    %516 = arith.mulf %515, %502 : vector<8x8xf32>
    %517 = vector.extract_strided_slice %512 {offsets = [0, 0], sizes = [8, 8], strides = [1, 1]} : vector<8x24xf32> to vector<8x8xf32>
    %518 = arith.mulf %517, %514 : vector<8x8xf32>
    %519 = arith.addf %516, %518 : vector<8x8xf32>
    %520 = vector.extract_strided_slice %512 {offsets = [0, 16], sizes = [8, 8], strides = [1, 1]} : vector<8x24xf32> to vector<8x8xf32>
    %521 = math.tanh %519 : vector<8x8xf32>
    %522 = arith.mulf %520, %521 : vector<8x8xf32>
    %523 = arith.addf %503, %522 : vector<8x8xf32>
    %524 = arith.truncf %522 : vector<8x8xf32> to vector<8x8xbf16>
    %c8_167 = arith.constant 8 : index
    %c0_168 = arith.constant 0 : index
    %525 = vector.load %arg9[%c8_167, %c0_168] : memref<128x32xf32, #tpu.memory_space<vmem>>, vector<8x32xf32>
    %c112_169 = arith.constant 112 : index
    %c0_170 = arith.constant 0 : index
    %526 = vector.load %arg10[%c112_169, %c0_170] : memref<128x32xf32, #tpu.memory_space<vmem>>, vector<8x32xf32>
    %527 = arith.addf %525, %526 : vector<8x32xf32>
    %cst_171 = arith.constant dense<0.000000e+00> : vector<8x32xf32>
    %528 = tpu.matmul %524, %501, %cst_171 {dimension_numbers = #tpu.dot_dimension_numbers<[1], [0], [0], [1], [0, 0, 1, 1], [], []>} : vector<8x8xbf16>, vector<8x32xbf16>, vector<8x32xf32> -> vector<8x32xf32>
    %529 = arith.addf %527, %528 : vector<8x32xf32>
    %530 = vector.extract_strided_slice %529 {offsets = [0, 0], sizes = [8, 24], strides = [1, 1]} : vector<8x32xf32> to vector<8x24xf32>
    %531 = arith.negf %530 : vector<8x24xf32>
    %532 = math.exp %531 : vector<8x24xf32>
    %cst_172 = arith.constant 1.000000e+00 : f32
    %533 = vector.broadcast %cst_172 : f32 to vector<8x24xf32>
    %534 = arith.addf %533, %532 : vector<8x24xf32>
    %535 = arith.divf %533, %534 : vector<8x24xf32>
    %536 = vector.extract_strided_slice %529 {offsets = [0, 24], sizes = [8, 8], strides = [1, 1]} : vector<8x32xf32> to vector<8x8xf32>
    %537 = math.tanh %536 : vector<8x8xf32>
    %538 = vector.extract_strided_slice %535 {offsets = [0, 8], sizes = [8, 8], strides = [1, 1]} : vector<8x24xf32> to vector<8x8xf32>
    %539 = arith.mulf %538, %519 : vector<8x8xf32>
    %540 = vector.extract_strided_slice %535 {offsets = [0, 0], sizes = [8, 8], strides = [1, 1]} : vector<8x24xf32> to vector<8x8xf32>
    %541 = arith.mulf %540, %537 : vector<8x8xf32>
    %542 = arith.addf %539, %541 : vector<8x8xf32>
    %543 = vector.extract_strided_slice %535 {offsets = [0, 16], sizes = [8, 8], strides = [1, 1]} : vector<8x24xf32> to vector<8x8xf32>
    %544 = math.tanh %542 : vector<8x8xf32>
    %545 = arith.mulf %543, %544 : vector<8x8xf32>
    %546 = arith.addf %523, %545 : vector<8x8xf32>
    %547 = arith.truncf %545 : vector<8x8xf32> to vector<8x8xbf16>
    %c16_173 = arith.constant 16 : index
    %c0_174 = arith.constant 0 : index
    %548 = vector.load %arg9[%c16_173, %c0_174] : memref<128x32xf32, #tpu.memory_space<vmem>>, vector<8x32xf32>
    %c104_175 = arith.constant 104 : index
    %c0_176 = arith.constant 0 : index
    %549 = vector.load %arg10[%c104_175, %c0_176] : memref<128x32xf32, #tpu.memory_space<vmem>>, vector<8x32xf32>
    %550 = arith.addf %548, %549 : vector<8x32xf32>
    %cst_177 = arith.constant dense<0.000000e+00> : vector<8x32xf32>
    %551 = tpu.matmul %547, %501, %cst_177 {dimension_numbers = #tpu.dot_dimension_numbers<[1], [0], [0], [1], [0, 0, 1, 1], [], []>} : vector<8x8xbf16>, vector<8x32xbf16>, vector<8x32xf32> -> vector<8x32xf32>
    %552 = arith.addf %550, %551 : vector<8x32xf32>
    %553 = vector.extract_strided_slice %552 {offsets = [0, 0], sizes = [8, 24], strides = [1, 1]} : vector<8x32xf32> to vector<8x24xf32>
    %554 = arith.negf %553 : vector<8x24xf32>
    %555 = math.exp %554 : vector<8x24xf32>
    %cst_178 = arith.constant 1.000000e+00 : f32
    %556 = vector.broadcast %cst_178 : f32 to vector<8x24xf32>
    %557 = arith.addf %556, %555 : vector<8x24xf32>
    %558 = arith.divf %556, %557 : vector<8x24xf32>
    %559 = vector.extract_strided_slice %552 {offsets = [0, 24], sizes = [8, 8], strides = [1, 1]} : vector<8x32xf32> to vector<8x8xf32>
    %560 = math.tanh %559 : vector<8x8xf32>
    %561 = vector.extract_strided_slice %558 {offsets = [0, 8], sizes = [8, 8], strides = [1, 1]} : vector<8x24xf32> to vector<8x8xf32>
    %562 = arith.mulf %561, %542 : vector<8x8xf32>
    %563 = vector.extract_strided_slice %558 {offsets = [0, 0], sizes = [8, 8], strides = [1, 1]} : vector<8x24xf32> to vector<8x8xf32>
    %564 = arith.mulf %563, %560 : vector<8x8xf32>
    %565 = arith.addf %562, %564 : vector<8x8xf32>
    %566 = vector.extract_strided_slice %558 {offsets = [0, 16], sizes = [8, 8], strides = [1, 1]} : vector<8x24xf32> to vector<8x8xf32>
    %567 = math.tanh %565 : vector<8x8xf32>
    %568 = arith.mulf %566, %567 : vector<8x8xf32>
    %569 = arith.addf %546, %568 : vector<8x8xf32>
    %570 = arith.truncf %568 : vector<8x8xf32> to vector<8x8xbf16>
    %c24_179 = arith.constant 24 : index
    %c0_180 = arith.constant 0 : index
    %571 = vector.load %arg9[%c24_179, %c0_180] : memref<128x32xf32, #tpu.memory_space<vmem>>, vector<8x32xf32>
    %c96_181 = arith.constant 96 : index
    %c0_182 = arith.constant 0 : index
    %572 = vector.load %arg10[%c96_181, %c0_182] : memref<128x32xf32, #tpu.memory_space<vmem>>, vector<8x32xf32>
    %573 = arith.addf %571, %572 : vector<8x32xf32>
    %cst_183 = arith.constant dense<0.000000e+00> : vector<8x32xf32>
    %574 = tpu.matmul %570, %501, %cst_183 {dimension_numbers = #tpu.dot_dimension_numbers<[1], [0], [0], [1], [0, 0, 1, 1], [], []>} : vector<8x8xbf16>, vector<8x32xbf16>, vector<8x32xf32> -> vector<8x32xf32>
    %575 = arith.addf %573, %574 : vector<8x32xf32>
    %576 = vector.extract_strided_slice %575 {offsets = [0, 0], sizes = [8, 24], strides = [1, 1]} : vector<8x32xf32> to vector<8x24xf32>
    %577 = arith.negf %576 : vector<8x24xf32>
    %578 = math.exp %577 : vector<8x24xf32>
    %cst_184 = arith.constant 1.000000e+00 : f32
    %579 = vector.broadcast %cst_184 : f32 to vector<8x24xf32>
    %580 = arith.addf %579, %578 : vector<8x24xf32>
    %581 = arith.divf %579, %580 : vector<8x24xf32>
    %582 = vector.extract_strided_slice %575 {offsets = [0, 24], sizes = [8, 8], strides = [1, 1]} : vector<8x32xf32> to vector<8x8xf32>
    %583 = math.tanh %582 : vector<8x8xf32>
    %584 = vector.extract_strided_slice %581 {offsets = [0, 8], sizes = [8, 8], strides = [1, 1]} : vector<8x24xf32> to vector<8x8xf32>
    %585 = arith.mulf %584, %565 : vector<8x8xf32>
    %586 = vector.extract_strided_slice %581 {offsets = [0, 0], sizes = [8, 8], strides = [1, 1]} : vector<8x24xf32> to vector<8x8xf32>
    %587 = arith.mulf %586, %583 : vector<8x8xf32>
    %588 = arith.addf %585, %587 : vector<8x8xf32>
    %589 = vector.extract_strided_slice %581 {offsets = [0, 16], sizes = [8, 8], strides = [1, 1]} : vector<8x24xf32> to vector<8x8xf32>
    %590 = math.tanh %588 : vector<8x8xf32>
    %591 = arith.mulf %589, %590 : vector<8x8xf32>
    %592 = arith.addf %569, %591 : vector<8x8xf32>
    %593 = arith.truncf %591 : vector<8x8xf32> to vector<8x8xbf16>
    %c32_185 = arith.constant 32 : index
    %c0_186 = arith.constant 0 : index
    %594 = vector.load %arg9[%c32_185, %c0_186] : memref<128x32xf32, #tpu.memory_space<vmem>>, vector<8x32xf32>
    %c88_187 = arith.constant 88 : index
    %c0_188 = arith.constant 0 : index
    %595 = vector.load %arg10[%c88_187, %c0_188] : memref<128x32xf32, #tpu.memory_space<vmem>>, vector<8x32xf32>
    %596 = arith.addf %594, %595 : vector<8x32xf32>
    %cst_189 = arith.constant dense<0.000000e+00> : vector<8x32xf32>
    %597 = tpu.matmul %593, %501, %cst_189 {dimension_numbers = #tpu.dot_dimension_numbers<[1], [0], [0], [1], [0, 0, 1, 1], [], []>} : vector<8x8xbf16>, vector<8x32xbf16>, vector<8x32xf32> -> vector<8x32xf32>
    %598 = arith.addf %596, %597 : vector<8x32xf32>
    %599 = vector.extract_strided_slice %598 {offsets = [0, 0], sizes = [8, 24], strides = [1, 1]} : vector<8x32xf32> to vector<8x24xf32>
    %600 = arith.negf %599 : vector<8x24xf32>
    %601 = math.exp %600 : vector<8x24xf32>
    %cst_190 = arith.constant 1.000000e+00 : f32
    %602 = vector.broadcast %cst_190 : f32 to vector<8x24xf32>
    %603 = arith.addf %602, %601 : vector<8x24xf32>
    %604 = arith.divf %602, %603 : vector<8x24xf32>
    %605 = vector.extract_strided_slice %598 {offsets = [0, 24], sizes = [8, 8], strides = [1, 1]} : vector<8x32xf32> to vector<8x8xf32>
    %606 = math.tanh %605 : vector<8x8xf32>
    %607 = vector.extract_strided_slice %604 {offsets = [0, 8], sizes = [8, 8], strides = [1, 1]} : vector<8x24xf32> to vector<8x8xf32>
    %608 = arith.mulf %607, %588 : vector<8x8xf32>
    %609 = vector.extract_strided_slice %604 {offsets = [0, 0], sizes = [8, 8], strides = [1, 1]} : vector<8x24xf32> to vector<8x8xf32>
    %610 = arith.mulf %609, %606 : vector<8x8xf32>
    %611 = arith.addf %608, %610 : vector<8x8xf32>
    %612 = vector.extract_strided_slice %604 {offsets = [0, 16], sizes = [8, 8], strides = [1, 1]} : vector<8x24xf32> to vector<8x8xf32>
    %613 = math.tanh %611 : vector<8x8xf32>
    %614 = arith.mulf %612, %613 : vector<8x8xf32>
    %615 = arith.addf %592, %614 : vector<8x8xf32>
    %616 = arith.truncf %614 : vector<8x8xf32> to vector<8x8xbf16>
    %c40_191 = arith.constant 40 : index
    %c0_192 = arith.constant 0 : index
    %617 = vector.load %arg9[%c40_191, %c0_192] : memref<128x32xf32, #tpu.memory_space<vmem>>, vector<8x32xf32>
    %c80_193 = arith.constant 80 : index
    %c0_194 = arith.constant 0 : index
    %618 = vector.load %arg10[%c80_193, %c0_194] : memref<128x32xf32, #tpu.memory_space<vmem>>, vector<8x32xf32>
    %619 = arith.addf %617, %618 : vector<8x32xf32>
    %cst_195 = arith.constant dense<0.000000e+00> : vector<8x32xf32>
    %620 = tpu.matmul %616, %501, %cst_195 {dimension_numbers = #tpu.dot_dimension_numbers<[1], [0], [0], [1], [0, 0, 1, 1], [], []>} : vector<8x8xbf16>, vector<8x32xbf16>, vector<8x32xf32> -> vector<8x32xf32>
    %621 = arith.addf %619, %620 : vector<8x32xf32>
    %622 = vector.extract_strided_slice %621 {offsets = [0, 0], sizes = [8, 24], strides = [1, 1]} : vector<8x32xf32> to vector<8x24xf32>
    %623 = arith.negf %622 : vector<8x24xf32>
    %624 = math.exp %623 : vector<8x24xf32>
    %cst_196 = arith.constant 1.000000e+00 : f32
    %625 = vector.broadcast %cst_196 : f32 to vector<8x24xf32>
    %626 = arith.addf %625, %624 : vector<8x24xf32>
    %627 = arith.divf %625, %626 : vector<8x24xf32>
    %628 = vector.extract_strided_slice %621 {offsets = [0, 24], sizes = [8, 8], strides = [1, 1]} : vector<8x32xf32> to vector<8x8xf32>
    %629 = math.tanh %628 : vector<8x8xf32>
    %630 = vector.extract_strided_slice %627 {offsets = [0, 8], sizes = [8, 8], strides = [1, 1]} : vector<8x24xf32> to vector<8x8xf32>
    %631 = arith.mulf %630, %611 : vector<8x8xf32>
    %632 = vector.extract_strided_slice %627 {offsets = [0, 0], sizes = [8, 8], strides = [1, 1]} : vector<8x24xf32> to vector<8x8xf32>
    %633 = arith.mulf %632, %629 : vector<8x8xf32>
    %634 = arith.addf %631, %633 : vector<8x8xf32>
    %635 = vector.extract_strided_slice %627 {offsets = [0, 16], sizes = [8, 8], strides = [1, 1]} : vector<8x24xf32> to vector<8x8xf32>
    %636 = math.tanh %634 : vector<8x8xf32>
    %637 = arith.mulf %635, %636 : vector<8x8xf32>
    %638 = arith.addf %615, %637 : vector<8x8xf32>
    %639 = arith.truncf %637 : vector<8x8xf32> to vector<8x8xbf16>
    %c48_197 = arith.constant 48 : index
    %c0_198 = arith.constant 0 : index
    %640 = vector.load %arg9[%c48_197, %c0_198] : memref<128x32xf32, #tpu.memory_space<vmem>>, vector<8x32xf32>
    %c72_199 = arith.constant 72 : index
    %c0_200 = arith.constant 0 : index
    %641 = vector.load %arg10[%c72_199, %c0_200] : memref<128x32xf32, #tpu.memory_space<vmem>>, vector<8x32xf32>
    %642 = arith.addf %640, %641 : vector<8x32xf32>
    %cst_201 = arith.constant dense<0.000000e+00> : vector<8x32xf32>
    %643 = tpu.matmul %639, %501, %cst_201 {dimension_numbers = #tpu.dot_dimension_numbers<[1], [0], [0], [1], [0, 0, 1, 1], [], []>} : vector<8x8xbf16>, vector<8x32xbf16>, vector<8x32xf32> -> vector<8x32xf32>
    %644 = arith.addf %642, %643 : vector<8x32xf32>
    %645 = vector.extract_strided_slice %644 {offsets = [0, 0], sizes = [8, 24], strides = [1, 1]} : vector<8x32xf32> to vector<8x24xf32>
    %646 = arith.negf %645 : vector<8x24xf32>
    %647 = math.exp %646 : vector<8x24xf32>
    %cst_202 = arith.constant 1.000000e+00 : f32
    %648 = vector.broadcast %cst_202 : f32 to vector<8x24xf32>
    %649 = arith.addf %648, %647 : vector<8x24xf32>
    %650 = arith.divf %648, %649 : vector<8x24xf32>
    %651 = vector.extract_strided_slice %644 {offsets = [0, 24], sizes = [8, 8], strides = [1, 1]} : vector<8x32xf32> to vector<8x8xf32>
    %652 = math.tanh %651 : vector<8x8xf32>
    %653 = vector.extract_strided_slice %650 {offsets = [0, 8], sizes = [8, 8], strides = [1, 1]} : vector<8x24xf32> to vector<8x8xf32>
    %654 = arith.mulf %653, %634 : vector<8x8xf32>
    %655 = vector.extract_strided_slice %650 {offsets = [0, 0], sizes = [8, 8], strides = [1, 1]} : vector<8x24xf32> to vector<8x8xf32>
    %656 = arith.mulf %655, %652 : vector<8x8xf32>
    %657 = arith.addf %654, %656 : vector<8x8xf32>
    %658 = vector.extract_strided_slice %650 {offsets = [0, 16], sizes = [8, 8], strides = [1, 1]} : vector<8x24xf32> to vector<8x8xf32>
    %659 = math.tanh %657 : vector<8x8xf32>
    %660 = arith.mulf %658, %659 : vector<8x8xf32>
    %661 = arith.addf %638, %660 : vector<8x8xf32>
    %662 = arith.truncf %660 : vector<8x8xf32> to vector<8x8xbf16>
    %c56_203 = arith.constant 56 : index
    %c0_204 = arith.constant 0 : index
    %663 = vector.load %arg9[%c56_203, %c0_204] : memref<128x32xf32, #tpu.memory_space<vmem>>, vector<8x32xf32>
    %c64_205 = arith.constant 64 : index
    %c0_206 = arith.constant 0 : index
    %664 = vector.load %arg10[%c64_205, %c0_206] : memref<128x32xf32, #tpu.memory_space<vmem>>, vector<8x32xf32>
    %665 = arith.addf %663, %664 : vector<8x32xf32>
    %cst_207 = arith.constant dense<0.000000e+00> : vector<8x32xf32>
    %666 = tpu.matmul %662, %501, %cst_207 {dimension_numbers = #tpu.dot_dimension_numbers<[1], [0], [0], [1], [0, 0, 1, 1], [], []>} : vector<8x8xbf16>, vector<8x32xbf16>, vector<8x32xf32> -> vector<8x32xf32>
    %667 = arith.addf %665, %666 : vector<8x32xf32>
    %668 = vector.extract_strided_slice %667 {offsets = [0, 0], sizes = [8, 24], strides = [1, 1]} : vector<8x32xf32> to vector<8x24xf32>
    %669 = arith.negf %668 : vector<8x24xf32>
    %670 = math.exp %669 : vector<8x24xf32>
    %cst_208 = arith.constant 1.000000e+00 : f32
    %671 = vector.broadcast %cst_208 : f32 to vector<8x24xf32>
    %672 = arith.addf %671, %670 : vector<8x24xf32>
    %673 = arith.divf %671, %672 : vector<8x24xf32>
    %674 = vector.extract_strided_slice %667 {offsets = [0, 24], sizes = [8, 8], strides = [1, 1]} : vector<8x32xf32> to vector<8x8xf32>
    %675 = math.tanh %674 : vector<8x8xf32>
    %676 = vector.extract_strided_slice %673 {offsets = [0, 8], sizes = [8, 8], strides = [1, 1]} : vector<8x24xf32> to vector<8x8xf32>
    %677 = arith.mulf %676, %657 : vector<8x8xf32>
    %678 = vector.extract_strided_slice %673 {offsets = [0, 0], sizes = [8, 8], strides = [1, 1]} : vector<8x24xf32> to vector<8x8xf32>
    %679 = arith.mulf %678, %675 : vector<8x8xf32>
    %680 = arith.addf %677, %679 : vector<8x8xf32>
    %681 = vector.extract_strided_slice %673 {offsets = [0, 16], sizes = [8, 8], strides = [1, 1]} : vector<8x24xf32> to vector<8x8xf32>
    %682 = math.tanh %680 : vector<8x8xf32>
    %683 = arith.mulf %681, %682 : vector<8x8xf32>
    %684 = arith.addf %661, %683 : vector<8x8xf32>
    %685 = arith.truncf %683 : vector<8x8xf32> to vector<8x8xbf16>
    %c64_209 = arith.constant 64 : index
    %c0_210 = arith.constant 0 : index
    %686 = vector.load %arg9[%c64_209, %c0_210] : memref<128x32xf32, #tpu.memory_space<vmem>>, vector<8x32xf32>
    %c56_211 = arith.constant 56 : index
    %c0_212 = arith.constant 0 : index
    %687 = vector.load %arg10[%c56_211, %c0_212] : memref<128x32xf32, #tpu.memory_space<vmem>>, vector<8x32xf32>
    %688 = arith.addf %686, %687 : vector<8x32xf32>
    %cst_213 = arith.constant dense<0.000000e+00> : vector<8x32xf32>
    %689 = tpu.matmul %685, %501, %cst_213 {dimension_numbers = #tpu.dot_dimension_numbers<[1], [0], [0], [1], [0, 0, 1, 1], [], []>} : vector<8x8xbf16>, vector<8x32xbf16>, vector<8x32xf32> -> vector<8x32xf32>
    %690 = arith.addf %688, %689 : vector<8x32xf32>
    %691 = vector.extract_strided_slice %690 {offsets = [0, 0], sizes = [8, 24], strides = [1, 1]} : vector<8x32xf32> to vector<8x24xf32>
    %692 = arith.negf %691 : vector<8x24xf32>
    %693 = math.exp %692 : vector<8x24xf32>
    %cst_214 = arith.constant 1.000000e+00 : f32
    %694 = vector.broadcast %cst_214 : f32 to vector<8x24xf32>
    %695 = arith.addf %694, %693 : vector<8x24xf32>
    %696 = arith.divf %694, %695 : vector<8x24xf32>
    %697 = vector.extract_strided_slice %690 {offsets = [0, 24], sizes = [8, 8], strides = [1, 1]} : vector<8x32xf32> to vector<8x8xf32>
    %698 = math.tanh %697 : vector<8x8xf32>
    %699 = vector.extract_strided_slice %696 {offsets = [0, 8], sizes = [8, 8], strides = [1, 1]} : vector<8x24xf32> to vector<8x8xf32>
    %700 = arith.mulf %699, %680 : vector<8x8xf32>
    %701 = vector.extract_strided_slice %696 {offsets = [0, 0], sizes = [8, 8], strides = [1, 1]} : vector<8x24xf32> to vector<8x8xf32>
    %702 = arith.mulf %701, %698 : vector<8x8xf32>
    %703 = arith.addf %700, %702 : vector<8x8xf32>
    %704 = vector.extract_strided_slice %696 {offsets = [0, 16], sizes = [8, 8], strides = [1, 1]} : vector<8x24xf32> to vector<8x8xf32>
    %705 = math.tanh %703 : vector<8x8xf32>
    %706 = arith.mulf %704, %705 : vector<8x8xf32>
    %707 = arith.addf %684, %706 : vector<8x8xf32>
    %708 = arith.truncf %706 : vector<8x8xf32> to vector<8x8xbf16>
    %c72_215 = arith.constant 72 : index
    %c0_216 = arith.constant 0 : index
    %709 = vector.load %arg9[%c72_215, %c0_216] : memref<128x32xf32, #tpu.memory_space<vmem>>, vector<8x32xf32>
    %c48_217 = arith.constant 48 : index
    %c0_218 = arith.constant 0 : index
    %710 = vector.load %arg10[%c48_217, %c0_218] : memref<128x32xf32, #tpu.memory_space<vmem>>, vector<8x32xf32>
    %711 = arith.addf %709, %710 : vector<8x32xf32>
    %cst_219 = arith.constant dense<0.000000e+00> : vector<8x32xf32>
    %712 = tpu.matmul %708, %501, %cst_219 {dimension_numbers = #tpu.dot_dimension_numbers<[1], [0], [0], [1], [0, 0, 1, 1], [], []>} : vector<8x8xbf16>, vector<8x32xbf16>, vector<8x32xf32> -> vector<8x32xf32>
    %713 = arith.addf %711, %712 : vector<8x32xf32>
    %714 = vector.extract_strided_slice %713 {offsets = [0, 0], sizes = [8, 24], strides = [1, 1]} : vector<8x32xf32> to vector<8x24xf32>
    %715 = arith.negf %714 : vector<8x24xf32>
    %716 = math.exp %715 : vector<8x24xf32>
    %cst_220 = arith.constant 1.000000e+00 : f32
    %717 = vector.broadcast %cst_220 : f32 to vector<8x24xf32>
    %718 = arith.addf %717, %716 : vector<8x24xf32>
    %719 = arith.divf %717, %718 : vector<8x24xf32>
    %720 = vector.extract_strided_slice %713 {offsets = [0, 24], sizes = [8, 8], strides = [1, 1]} : vector<8x32xf32> to vector<8x8xf32>
    %721 = math.tanh %720 : vector<8x8xf32>
    %722 = vector.extract_strided_slice %719 {offsets = [0, 8], sizes = [8, 8], strides = [1, 1]} : vector<8x24xf32> to vector<8x8xf32>
    %723 = arith.mulf %722, %703 : vector<8x8xf32>
    %724 = vector.extract_strided_slice %719 {offsets = [0, 0], sizes = [8, 8], strides = [1, 1]} : vector<8x24xf32> to vector<8x8xf32>
    %725 = arith.mulf %724, %721 : vector<8x8xf32>
    %726 = arith.addf %723, %725 : vector<8x8xf32>
    %727 = vector.extract_strided_slice %719 {offsets = [0, 16], sizes = [8, 8], strides = [1, 1]} : vector<8x24xf32> to vector<8x8xf32>
    %728 = math.tanh %726 : vector<8x8xf32>
    %729 = arith.mulf %727, %728 : vector<8x8xf32>
    %730 = arith.addf %707, %729 : vector<8x8xf32>
    %731 = arith.truncf %729 : vector<8x8xf32> to vector<8x8xbf16>
    %c80_221 = arith.constant 80 : index
    %c0_222 = arith.constant 0 : index
    %732 = vector.load %arg9[%c80_221, %c0_222] : memref<128x32xf32, #tpu.memory_space<vmem>>, vector<8x32xf32>
    %c40_223 = arith.constant 40 : index
    %c0_224 = arith.constant 0 : index
    %733 = vector.load %arg10[%c40_223, %c0_224] : memref<128x32xf32, #tpu.memory_space<vmem>>, vector<8x32xf32>
    %734 = arith.addf %732, %733 : vector<8x32xf32>
    %cst_225 = arith.constant dense<0.000000e+00> : vector<8x32xf32>
    %735 = tpu.matmul %731, %501, %cst_225 {dimension_numbers = #tpu.dot_dimension_numbers<[1], [0], [0], [1], [0, 0, 1, 1], [], []>} : vector<8x8xbf16>, vector<8x32xbf16>, vector<8x32xf32> -> vector<8x32xf32>
    %736 = arith.addf %734, %735 : vector<8x32xf32>
    %737 = vector.extract_strided_slice %736 {offsets = [0, 0], sizes = [8, 24], strides = [1, 1]} : vector<8x32xf32> to vector<8x24xf32>
    %738 = arith.negf %737 : vector<8x24xf32>
    %739 = math.exp %738 : vector<8x24xf32>
    %cst_226 = arith.constant 1.000000e+00 : f32
    %740 = vector.broadcast %cst_226 : f32 to vector<8x24xf32>
    %741 = arith.addf %740, %739 : vector<8x24xf32>
    %742 = arith.divf %740, %741 : vector<8x24xf32>
    %743 = vector.extract_strided_slice %736 {offsets = [0, 24], sizes = [8, 8], strides = [1, 1]} : vector<8x32xf32> to vector<8x8xf32>
    %744 = math.tanh %743 : vector<8x8xf32>
    %745 = vector.extract_strided_slice %742 {offsets = [0, 8], sizes = [8, 8], strides = [1, 1]} : vector<8x24xf32> to vector<8x8xf32>
    %746 = arith.mulf %745, %726 : vector<8x8xf32>
    %747 = vector.extract_strided_slice %742 {offsets = [0, 0], sizes = [8, 8], strides = [1, 1]} : vector<8x24xf32> to vector<8x8xf32>
    %748 = arith.mulf %747, %744 : vector<8x8xf32>
    %749 = arith.addf %746, %748 : vector<8x8xf32>
    %750 = vector.extract_strided_slice %742 {offsets = [0, 16], sizes = [8, 8], strides = [1, 1]} : vector<8x24xf32> to vector<8x8xf32>
    %751 = math.tanh %749 : vector<8x8xf32>
    %752 = arith.mulf %750, %751 : vector<8x8xf32>
    %753 = arith.addf %730, %752 : vector<8x8xf32>
    %754 = arith.truncf %752 : vector<8x8xf32> to vector<8x8xbf16>
    %c88_227 = arith.constant 88 : index
    %c0_228 = arith.constant 0 : index
    %755 = vector.load %arg9[%c88_227, %c0_228] : memref<128x32xf32, #tpu.memory_space<vmem>>, vector<8x32xf32>
    %c32_229 = arith.constant 32 : index
    %c0_230 = arith.constant 0 : index
    %756 = vector.load %arg10[%c32_229, %c0_230] : memref<128x32xf32, #tpu.memory_space<vmem>>, vector<8x32xf32>
    %757 = arith.addf %755, %756 : vector<8x32xf32>
    %cst_231 = arith.constant dense<0.000000e+00> : vector<8x32xf32>
    %758 = tpu.matmul %754, %501, %cst_231 {dimension_numbers = #tpu.dot_dimension_numbers<[1], [0], [0], [1], [0, 0, 1, 1], [], []>} : vector<8x8xbf16>, vector<8x32xbf16>, vector<8x32xf32> -> vector<8x32xf32>
    %759 = arith.addf %757, %758 : vector<8x32xf32>
    %760 = vector.extract_strided_slice %759 {offsets = [0, 0], sizes = [8, 24], strides = [1, 1]} : vector<8x32xf32> to vector<8x24xf32>
    %761 = arith.negf %760 : vector<8x24xf32>
    %762 = math.exp %761 : vector<8x24xf32>
    %cst_232 = arith.constant 1.000000e+00 : f32
    %763 = vector.broadcast %cst_232 : f32 to vector<8x24xf32>
    %764 = arith.addf %763, %762 : vector<8x24xf32>
    %765 = arith.divf %763, %764 : vector<8x24xf32>
    %766 = vector.extract_strided_slice %759 {offsets = [0, 24], sizes = [8, 8], strides = [1, 1]} : vector<8x32xf32> to vector<8x8xf32>
    %767 = math.tanh %766 : vector<8x8xf32>
    %768 = vector.extract_strided_slice %765 {offsets = [0, 8], sizes = [8, 8], strides = [1, 1]} : vector<8x24xf32> to vector<8x8xf32>
    %769 = arith.mulf %768, %749 : vector<8x8xf32>
    %770 = vector.extract_strided_slice %765 {offsets = [0, 0], sizes = [8, 8], strides = [1, 1]} : vector<8x24xf32> to vector<8x8xf32>
    %771 = arith.mulf %770, %767 : vector<8x8xf32>
    %772 = arith.addf %769, %771 : vector<8x8xf32>
    %773 = vector.extract_strided_slice %765 {offsets = [0, 16], sizes = [8, 8], strides = [1, 1]} : vector<8x24xf32> to vector<8x8xf32>
    %774 = math.tanh %772 : vector<8x8xf32>
    %775 = arith.mulf %773, %774 : vector<8x8xf32>
    %776 = arith.addf %753, %775 : vector<8x8xf32>
    %777 = arith.truncf %775 : vector<8x8xf32> to vector<8x8xbf16>
    %c96_233 = arith.constant 96 : index
    %c0_234 = arith.constant 0 : index
    %778 = vector.load %arg9[%c96_233, %c0_234] : memref<128x32xf32, #tpu.memory_space<vmem>>, vector<8x32xf32>
    %c24_235 = arith.constant 24 : index
    %c0_236 = arith.constant 0 : index
    %779 = vector.load %arg10[%c24_235, %c0_236] : memref<128x32xf32, #tpu.memory_space<vmem>>, vector<8x32xf32>
    %780 = arith.addf %778, %779 : vector<8x32xf32>
    %cst_237 = arith.constant dense<0.000000e+00> : vector<8x32xf32>
    %781 = tpu.matmul %777, %501, %cst_237 {dimension_numbers = #tpu.dot_dimension_numbers<[1], [0], [0], [1], [0, 0, 1, 1], [], []>} : vector<8x8xbf16>, vector<8x32xbf16>, vector<8x32xf32> -> vector<8x32xf32>
    %782 = arith.addf %780, %781 : vector<8x32xf32>
    %783 = vector.extract_strided_slice %782 {offsets = [0, 0], sizes = [8, 24], strides = [1, 1]} : vector<8x32xf32> to vector<8x24xf32>
    %784 = arith.negf %783 : vector<8x24xf32>
    %785 = math.exp %784 : vector<8x24xf32>
    %cst_238 = arith.constant 1.000000e+00 : f32
    %786 = vector.broadcast %cst_238 : f32 to vector<8x24xf32>
    %787 = arith.addf %786, %785 : vector<8x24xf32>
    %788 = arith.divf %786, %787 : vector<8x24xf32>
    %789 = vector.extract_strided_slice %782 {offsets = [0, 24], sizes = [8, 8], strides = [1, 1]} : vector<8x32xf32> to vector<8x8xf32>
    %790 = math.tanh %789 : vector<8x8xf32>
    %791 = vector.extract_strided_slice %788 {offsets = [0, 8], sizes = [8, 8], strides = [1, 1]} : vector<8x24xf32> to vector<8x8xf32>
    %792 = arith.mulf %791, %772 : vector<8x8xf32>
    %793 = vector.extract_strided_slice %788 {offsets = [0, 0], sizes = [8, 8], strides = [1, 1]} : vector<8x24xf32> to vector<8x8xf32>
    %794 = arith.mulf %793, %790 : vector<8x8xf32>
    %795 = arith.addf %792, %794 : vector<8x8xf32>
    %796 = vector.extract_strided_slice %788 {offsets = [0, 16], sizes = [8, 8], strides = [1, 1]} : vector<8x24xf32> to vector<8x8xf32>
    %797 = math.tanh %795 : vector<8x8xf32>
    %798 = arith.mulf %796, %797 : vector<8x8xf32>
    %799 = arith.addf %776, %798 : vector<8x8xf32>
    %800 = arith.truncf %798 : vector<8x8xf32> to vector<8x8xbf16>
    %c104_239 = arith.constant 104 : index
    %c0_240 = arith.constant 0 : index
    %801 = vector.load %arg9[%c104_239, %c0_240] : memref<128x32xf32, #tpu.memory_space<vmem>>, vector<8x32xf32>
    %c16_241 = arith.constant 16 : index
    %c0_242 = arith.constant 0 : index
    %802 = vector.load %arg10[%c16_241, %c0_242] : memref<128x32xf32, #tpu.memory_space<vmem>>, vector<8x32xf32>
    %803 = arith.addf %801, %802 : vector<8x32xf32>
    %cst_243 = arith.constant dense<0.000000e+00> : vector<8x32xf32>
    %804 = tpu.matmul %800, %501, %cst_243 {dimension_numbers = #tpu.dot_dimension_numbers<[1], [0], [0], [1], [0, 0, 1, 1], [], []>} : vector<8x8xbf16>, vector<8x32xbf16>, vector<8x32xf32> -> vector<8x32xf32>
    %805 = arith.addf %803, %804 : vector<8x32xf32>
    %806 = vector.extract_strided_slice %805 {offsets = [0, 0], sizes = [8, 24], strides = [1, 1]} : vector<8x32xf32> to vector<8x24xf32>
    %807 = arith.negf %806 : vector<8x24xf32>
    %808 = math.exp %807 : vector<8x24xf32>
    %cst_244 = arith.constant 1.000000e+00 : f32
    %809 = vector.broadcast %cst_244 : f32 to vector<8x24xf32>
    %810 = arith.addf %809, %808 : vector<8x24xf32>
    %811 = arith.divf %809, %810 : vector<8x24xf32>
    %812 = vector.extract_strided_slice %805 {offsets = [0, 24], sizes = [8, 8], strides = [1, 1]} : vector<8x32xf32> to vector<8x8xf32>
    %813 = math.tanh %812 : vector<8x8xf32>
    %814 = vector.extract_strided_slice %811 {offsets = [0, 8], sizes = [8, 8], strides = [1, 1]} : vector<8x24xf32> to vector<8x8xf32>
    %815 = arith.mulf %814, %795 : vector<8x8xf32>
    %816 = vector.extract_strided_slice %811 {offsets = [0, 0], sizes = [8, 8], strides = [1, 1]} : vector<8x24xf32> to vector<8x8xf32>
    %817 = arith.mulf %816, %813 : vector<8x8xf32>
    %818 = arith.addf %815, %817 : vector<8x8xf32>
    %819 = vector.extract_strided_slice %811 {offsets = [0, 16], sizes = [8, 8], strides = [1, 1]} : vector<8x24xf32> to vector<8x8xf32>
    %820 = math.tanh %818 : vector<8x8xf32>
    %821 = arith.mulf %819, %820 : vector<8x8xf32>
    %822 = arith.addf %799, %821 : vector<8x8xf32>
    %823 = arith.truncf %821 : vector<8x8xf32> to vector<8x8xbf16>
    %c112_245 = arith.constant 112 : index
    %c0_246 = arith.constant 0 : index
    %824 = vector.load %arg9[%c112_245, %c0_246] : memref<128x32xf32, #tpu.memory_space<vmem>>, vector<8x32xf32>
    %c8_247 = arith.constant 8 : index
    %c0_248 = arith.constant 0 : index
    %825 = vector.load %arg10[%c8_247, %c0_248] : memref<128x32xf32, #tpu.memory_space<vmem>>, vector<8x32xf32>
    %826 = arith.addf %824, %825 : vector<8x32xf32>
    %cst_249 = arith.constant dense<0.000000e+00> : vector<8x32xf32>
    %827 = tpu.matmul %823, %501, %cst_249 {dimension_numbers = #tpu.dot_dimension_numbers<[1], [0], [0], [1], [0, 0, 1, 1], [], []>} : vector<8x8xbf16>, vector<8x32xbf16>, vector<8x32xf32> -> vector<8x32xf32>
    %828 = arith.addf %826, %827 : vector<8x32xf32>
    %829 = vector.extract_strided_slice %828 {offsets = [0, 0], sizes = [8, 24], strides = [1, 1]} : vector<8x32xf32> to vector<8x24xf32>
    %830 = arith.negf %829 : vector<8x24xf32>
    %831 = math.exp %830 : vector<8x24xf32>
    %cst_250 = arith.constant 1.000000e+00 : f32
    %832 = vector.broadcast %cst_250 : f32 to vector<8x24xf32>
    %833 = arith.addf %832, %831 : vector<8x24xf32>
    %834 = arith.divf %832, %833 : vector<8x24xf32>
    %835 = vector.extract_strided_slice %828 {offsets = [0, 24], sizes = [8, 8], strides = [1, 1]} : vector<8x32xf32> to vector<8x8xf32>
    %836 = math.tanh %835 : vector<8x8xf32>
    %837 = vector.extract_strided_slice %834 {offsets = [0, 8], sizes = [8, 8], strides = [1, 1]} : vector<8x24xf32> to vector<8x8xf32>
    %838 = arith.mulf %837, %818 : vector<8x8xf32>
    %839 = vector.extract_strided_slice %834 {offsets = [0, 0], sizes = [8, 8], strides = [1, 1]} : vector<8x24xf32> to vector<8x8xf32>
    %840 = arith.mulf %839, %836 : vector<8x8xf32>
    %841 = arith.addf %838, %840 : vector<8x8xf32>
    %842 = vector.extract_strided_slice %834 {offsets = [0, 16], sizes = [8, 8], strides = [1, 1]} : vector<8x24xf32> to vector<8x8xf32>
    %843 = math.tanh %841 : vector<8x8xf32>
    %844 = arith.mulf %842, %843 : vector<8x8xf32>
    %845 = arith.addf %822, %844 : vector<8x8xf32>
    %846 = arith.truncf %844 : vector<8x8xf32> to vector<8x8xbf16>
    %c120_251 = arith.constant 120 : index
    %c0_252 = arith.constant 0 : index
    %847 = vector.load %arg9[%c120_251, %c0_252] : memref<128x32xf32, #tpu.memory_space<vmem>>, vector<8x32xf32>
    %c0_253 = arith.constant 0 : index
    %c0_254 = arith.constant 0 : index
    %848 = vector.load %arg10[%c0_253, %c0_254] : memref<128x32xf32, #tpu.memory_space<vmem>>, vector<8x32xf32>
    %849 = arith.addf %847, %848 : vector<8x32xf32>
    %cst_255 = arith.constant dense<0.000000e+00> : vector<8x32xf32>
    %850 = tpu.matmul %846, %501, %cst_255 {dimension_numbers = #tpu.dot_dimension_numbers<[1], [0], [0], [1], [0, 0, 1, 1], [], []>} : vector<8x8xbf16>, vector<8x32xbf16>, vector<8x32xf32> -> vector<8x32xf32>
    %851 = arith.addf %849, %850 : vector<8x32xf32>
    %852 = vector.extract_strided_slice %851 {offsets = [0, 0], sizes = [8, 24], strides = [1, 1]} : vector<8x32xf32> to vector<8x24xf32>
    %853 = arith.negf %852 : vector<8x24xf32>
    %854 = math.exp %853 : vector<8x24xf32>
    %cst_256 = arith.constant 1.000000e+00 : f32
    %855 = vector.broadcast %cst_256 : f32 to vector<8x24xf32>
    %856 = arith.addf %855, %854 : vector<8x24xf32>
    %857 = arith.divf %855, %856 : vector<8x24xf32>
    %858 = vector.extract_strided_slice %851 {offsets = [0, 24], sizes = [8, 8], strides = [1, 1]} : vector<8x32xf32> to vector<8x8xf32>
    %859 = math.tanh %858 : vector<8x8xf32>
    %860 = vector.extract_strided_slice %857 {offsets = [0, 8], sizes = [8, 8], strides = [1, 1]} : vector<8x24xf32> to vector<8x8xf32>
    %861 = arith.mulf %860, %841 : vector<8x8xf32>
    %862 = vector.extract_strided_slice %857 {offsets = [0, 0], sizes = [8, 8], strides = [1, 1]} : vector<8x24xf32> to vector<8x8xf32>
    %863 = arith.mulf %862, %859 : vector<8x8xf32>
    %864 = arith.addf %861, %863 : vector<8x8xf32>
    %865 = vector.extract_strided_slice %857 {offsets = [0, 16], sizes = [8, 8], strides = [1, 1]} : vector<8x24xf32> to vector<8x8xf32>
    %866 = math.tanh %864 : vector<8x8xf32>
    %867 = arith.mulf %865, %866 : vector<8x8xf32>
    %868 = arith.addf %845, %867 : vector<8x8xf32>
    %869 = vector.extract_strided_slice %868 {offsets = [0, 0], sizes = [2, 8], strides = [1, 1]} : vector<8x8xf32> to vector<2x8xf32>
    %cst_257 = arith.constant 6.250000e-02 : f32
    %870 = vector.broadcast %cst_257 : f32 to vector<2x8xf32>
    %871 = arith.mulf %869, %870 : vector<2x8xf32>
    %872 = tpu.concatenate %78, %96, %871 in 1 : vector<2x8xf32>, vector<2x8xf32>, vector<2x8xf32> -> vector<2x24xf32>
    %873 = arith.truncf %872 : vector<2x24xf32> to vector<2x24xbf16>
    %c560 = arith.constant 560 : index
    %c0_258 = arith.constant 0 : index
    %874 = vector.load %arg3[%c560, %c0_258] : memref<640x256xbf16, #tpu.memory_space<vmem>>, vector<24x32xbf16>
    %cst_259 = arith.constant dense<0.000000e+00> : vector<2x32xf32>
    %875 = tpu.matmul %873, %874, %cst_259 {dimension_numbers = #tpu.dot_dimension_numbers<[1], [0], [0], [1], [0, 0, 1, 1], [], []>} : vector<2x24xbf16>, vector<24x32xbf16>, vector<2x32xf32> -> vector<2x32xf32>
    %c6 = arith.constant 6 : index
    %c0_260 = arith.constant 0 : index
    %876 = vector.load %arg4[%c6, %c0_260] : memref<16x256xf32, #tpu.memory_space<vmem>>, vector<1x32xf32>
    %877 = vector.broadcast %876 : vector<1x32xf32> to vector<2x32xf32>
    %878 = arith.addf %875, %877 : vector<2x32xf32>
    %cst_261 = arith.constant 0.000000e+00 : f32
    %879 = vector.broadcast %cst_261 : f32 to vector<2x32xf32>
    %880 = arith.maximumf %878, %879 : vector<2x32xf32>
    %881 = arith.truncf %880 : vector<2x32xf32> to vector<2x32xbf16>
    %c592 = arith.constant 592 : index
    %c0_262 = arith.constant 0 : index
    %882 = vector.load %arg3[%c592, %c0_262] : memref<640x256xbf16, #tpu.memory_space<vmem>>, vector<32x5xbf16>
    %cst_263 = arith.constant dense<0.000000e+00> : vector<2x5xf32>
    %883 = tpu.matmul %881, %882, %cst_263 {dimension_numbers = #tpu.dot_dimension_numbers<[1], [0], [0], [1], [0, 0, 1, 1], [], []>} : vector<2x32xbf16>, vector<32x5xbf16>, vector<2x5xf32> -> vector<2x5xf32>
    %c7 = arith.constant 7 : index
    %c0_264 = arith.constant 0 : index
    %884 = vector.load %arg4[%c7, %c0_264] : memref<16x256xf32, #tpu.memory_space<vmem>>, vector<1x5xf32>
    %885 = vector.broadcast %884 : vector<1x5xf32> to vector<2x5xf32>
    %886 = arith.addf %883, %885 : vector<2x5xf32>
    %cst_265 = arith.constant 0.000000e+00 : f32
    %887 = vector.broadcast %cst_265 : f32 to vector<2x5xf32>
    %888 = arith.maximumf %886, %887 : vector<2x5xf32>
    %889 = arith.truncf %888 : vector<2x5xf32> to vector<2x5xbf16>
    %c624 = arith.constant 624 : index
    %c0_266 = arith.constant 0 : index
    %890 = vector.load %arg3[%c624, %c0_266] : memref<640x256xbf16, #tpu.memory_space<vmem>>, vector<5x1xbf16>
    %cst_267 = arith.constant dense<0.000000e+00> : vector<2x1xf32>
    %891 = tpu.matmul %889, %890, %cst_267 {dimension_numbers = #tpu.dot_dimension_numbers<[1], [0], [0], [1], [0, 0, 1, 1], [], []>} : vector<2x5xbf16>, vector<5x1xbf16>, vector<2x1xf32> -> vector<2x1xf32>
    %c8_268 = arith.constant 8 : index
    %c0_269 = arith.constant 0 : index
    %892 = vector.load %arg4[%c8_268, %c0_269] : memref<16x256xf32, #tpu.memory_space<vmem>>, vector<1x1xf32>
    %893 = vector.broadcast %892 : vector<1x1xf32> to vector<2x1xf32>
    %894 = arith.addf %891, %893 : vector<2x1xf32>
    %895 = arith.negf %894 : vector<2x1xf32>
    %896 = math.exp %895 : vector<2x1xf32>
    %cst_270 = arith.constant 1.000000e+00 : f32
    %897 = vector.broadcast %cst_270 : f32 to vector<2x1xf32>
    %898 = arith.addf %897, %896 : vector<2x1xf32>
    %899 = arith.divf %897, %898 : vector<2x1xf32>
    %c0_271 = arith.constant 0 : index
    %c0_272 = arith.constant 0 : index
    %900 = vector.load %arg5[%c0_271, %c0_272] : memref<2x1xf32, #tpu.memory_space<vmem>>, vector<2x1xf32>
    tpu.vector_store %arg5[%c0_271, %c0_272], %899 {strides = array<i32>} : memref<2x1xf32, #tpu.memory_space<vmem>>, vector<2x1xf32>,
    return
  }
}

</mosaic_0001>

<bundles_post_ra>
// kernel: slamnet_forward.1
= control target key start
LH: loop header
LB: loop body
LE: loop exit
PB: predicated region body
PF: predicated region fallthrough
CT: control target
= control target key end

     0   :  { %10 = vsyncpa [#allocation8], 0  ;;  %s6062_s18 = smov [#allocation7]   ;;  %s7480_s0 = inlined_call_operand.vmem [shape: s32[2,16,1], index: 0, kind: input, shape index: {}]   ;;  %s7481_s1 = inlined_call_operand.vmem [shape: s32[128,1], index: 1, kind: input, shape index: {}]   ;;  %s7482_s2 = inlined_call_operand.vmem [shape: s32[128,1], index: 2, kind: input, shape index: {}]   ;;  %s7483_s3 = inlined_call_operand.hbm [shape: bf16[640,256], index: 3, kind: input, shape index: {}]   ;;  %s7484_s4 = inlined_call_operand.vmem [shape: f32[16,256], index: 4, kind: input, shape index: {}]   ;;  %s7485_s5 = inlined_call_operand.vmem [shape: f32[2,1], index: 5, kind: output, shape index: {}]  }
   0x1   :  { %s22_s19 = sshll.u32 %s6062_s18, 4  ;;  %s6038_s22 = scalar_lea.hbm %s7483_s3, 10240  ;;  %s23_s19 = int_to_ptr.vmem [resolvable:$true] %s22_s19 }
   0x2   :  { %p6039_p0 = scmp.ne.s32.totalorder %s7483_s3, %s6038_s22  ;;  %p6042_p1 = scmp.lt.u32.totalorder %s6038_s22, %s7483_s3 }
   0x4   :  { %p6044_p2 = pnand %p6042_p1, %p6039_p0 }
   0x6   :  { %6047 = shalt.err (!%p6044_p2)
}
   0x7   :  { %s6048_s27 = scalar_lea.vmem %s23_s19, 10240  ;;  %p6053_p4 = scmp.lt.s32.totalorder %s23_s19, %s23_s19 }
   0x8   :  { %p6049_p3 = scmp.ne.s32.totalorder %s23_s19, %s6048_s27  ;;  %p6054_p5 = scmp.lt.s32.totalorder %s6048_s27, %s6048_s27 }
   0xa   :  { %p6055_p6 = por %p6054_p5, %p6053_p4 }
   0xc   :  { %p6056_p7 = pnand %p6055_p6, %p6049_p3 }
   0xe   :  { %6059 = shalt.err (!%p6056_p7)
}
   0xf   :  { %s6063_s28 = smov 128   ;;  %s6064_s29 = smov 8  }
  0x10   :  { %28 = dma.hbm_to_vmem [thread:$0]  %s7483_s3, 10240, %s23_s19, [#allocation8], %s6063_s28, %s6063_s28, %s6064_s29  }
  0x11   :  { %6060 = dma.done.wait [#allocation8], 10240  }
  0x12   :  { %6061 = vsyncadd [#allocation8], 4294957056  ;;  %v6065_v0 = vmov 0   ;;  %v39_v1 = vld [vmem:[%s7480_s0 + $0x10] sm:$0xff]  ;;  %v37_v2 = vld [vmem:[%s7480_s0] sm:$0xff]  ;;  %v35_v5 = vlaneseq  ;;  %v6066_v9 = vmov 0.0  }
  0x13   :  { %5515 = vset.pattern.permute.xlu1 %v6065_v0  ;;  %5514 = vset.pattern.permute.xlu0 %v6065_v0  ;;  %v40_v3 = vld [vmem:[%s7480_s0 + $0x18] sm:$0xff]  ;;  %v38_v4 = vld [vmem:[%s7480_s0 + $0x8] sm:$0xff]  ;;  %vm293_vm4 = vcmask 1046528   ;;  %vm312_vm5 = vcmask 1045504   ;;  %vm1456_vm6 = vcmask 1040384   ;;  %s6067_s0 = smov 24  }
  0x14   :  { %48 = vperm.xlu0 %5514, %v39_v1   ;;  %42 = vperm.xlu1 %5515, %v37_v2   ;;  %v6138_v6 = vand.u32 127, %v35_v5  ;;  %v5656_v29 = vld [vmem:[#allocation7 + $0xc0] ss:$8 sps:$4 sm:$0xff]   ;;  %v5657_v40 = vld [vmem:[#allocation7 + $0xd0] ss:$8 sps:$4 sm:$0xff]   ;;  %s6068_s14 = smov 48  }
  0x15   :  { %5320 = vmatprep.subr.bf16.mxu0 %v5656_v29  ;;  %v5658_v49 = vld [vmem:[#allocation7 + $0xe0] ss:$8 sps:$4 sm:$0xff]   ;;  %v5659_v57 = vld [vmem:[#allocation7 + $0xf0] ss:$8 sps:$4 sm:$0xff]   ;;  %vm639_vm7 = vcmask 1043456   ;;  %vm331_vm8 = vcmask 195584  }
  0x16   :  { %5321 = vmatpush3.bf16.msra.mxu0 %v5656_v29  ;;  %v177_v50 = vld [vmem:[%s7482_s2] sm:$0xff]  ;;  %v178_v51 = vld [vmem:[%s7482_s2 + $0x8] sm:$0xff]  ;;  %vm336_vm9 = vcmask 392192   ;;  %vm632_vm12 = vcmask 588800   ;;  %s6071_s27 = smov 32   ;;  %vm1630_vm15 = vcmask 64512  }
  0x17   :  { %5322 = vmatprep.subr.bf16.mxu0 %v5657_v40  ;;  %s6072_s28 = smov 16   ;;  %s6073_s7 = smov 64  }
  0x18   :  { %51 = vperm.xlu0 %5514, %v40_v3   ;;  %45 = vperm.xlu1 %5515, %v38_v4   ;;  %v5660_v4 = vld [vmem:[#allocation7 + $0x100] ss:$0 sps:$4 sm:$0xff]   ;;  %s6074_s10 = smov 96   ;;  %s6075_s11 = smov 80  }
  0x19   :  { %s6076_s12 = smov 112  }
  0x1a   :  { %5323 = vmatpush3.bf16.msra.mxu0 %v5657_v40 }
  0x1b   :  { %5324 = vmatprep.subr.bf16.mxu0 %v5658_v49 }
  0x1e   :  { %5325 = vmatpush3.bf16.msra.mxu0 %v5658_v49 }
  0x1f   :  { %5326 = vmatprep.subr.bf16.mxu0 %v5659_v57 }
  0x22   :  { %5327 = vmatpush3.bf16.msra.mxu0 %v5659_v57 }
  0x23   :  { %5494 = vmatprep.subr.msk.bf16.mxu0 %vm639_vm7, %v5660_v4 }
  0x93   :  { %v49_v7 = vpop.permute.xlu0 %48  ;;  %v43_v8 = vpop.permute.xlu1 %42 }
  0x94   :  { %vm55_vm0 = vcmp.eq.s32.totalorder %v49_v7, %v6138_v6  ;;  %vm53_vm1 = vcmp.eq.s32.totalorder %v43_v8, %v6138_v6 }
  0x95   :  { %v6143_v10 = vsel %vm55_vm0, 1.0, %v6066_v9  ;;  %v6146_v13 = vsel %vm53_vm1, 1.0, %v6066_v9  ;;  %vm1204_vm0 = vcmask 1041409   ;;  %vm947_vm1 = vcmask 130048  }
  0x96   :  { %v297_v16 = vrot.slane %v6143_v10, 1  ;;  %v294_v19 = vrot.slane %v6146_v13, 1  ;;  %v316_v23 = vrot.slane %v6143_v10, 2  ;;  %v313_v25 = vrot.slane %v6146_v13, 2 }
  0x97   :  { %v52_v11 = vpop.permute.xlu0 %51  ;;  %v46_v12 = vpop.permute.xlu1 %45  ;;  %v1457_v26 = vrot.slane %v6146_v13, 7  ;;  %v1460_v30 = vrot.slane %v6143_v10, 7 }
  0x98   :  { %vm56_vm2 = vcmp.eq.s32.totalorder %v52_v11, %v6138_v6  ;;  %vm54_vm3 = vcmp.eq.s32.totalorder %v46_v12, %v6138_v6 }
  0x99   :  { %v6151_v14 = vsel %vm56_vm2, 1.0, %v6066_v9  ;;  %v6154_v15 = vsel %vm54_vm3, 1.0, %v6066_v9  ;;  %v6183_v39 = vsel %vm1456_vm6, 0.0, %v1457_v26  ;;  %v6186_v41 = vsel %vm1456_vm6, 0.0, %v1460_v30 }
  0x9a   :  { %v298_v17 = vrot.slane %v6151_v14, 1  ;;  %v295_v18 = vrot.slane %v6154_v15, 1  ;;  %v1458_v20 = vrot.slane %v6154_v15, 7  ;;  %v317_v21 = vrot.slane %v6151_v14, 2 }
  0x9b   :  { %v314_v22 = vrot.slane %v6154_v15, 2  ;;  %v1461_v24 = vrot.slane %v6151_v14, 7  ;;  %v1477_v48 = vrot.slane %v6183_v39, 1  ;;  %v1482_v52 = vrot.slane %v6186_v41, 1 }
  0x9c   :  { %v299_v27 = vsel %vm293_vm4, %v297_v16, %v298_v17  ;;  %v296_v28 = vsel %vm293_vm4, %v294_v19, %v295_v18  ;;  %v6171_v33 = vsel %vm1456_vm6, %v1457_v26, %v1458_v20  ;;  %v318_v34 = vsel %vm312_vm5, %v316_v23, %v317_v21  ;;  %v65_v19 = vld [vmem:[%s7481_s1] sm:$0xff] }
  0x9d   :  { %v5516_v31 = vpack.i.bf16 %v298_v17, %v299_v27  ;;  %v5521_v32 = vpack.i.bf16 %v295_v18, %v296_v28  ;;  %v315_v35 = vsel %vm312_vm5, %v313_v25, %v314_v22  ;;  %v6176_v36 = vsel %vm1456_vm6, %v1460_v30, %v1461_v24  ;;  %v6216_v18 = vld [vmem:[#allocation7 + $0x1e0] ss:$8 sps:$4 sm:$0xff]  }
  0x9e   :  { %v1472_v37 = vsel %vm1456_vm6, %v1461_v24, 0.0  ;;  %v1471_v38 = vsel %vm1456_vm6, %v1458_v20, 0.0  ;;  %v5526_v42 = vpack.i.bf16 %v317_v21, %v318_v34  ;;  %v5531_v43 = vpack.i.bf16 %v314_v22, %v315_v35  ;;  %v66_v20 = vld [vmem:[%s7481_s1 + $0x8] sm:$0xff] }
  0x9f   :  { %5517 = vrot.lane.b32.xlu0 %v5516_v31, %s6067_s0  ;;  %5522 = vrot.lane.b32.xlu1 %v5521_v32, %s6067_s0  ;;  %v1478_v44 = vrot.slane %v6171_v33, 1  ;;  %v1480_v45 = vrot.slane %v1471_v38, 1  ;;  %v1483_v46 = vrot.slane %v6176_v36, 1  ;;  %v1485_v47 = vrot.slane %v1472_v37, 1 }
  0xa0   :  { %v1500_v54 = vrot.slane %v6171_v33, 2  ;;  %v1502_v55 = vrot.slane %v1471_v38, 2  ;;  %v1505_v56 = vrot.slane %v6176_v36, 2  ;;  %v1507_v61 = vrot.slane %v1472_v37, 2 }
  0xa1   :  { %v1479_v53 = vsel %vm293_vm4, %v1477_v48, %v1478_v44  ;;  %v1481_v58 = vsel %vm293_vm4, %v1478_v44, %v1480_v45  ;;  %v1484_v59 = vsel %vm293_vm4, %v1482_v52, %v1483_v46  ;;  %v1486_v60 = vsel %vm293_vm4, %v1483_v46, %v1485_v47 }
  0xa2   :  { %v1499_v62 = vrot.slane %v6183_v39, 2  ;;  %v1504_v63 = vrot.slane %v6186_v41, 2  ;;  %v5536_v1 = vpack.i.bf16 %v1481_v58, %v1479_v53  ;;  %v5541_v2 = vpack.i.bf16 %v1486_v60, %v1484_v59 }
  0xa3   :  { %5527 = vrot.lane.b32.xlu0 %v5526_v42, %s6068_s14  ;;  %5532 = vrot.lane.b32.xlu1 %v5531_v43, %s6068_s14  ;;  %v1503_v7 = vsel %vm312_vm5, %v1500_v54, %v1502_v55  ;;  %v1508_v11 = vsel %vm312_vm5, %v1505_v56, %v1507_v61  ;;  %v641_v17 = vsel %vm639_vm7, %v5660_v4, 0  ;;  %v6069_v21 = vmov 1966171168  }
  0xa4   :  { %v1501_v3 = vsel %vm312_vm5, %v1499_v62, %v1500_v54  ;;  %v1506_v8 = vsel %vm312_vm5, %v1504_v63, %v1505_v56  ;;  %5329 = vmatpush3.bf16.msra.mxu0 %v641_v17  ;;  %v357_v22 = vunpack.c.l.s4 %v6069_v21  ;;  %v6228_v26 = vshrl.u32 %v35_v5, 7 }
  0xa5   :  { %v5546_v12 = vpack.i.bf16 %v1503_v7, %v1501_v3  ;;  %v5551_v16 = vpack.i.bf16 %v1508_v11, %v1506_v8  ;;  %5344 = vmatprep.subr.bf16.mxu0 %v6216_v18  ;;  %vm952_vm2 = vcmask 261120   ;;  %vm1126_vm3 = vcmask 1042432  }
  0xa6   :  { %v358_v25 = vunpack.c.0.s8 %v357_v22  ;;  %vm1157_vm5 = vcmask 1041408   ;;  %vm1158_vm6 = vcmask 1045508  }
  0xa7   :  { %194 = vperm.xlu0 %5514, %v177_v50   ;;  %197 = vperm.xlu1 %5515, %v178_v51  }
  0xa8   :  { %v6231_v31 = vsub.s32 %v358_v25, %v6228_v26 }
  0xab   :  { %5537 = vrot.lane.b32.xlu0 %v5536_v1, %s6067_s0  ;;  %5542 = vrot.lane.b32.xlu1 %v5541_v2, %s6067_s0 }
  0xaf   :  { %5547 = vrot.lane.b32.xlu0 %v5546_v12, %s6068_s14  ;;  %5552 = vrot.lane.b32.xlu1 %v5551_v16, %s6068_s14 }
  0xb3   :  { %82 = vperm.xlu0 %5514, %v65_v19   ;;  %85 = vperm.xlu1 %5515, %v66_v20  }
 0x111   :  { %v5518_v23 = vpop.permute.xlu0 %5517  ;;  %v5523_v24 = vpop.permute.xlu1 %5522 }
 0x112   :  { %v5520_v27 = vunpack.i.h.bf16 %v5518_v23  ;;  %v5519_v28 = vunpack.i.l.bf16 %v5518_v23  ;;  %v5525_v29 = vunpack.i.h.bf16 %v5523_v24  ;;  %v5524_v30 = vunpack.i.l.bf16 %v5523_v24 }
 0x114   :  { %v335_v42 = vsel %vm331_vm8, %v6151_v14, %v5520_v27  ;;  %v334_v5 = vsel %vm331_vm8, %v6143_v10, %v5519_v28  ;;  %v333_v43 = vsel %vm331_vm8, %v6154_v15, %v5525_v29  ;;  %v332_v44 = vsel %vm331_vm8, %v6146_v13, %v5524_v30 }
 0x115   :  { %v5528_v32 = vpop.permute.xlu0 %5527  ;;  %v5533_v34 = vpop.permute.xlu1 %5532 }
 0x116   :  { %v5530_v35 = vunpack.i.h.bf16 %v5528_v32  ;;  %v5529_v37 = vunpack.i.l.bf16 %v5528_v32  ;;  %v5535_v38 = vunpack.i.h.bf16 %v5533_v34  ;;  %v5534_v40 = vunpack.i.l.bf16 %v5533_v34 }
 0x118   :  { %v339_v45 = vsel %vm336_vm9, %v334_v5, %v5529_v37  ;;  %v340_v46 = vsel %vm336_vm9, %v335_v42, %v5530_v35  ;;  %v337_v47 = vsel %vm336_vm9, %v332_v44, %v5534_v40  ;;  %v338_v48 = vsel %vm336_vm9, %v333_v43, %v5535_v38 }
 0x119   :  { %v342_v49 = vpack.c.bf16 %v340_v46, %v339_v45  ;;  %v5093_v50 = vpack.c.bf16 %v340_v46, %v340_v46  ;;  %v341_v14 = vpack.c.bf16 %v338_v48, %v337_v47  ;;  %v5092_v51 = vpack.c.bf16 %v338_v48, %v338_v48 }
 0x11b   :  { %v410_v10 = vrot.slane %v342_v49, %v6231_v31  ;;  %v417_v52 = vrot.slane %v5093_v50, %v6231_v31  ;;  %v362_v15 = vrot.slane %v341_v14, %v6231_v31  ;;  %v369_v13 = vrot.slane %v5092_v51, %v6231_v31  ;;  %v5662_v50 = vld [vmem:[#allocation7 + $0x1f0] ss:$8 sps:$4 sm:$0xff]  }
 0x11d   :  { %v418_v53 = vcombine.high %v410_v10, %v410_v10  ;;  %v419_v54 = vcombine.high %v417_v52, %v417_v52  ;;  %v433_v55 = vrot.slane %v417_v52, %v6231_v31  ;;  %v370_v56 = vcombine.high %v362_v15, %v362_v15 }
 0x11e   :  { %v371_v57 = vcombine.high %v369_v13, %v369_v13  ;;  %v378_v58 = vrot.slane %v362_v15, %v6231_v31  ;;  %v385_v59 = vrot.slane %v369_v13, %v6231_v31  ;;  %v426_v60 = vrot.slane %v410_v10, %v6231_v31  ;;  %v5663_v13 = vld [vmem:[#allocation7 + $0x200] ss:$8 sps:$4 sm:$0xff]  }
 0x11f   :  { %v440_v61 = vrot.slane %v418_v53, %v6231_v31  ;;  %v447_v62 = vrot.slane %v419_v54, %v6231_v31  ;;  %v449_v63 = vcombine.high %v433_v55, %v433_v55  ;;  %v392_v1 = vrot.slane %v370_v56, %v6231_v31 }
 0x120   :  { %v399_v2 = vrot.slane %v371_v57, %v6231_v31  ;;  %v401_v3 = vcombine.high %v385_v59, %v385_v59  ;;  %v448_v4 = vcombine.high %v426_v60, %v426_v60 }
 0x121   :  { %v450_v7 = vcombine.high %v440_v61, %v440_v61  ;;  %v469_v8 = vcombine.low %v378_v58, %v392_v1  ;;  %v5094_v11 = vcombine.high %v378_v58, %v392_v1  ;;  %v520_v19 = vcombine.low %v447_v62, %v449_v63  ;;  %v5665_v58 = vld [vmem:[#allocation7 + $0x220] ss:$0 sps:$4 sm:$0xff]   ;;  %v5668_v63 = vld [vmem:[#allocation7 + $0x4] ss:$8 sps:$4 sm:$0xff]  }
 0x122   :  { %v471_v12 = vcombine.low %v385_v59, %v399_v2  ;;  %v472_v16 = vcombine.low %v401_v3, %v426_v60  ;;  %v518_v17 = vcombine.low %v440_v61, %v448_v4  ;;  %v1575_v62 = vsel %vm639_vm7, %v5665_v58, 0  ;;  %v5666_v3 = vld [vmem:[#allocation7] ss:$8 sps:$4 sm:$0xff]  }
 0x123   :  { %v519_v20 = vcombine.low %v450_v7, %v433_v55  ;;  %v479_v21 = vrot.slane %v469_v8, %v6231_v31  ;;  %v486_v22 = vrot.slane %v5094_v11, %v6231_v31  ;;  %v541_v34 = vrot.slane %v520_v19, %v6231_v31  ;;  %v5671_v7 = vld [vmem:[#allocation7 + $0x14] ss:$8 sps:$4 sm:$0xff]   ;;  %v5672_v8 = vld [vmem:[#allocation7 + $0x20] ss:$8 sps:$4 sm:$0xff]  }
 0x124   :  { %v493_v23 = vrot.slane %v471_v12, %v6231_v31  ;;  %v500_v24 = vrot.slane %v472_v16, %v6231_v31  ;;  %v527_v27 = vrot.slane %v518_v17, %v6231_v31 }
 0x125   :  { %v501_v25 = vcombine.low %v479_v21, %v486_v22  ;;  %v534_v28 = vrot.slane %v519_v20, %v6231_v31  ;;  %v556_v46 = vrot.slane %v541_v34, %v6231_v31 }
 0x126   :  { %v195_v29 = vpop.permute.xlu0 %194  ;;  %v198_v30 = vpop.permute.xlu1 %197  ;;  %v502_v32 = vcombine.low %v493_v23, %v500_v24 }
 0x127   :  { %vm241_vm10 = vcmp.eq.s32.totalorder %v195_v29, %v6138_v6  ;;  %vm242_vm11 = vcmp.eq.s32.totalorder %v198_v30, %v6138_v6  ;;  %v509_v35 = vrot.slane %v501_v25, %v6231_v31  ;;  %v542_v37 = vcombine.low %v527_v27, %v534_v28  ;;  %v352_v29 = vld [vmem:[%s7484_s4 + $0x2] ss:$0 sm:$0xff] }
 0x128   :  { %v5076_v38 = vsel %vm241_vm10, 1.0, %v6066_v9  ;;  %v5077_v40 = vsel %vm242_vm11, 1.0, %v6066_v9  ;;  %v516_v42 = vrot.slane %v502_v32, %v6231_v31  ;;  %v6070_v25 = vmov 1983009808   ;;  %vm6432_vm11 = vmor %vm1157_vm5, %vm1158_vm6 }
 0x129   :  { %v5556_v5 = vpack.i.bf16 %v5077_v40, %v5076_v38  ;;  %v549_v43 = vrot.slane %v542_v37, %v6231_v31  ;;  %v454_v27 = vunpack.c.l.s4 %v6070_v25  ;;  %v452_v32 = vcombine.high %v352_v29, %v352_v29 }
 0x12a   :  { %v5538_v44 = vpop.permute.xlu0 %5537  ;;  %v517_v45 = vcombine.low %v509_v35, %v516_v42  ;;  %v5543_v15 = vpop.permute.xlu1 %5542 }
 0x12b   :  { %5557 = vrot.lane.b32.xlu0 %v5556_v5, %s6067_s0  ;;  %v5540_v47 = vunpack.i.h.bf16 %v5538_v44  ;;  %v5539_v48 = vunpack.i.l.bf16 %v5538_v44  ;;  %v557_v49 = vcombine.low %v549_v43, %v556_v46  ;;  %v5545_v57 = vunpack.i.h.bf16 %v5543_v15 }
 0x12c   :  { %5330 = vmatprep.mubr.msk.bf16.mxu0 %vm632_vm12, %v517_v45  ;;  %v455_v28 = vunpack.c.0.s8 %v454_v27 }
 0x12d   :  { %5331 = vmatmul.mubr.msk.bf16.vlgmr.msra.gmra.mrb[0].mxu0 %vm632_vm12, %v557_v49  ;;  %v1522_v52 = vsel %vm331_vm8, %v6171_v33, %v5540_v47  ;;  %v1521_v31 = vsel %vm331_vm8, %v6183_v39, %v5539_v48  ;;  %v5544_v33 = vunpack.i.l.bf16 %v5543_v15  ;;  %v1524_v60 = vsel %vm331_vm8, %v6176_v36, %v5545_v57  ;;  %v5669_v36 = vld [vmem:[#allocation7 + $0x10] ss:$8 sps:$4 sm:$0xff]  }
 0x12e   :  { %v5548_v14 = vpop.permute.xlu0 %5547  ;;  %5345 = vmatpush3.bf16.msra.mxu0 %v6216_v18  ;;  %v5664_v18 = vld [vmem:[#allocation7 + $0x210] ss:$8 sps:$4 sm:$0xff]   ;;  %v5553_v56 = vpop.permute.xlu1 %5552  ;;  %v6305_v30 = vsub.s32 %v455_v28, %v6228_v26 }
 0x12f   :  { %v5550_v51 = vunpack.i.h.bf16 %v5548_v14  ;;  %v5549_v10 = vunpack.i.l.bf16 %v5548_v14  ;;  %5346 = vmatprep.subr.bf16.mxu0 %v5662_v50  ;;  %v5555_v39 = vunpack.i.h.bf16 %v5553_v56  ;;  %v5554_v59 = vunpack.i.l.bf16 %v5553_v56 }
 0x130   :  { %v1523_v61 = vsel %vm331_vm8, %v6186_v41, %v5544_v33  ;;  %v5674_v41 = vld [vmem:[#allocation7 + $0x24] ss:$8 sps:$4 sm:$0xff]   ;;  %v459_v34 = vrot.slane %v352_v29, %v6305_v30  ;;  %v466_v35 = vrot.slane %v452_v32, %v6305_v30 }
 0x131   :  { %v1525_v53 = vsel %vm336_vm9, %v1521_v31, %v5549_v10  ;;  %v1526_v54 = vsel %vm336_vm9, %v1522_v52, %v5550_v51  ;;  %v1527_v1 = vsel %vm336_vm9, %v1523_v61, %v5554_v59  ;;  %v1528_v2 = vsel %vm336_vm9, %v1524_v60, %v5555_v39 }
 0x132   :  { %v1529_v55 = vpack.c.bf16 %v1526_v54, %v1525_v53  ;;  %5347 = vmatpush3.bf16.msra.mxu0 %v5662_v50  ;;  %v1530_v4 = vpack.c.bf16 %v1528_v2, %v1527_v1  ;;  %v83_v11 = vpop.permute.xlu0 %82  ;;  %v86_v12 = vpop.permute.xlu1 %85  ;;  %v467_v37 = vcombine.high %v459_v34, %v459_v34  ;;  %v468_v38 = vcombine.high %v466_v35, %v466_v35 }
 0x133   :  { %5348 = vmatprep.subr.bf16.mxu0 %v5663_v13  ;;  %vm129_vm13 = vcmp.eq.s32.totalorder %v83_v11, %v6138_v6  ;;  %vm130_vm14 = vcmp.eq.s32.totalorder %v86_v12, %v6138_v6  ;;  %v602_v44 = vcombine.low %v466_v35, %v459_v34 }
 0x134   :  { %5354 = vmatprep.mubr.msk.bf16.mxu0 %vm632_vm12, %v1529_v55  ;;  %v5060_v20 = vsel %vm129_vm13, 1.0, %v6066_v9  ;;  %v5061_v21 = vsel %vm130_vm14, 1.0, %v6066_v9  ;;  %v611_v40 = vcombine.low %v467_v37, %v466_v35  ;;  %v612_v42 = vcombine.low %v468_v38, %v459_v34 }
 0x135   :  { %v585_v5 = vcombine.low %v459_v34, %v467_v37  ;;  %v586_v43 = vcombine.low %v466_v35, %v468_v38  ;;  %v609_v49 = vrot.slane %v602_v44, %v6305_v30  ;;  %vm1322_vm13 = vcmask 654336  }
 0x136   :  { %5349 = vmatpush3.bf16.msra.mxu0 %v5663_v13  ;;  %v619_v45 = vrot.slane %v611_v40, %v6305_v30  ;;  %v626_v46 = vrot.slane %v612_v42, %v6305_v30  ;;  %vm1324_vm14 = vcmask 785408  }
 0x137   :  { %5350 = vmatprep.subr.bf16.mxu0 %v5664_v18  ;;  %v593_v47 = vrot.slane %v585_v5, %v6305_v30  ;;  %v600_v48 = vrot.slane %v586_v43, %v6305_v30 }
 0x138   :  { %v627_v50 = vcombine.low %v619_v45, %v626_v46 }
 0x139   :  { %v601_v14 = vcombine.low %v593_v47, %v600_v48  ;;  %v610_v10 = vcombine.low %v593_v47, %v609_v49 }
 0x13a   :  { %5351 = vmatpush3.bf16.msra.mxu0 %v5664_v18 }
 0x13b   :  { %5495 = vmatprep.subr.msk.bf16.mxu0 %vm639_vm7, %v5665_v58 }
 0x13e   :  { %5353 = vmatpush3.bf16.msra.mxu0 %v1575_v62 }
 0x13f   :  { %1811 = vmatprep.subr.bf16.mxu0 %v5668_v63 }
 0x141   :  { %5355 = vmatmul.mubr.msk.bf16.vlgmr.msra.gmra.mrb[4].mxu0 %vm632_vm12, %v1530_v4  ;;  %vm1320_vm12 = vcmask 523264  }
 0x142   :  { %1812 = vmatpush1.bf16.msra.mxu0 %v5666_v3  ;;  %1843 = vmatprep.mubr.bf16.mxu0 %v6065_v0 }
 0x143   :  { %1813 = vmatprep.subr.bf16.mxu0 %v5671_v7 }
 0x146   :  { %1814 = vmatpush1.bf16.msra.mxu0 %v5669_v36 }
 0x147   :  { %1815 = vmatprep.subr.bf16.mxu0 %v5674_v41 }
 0x14a   :  { %1816 = vmatpush1.bf16.msra.mxu0 %v5672_v8 }
 0x19d   :  { %v5558_v16 = vpop.permute.xlu0 %5557 }
 0x19e   :  { %v5560_v17 = vunpack.i.h.bf16 %v5558_v16  ;;  %v5559_v19 = vunpack.i.l.bf16 %v5558_v16 }
 0x1a0   :  { %v1715_v22 = vsel %vm331_vm8, %v5060_v20, %v5559_v19  ;;  %v1716_v23 = vsel %vm331_vm8, %v5061_v21, %v5560_v17 }
 0x1a1   :  { %v1731_v24 = vpack.c.bf16 %v1716_v23, %v1715_v22 }
 0x1a3   :  { %5137 = vmatmul.mubr.msk.bf16.vlgmr.msra.gmra.mrb[8].mxu0 %vm336_vm9, %v1731_v24 }
 0x1a4   :  { %1853 = vmatprep.mubr.bf16.mxu0 %v6065_v0 }
 0x200   :  { %v5332_v51 = vpop.f32.mrb[0].mxu0 }
 0x201   :  { %v686_v52 = vadd.f32 %v5332_v51, %v627_v50  ;;  %v677_v31 = vpop.f32.mrb[1].mxu0 }
 0x202   :  { %v678_v15 = vadd.f32 %v677_v31, %v601_v14  ;;  %v5333_v13 = vpop.f32.mrb[2].mxu0 }
 0x203   :  { %v730_v53 = vcombine.high %v686_v52, %v686_v52  ;;  %v737_v54 = vrot.slane %v686_v52, %v6305_v30  ;;  %v689_v55 = vadd.f32 %v5333_v13, %v619_v45  ;;  %v680_v18 = vpop.f32.mrb[3].mxu0 }
 0x204   :  { %v696_v56 = vcombine.high %v678_v15, %v678_v15  ;;  %v703_v57 = vrot.slane %v678_v15, %v6305_v30  ;;  %v681_v33 = vadd.f32 %v680_v18, %v610_v10  ;;  %v1540_v15 = vld [vmem:[%s7484_s4 + $0x5] ss:$0 sm:$0xff] }
 0x205   :  { %v744_v58 = vrot.slane %v730_v53, %v6305_v30  ;;  %v745_v39 = vcombine.high %v737_v54, %v737_v54  ;;  %v753_v59 = vrot.slane %v689_v55, %v6305_v30  ;;  %v777_v60 = vmax.f32 %v737_v54, 0.0 }
 0x206   :  { %v710_v61 = vrot.slane %v696_v56, %v6305_v30  ;;  %v711_v62 = vcombine.high %v703_v57, %v703_v57  ;;  %v769_v63 = vmax.f32 %v703_v57, 0.0  ;;  %v713_v4 = vcombine.high %v681_v33, %v681_v33 }
 0x207   :  { %v746_v1 = vcombine.high %v744_v58, %v744_v58  ;;  %v778_v2 = vmax.f32 %v745_v39, 0.0  ;;  %v754_v3 = vcombine.high %v753_v59, %v753_v59  ;;  %v779_v7 = vmax.f32 %v744_v58, 0.0  ;;  %v5675_v39 = vld [vmem:[#allocation7 + $0x110] ss:$8 sps:$4 sm:$0xff]  }
 0x208   :  { %v712_v36 = vcombine.high %v710_v61, %v710_v61  ;;  %v770_v41 = vmax.f32 %v711_v62, 0.0  ;;  %v771_v8 = vmax.f32 %v710_v61, 0.0  ;;  %v781_v16 = vmax.f32 %v753_v59, 0.0  ;;  %5334 = vmatprep.subr.bf16.mxu1 %v5675_v39 }
 0x209   :  { %v780_v11 = vmax.f32 %v746_v1, 0.0  ;;  %v910_v12 = vcombine.low %v777_v60, %v778_v2  ;;  %v782_v17 = vmax.f32 %v754_v3, 0.0  ;;  %v720_v20 = vrot.slane %v681_v33, %v6305_v30  ;;  %5335 = vmatpush3.bf16.msra.mxu1 %v5675_v39 }
 0x20a   :  { %v772_v19 = vmax.f32 %v712_v36, 0.0  ;;  %v795_v22 = vcombine.low %v769_v63, %v770_v41  ;;  %v885_v23 = vcombine.low %v770_v41, %v771_v8  ;;  %v727_v28 = vrot.slane %v713_v4, %v6305_v30 }
 0x20b   :  { %v911_v21 = vcombine.low %v779_v7, %v780_v11  ;;  %v837_v24 = vcombine.low %v780_v11, %v781_v16  ;;  %v927_v27 = vcombine.low %v781_v16, %v782_v17  ;;  %v821_v29 = vcombine.low %v778_v2, %v779_v7 }
 0x20c   :  { %v796_v25 = vcombine.low %v771_v8, %v772_v19  ;;  %v728_v32 = vcombine.high %v720_v20, %v720_v20  ;;  %v773_v34 = vmax.f32 %v720_v20, 0.0  ;;  %v918_v35 = vrot.slane %v910_v12, %v6305_v30  ;;  %v5676_v8 = vld [vmem:[#allocation7 + $0x120] ss:$8 sps:$4 sm:$0xff]  }
 0x20d   :  { %v729_v38 = vcombine.high %v727_v28, %v727_v28  ;;  %v775_v40 = vmax.f32 %v727_v28, 0.0  ;;  %v925_v42 = vrot.slane %v911_v21, %v6305_v30  ;;  %v803_v5 = vrot.slane %v795_v22, %v6305_v30  ;;  %5336 = vmatprep.subr.bf16.mxu1 %v5676_v8 }
 0x20e   :  { %v810_v37 = vrot.slane %v796_v25, %v6305_v30  ;;  %v774_v43 = vmax.f32 %v728_v32, 0.0  ;;  %v886_v44 = vcombine.low %v772_v19, %v773_v34  ;;  %v893_v45 = vrot.slane %v885_v23, %v6305_v30  ;;  %5337 = vmatpush3.bf16.msra.mxu1 %v5676_v8 }
 0x20f   :  { %v776_v46 = vmax.f32 %v729_v38, 0.0  ;;  %v926_v47 = vcombine.low %v918_v35, %v925_v42  ;;  %v934_v48 = vrot.slane %v927_v27, %v6305_v30  ;;  %v6328_v49 = vrot.slane %v837_v24, %v6305_v30 }
 0x210   :  { %v6330_v50 = vcombine.low %v803_v5, %v810_v37  ;;  %v812_v14 = vcombine.low %v773_v34, %v774_v43  ;;  %v902_v51 = vcombine.low %v774_v43, %v775_v40  ;;  %v900_v10 = vrot.slane %v886_v44, %v6305_v30 }
 0x211   :  { %v865_v52 = vrot.slane %v782_v17, %v6305_v30  ;;  %v820_v31 = vcombine.low %v776_v46, %v777_v60  ;;  %v5576_v13 = vpack.i.bf16 %v934_v48, %v926_v47  ;;  %v857_v18 = vrot.slane %v775_v40, %v6305_v30  ;;  %v5677_v17 = vld [vmem:[#allocation7 + $0x130] ss:$8 sps:$4 sm:$0xff]  }
 0x212   :  { %v901_v53 = vcombine.low %v893_v45, %v900_v10  ;;  %v909_v54 = vrot.slane %v902_v51, %v6305_v30  ;;  %v6339_v55 = vrot.slane %v812_v14, %v6305_v30  ;;  %v835_v56 = vrot.slane %v821_v29, %v6305_v30  ;;  %5338 = vmatprep.subr.bf16.mxu1 %v5677_v17 }
 0x213   :  { %v828_v57 = vrot.slane %v820_v31, %v6305_v30  ;;  %v866_v58 = vcombine.low %v6328_v49, %v865_v52  ;;  %v867_v63 = vrot.slane %v6330_v50, 1  ;;  %5339 = vmatpush3.bf16.msra.mxu1 %v5677_v17  ;;  %v6365_v31 = vsub.s32 1, %v6228_v26 }
 0x214   :  { %v5356_v33 = vpop.f32.mrb[4].mxu0  ;;  %v5561_v61 = vpack.i.bf16 %v909_v54, %v901_v53  ;;  %v858_v62 = vcombine.low %v6339_v55, %v857_v18  ;;  %1415 = vmatprep.subr.bf16.mxu1 %v6065_v0 }
 0x215   :  { %v1620_v59 = vadd.f32 %v5356_v33, %v1540_v15  ;;  %v1611_v60 = vpop.f32.mrb[5].mxu0  ;;  %v6347_v3 = vcombine.low %v828_v57, %v835_v56  ;;  %v871_v21 = vrot.slane %v866_v58, 1 }
 0x216   :  { %v1612_v1 = vadd.f32 %v1611_v60, %v1540_v15  ;;  %v5357_v2 = vpop.f32.mrb[6].mxu0  ;;  %5562 = vrot.lane.b32.xlu0 %v5561_v61, %s6071_s27  ;;  %v868_v41 = vrot.slane %v858_v62, 1 }
 0x217   :  { %v1628_v4 = vmax.f32 %v1620_v59, 0.0  ;;  %v1623_v7 = vadd.f32 %v5357_v2, %v1540_v15  ;;  %v1614_v36 = vpop.f32.mrb[7].mxu0  ;;  %v870_v16 = vrot.slane %v6347_v3, 1 }
 0x218   :  { %v1626_v11 = vmax.f32 %v1612_v1, 0.0  ;;  %v1615_v12 = vadd.f32 %v1614_v36, %v1540_v15  ;;  %v869_v20 = vsel %vm293_vm4, %v867_v63, %v868_v41  ;;  %v1745_v15 = vld [vmem:[%s7484_s4] ss:$8 sm:$0x3] }
 0x219   :  { %v1629_v19 = vmax.f32 %v1623_v7, 0.0  ;;  %v5566_v23 = vpack.i.bf16 %v868_v41, %v869_v20  ;;  %v1640_v24 = vsel %vm1630_vm15, %v1628_v4, 0.0  ;;  %v872_v27 = vsel %vm293_vm4, %v870_v16, %v871_v21 }
 0x21a   :  { %v1627_v22 = vmax.f32 %v1615_v12, 0.0  ;;  %5577 = vrot.lane.b32.xlu0 %v5576_v13, %s6071_s27  ;;  %v1631_v28 = vsel %vm1630_vm15, %v1626_v11, 0.0  ;;  %v5571_v37 = vpack.i.bf16 %v871_v21, %v872_v27  ;;  %v6371_v13 = vrot.slane %v1745_v15, %v6365_v31 }
 0x21b   :  { %v1641_v25 = vsel %vm1630_vm15, %v1629_v19, 0.0  ;;  %5567 = vrot.lane.b32.xlu1 %v5566_v23, %s6072_s28  ;;  %vm1127_vm4 = vcmask 1046532  }
 0x21c   :  { %v1642_v29 = vadd.f32 %v1641_v25, %v1640_v24  ;;  %v1632_v32 = vsel %vm1630_vm15, %v1627_v22, 0.0  ;;  %vm6424_vm10 = vmor %vm1126_vm3, %vm1127_vm4 }
 0x21d   :  { %v1633_v34 = vadd.f32 %v1632_v32, %v1631_v28 }
 0x21e   :  { %v1643_v35 = vrot.slane %v1642_v29, 4 }
 0x21f   :  { %v1634_v38 = vrot.slane %v1633_v34, 4  ;;  %5572 = vrot.lane.b32.xlu1 %v5571_v37, %s6072_s28 }
 0x220   :  { %v1644_v40 = vadd.f32 %v1643_v35, %v1642_v29 }
 0x221   :  { %v1635_v42 = vadd.f32 %v1634_v38, %v1633_v34 }
 0x222   :  { %v1645_v5 = vrot.slane %v1644_v40, 2 }
 0x223   :  { %v1636_v43 = vrot.slane %v1635_v42, 2 }
 0x224   :  { %v1646_v44 = vadd.f32 %v1645_v5, %v1644_v40  ;;  %v6404_v40 = vsub.s32 0, %v6228_v26 }
 0x225   :  { %v1637_v45 = vadd.f32 %v1636_v43, %v1635_v42 }
 0x226   :  { %v1647_v46 = vrot.slane %v1646_v44, 1  ;;  %v6407_v42 = vrot.slane %v1745_v15, %v6404_v40  ;;  %v5682_v15 = vld [vmem:[#allocation7 + $0x180] ss:$8 sps:$4 sm:$0xff]  }
 0x227   :  { %v1638_v47 = vrot.slane %v1637_v45, 1 }
 0x228   :  { %v1648_v48 = vadd.f32 %v1647_v46, %v1646_v44 }
 0x229   :  { %v1639_v14 = vadd.f32 %v1638_v47, %v1637_v45 }
 0x22a   :  { %v1650_v51 = vmul.f32 0.0625, %v1648_v48  ;;  %v5678_v48 = vld [vmem:[#allocation7 + $0x140] ss:$8 sps:$4 sm:$0xff]  }
 0x22b   :  { %v1649_v10 = vmul.f32 0.0625, %v1639_v14  ;;  %v5679_v14 = vld [vmem:[#allocation7 + $0x150] ss:$8 sps:$4 sm:$0xff]  }
 0x22d   :  { %v6362_v52 = vsel %vm1204_vm0, %v1650_v51, %v1649_v10  ;;  %v5680_v51 = vld [vmem:[#allocation7 + $0x160] ss:$8 sps:$4 sm:$0xff]   ;;  %v5681_v10 = vld [vmem:[#allocation7 + $0x170] ss:$8 sps:$4 sm:$0xff]  }
 0x276   :  { %v1845_v53 = vpop.f32.mrb[8].mxu0 }
 0x277   :  { %v1847_v54 = vpop.f32.mrb[9].mxu0  ;;  %v1846_v5 = vadd.f32 %v1845_v53, %v6407_v42  ;;  %v5683_v53 = vld [vmem:[#allocation7 + $0x190] ss:$8 sps:$4 sm:$0xff]  }
 0x278   :  { %v6374_v18 = vadd.f32 %v1847_v54, %v6371_v13  ;;  %v6376_v56 = vpop.f32.mrb[10].mxu0  ;;  %v965_v54 = vld [vmem:[%s7484_s4 + $0x3] ss:$0 sm:$0xff] }
 0x279   :  { %v6378_v57 = vpop.f32.mrb[11].mxu0  ;;  %v5145_v43 = vmul.f32 -1.442695, %v1846_v5 }
 0x27a   :  { %5707 = vtanh.f32 %v6374_v18 }
 0x27b   :  { %5709 = vpow2.f32 %v5145_v43 }
 0x284   :  { %v5708_v33 = vpop.eup %5707 }
 0x285   :  { %1981 = vrot.lane.b32.xlu1 %v5708_v33, %s6073_s7  ;;  %v5710_v44 = vpop.eup %5709  ;;  %v1001_v33 = vcombine.high %v965_v54, %v965_v54 }
 0x286   :  { %v1972_v45 = vadd.f32 1.0, %v5710_v44 }
 0x288   :  { %v5563_v58 = vpop.permute.xlu0 %5562  ;;  %5711 = vrcp.f32 %v1972_v45 }
 0x289   :  { %v5565_v61 = vunpack.i.h.bf16 %v5563_v58  ;;  %v5564_v62 = vunpack.i.l.bf16 %v5563_v58  ;;  %v1047_v58 = vcombine.low %v1001_v33, %v965_v54 }
 0x28c   :  { %v5578_v2 = vpop.permute.xlu0 %5577 }
 0x28d   :  { %v5568_v39 = vpop.permute.xlu1 %5567  ;;  %v5580_v12 = vunpack.i.h.bf16 %v5578_v2  ;;  %v5579_v16 = vunpack.i.l.bf16 %v5578_v2 }
 0x28e   :  { %v5570_v59 = vunpack.i.h.bf16 %v5568_v39  ;;  %v5569_v60 = vunpack.i.l.bf16 %v5568_v39  ;;  %v1045_v39 = vcombine.low %v965_v54, %v1001_v33 }
 0x290   :  { %v949_v63 = vsel %vm947_vm1, %v6339_v55, %v5570_v59  ;;  %v948_v1 = vsel %vm947_vm1, %v6330_v50, %v5569_v60  ;;  %v1046_v60 = vcombine.low %v965_v54, %v965_v54 }
 0x291   :  { %v954_v4 = vsel %vm952_vm2, %v949_v63, %v5565_v61  ;;  %v953_v7 = vsel %vm952_vm2, %v948_v1, %v5564_v62  ;;  %v5573_v36 = vpop.permute.xlu1 %5572 }
 0x292   :  { %v5575_v41 = vunpack.i.h.bf16 %v5573_v36  ;;  %v5574_v8 = vunpack.i.l.bf16 %v5573_v36  ;;  %v957_v11 = vpack.c.bf16 %v954_v4, %v953_v7  ;;  %v5102_v19 = vpack.c.bf16 %v954_v4, %v954_v4  ;;  %v6410_v46 = vpop.eup %5711 }
 0x294   :  { %v951_v17 = vsel %vm947_vm1, %v6328_v49, %v5575_v41  ;;  %v950_v55 = vsel %vm947_vm1, %v6347_v3, %v5574_v8  ;;  %v975_v50 = vrot.slane %v957_v11, %v6305_v30  ;;  %v982_v25 = vrot.slane %v5102_v19, %v6305_v30 }
 0x295   :  { %v956_v20 = vsel %vm952_vm2, %v951_v17, %v5580_v12  ;;  %v955_v21 = vsel %vm952_vm2, %v950_v55, %v5579_v16  ;;  %v6429_v55 = vsub.s32 2, %v6228_v26 }
 0x296   :  { %v5103_v22 = vpack.c.bf16 %v956_v20, %v956_v20  ;;  %v958_v23 = vpack.c.bf16 %v956_v20, %v955_v21  ;;  %v983_v24 = vcombine.high %v975_v50, %v975_v50 }
 0x298   :  { %v991_v27 = vrot.slane %v958_v23, %v6305_v30  ;;  %v1002_v28 = vcombine.low %v975_v50, %v983_v24  ;;  %v998_v32 = vrot.slane %v5103_v22, %v6305_v30 }
 0x29a   :  { %v999_v29 = vcombine.high %v991_v27, %v991_v27  ;;  %v1003_v49 = vcombine.low %v982_v25, %v991_v27  ;;  %v1010_v3 = vrot.slane %v1002_v28, %v6305_v30 }
 0x29c   :  { %v1017_v34 = vrot.slane %v1003_v49, %v6305_v30  ;;  %v1019_v35 = vcombine.low %v999_v29, %v998_v32 }
 0x29e   :  { %v1018_v37 = vcombine.low %v1010_v3, %v1017_v34  ;;  %v1026_v38 = vrot.slane %v1019_v35, %v6305_v30 }
 0x2a0   :  { %5340 = vmatprep.mubr.msk.bf16.mxu1 %vm336_vm9, %v1018_v37  ;;  %v6441_v37 = vsub.s32 3, %v6228_v26 }
 0x2a1   :  { %5341 = vmatmul.mubr.msk.bf16.vlgmr.msra.gmra.mrb[0].mxu1 %vm336_vm9, %v1026_v38 }
 0x2a2   :  { %1416 = vmatpush1.bf16.msra.mxu1 %v5678_v48 }
 0x2a3   :  { %1417 = vmatprep.subr.bf16.mxu1 %v6065_v0 }
 0x2a6   :  { %1418 = vmatpush1.bf16.msra.mxu1 %v5679_v14  ;;  %v5684_v14 = vld [vmem:[#allocation7 + $0x1a0] ss:$8 sps:$4 sm:$0xff]  }
 0x2a7   :  { %1419 = vmatprep.subr.bf16.mxu1 %v6065_v0 }
 0x2aa   :  { %1420 = vmatpush1.bf16.msra.mxu1 %v5680_v51 }
 0x2ab   :  { %1421 = vmatprep.subr.bf16.mxu1 %v6065_v0 }
 0x2ae   :  { %1422 = vmatpush1.bf16.msra.mxu1 %v5681_v10 }
 0x2af   :  { %1423 = vmatprep.subr.bf16.mxu1 %v6065_v0 }
 0x2b2   :  { %1424 = vmatpush1.bf16.msra.mxu1 %v5682_v15 }
 0x2b3   :  { %1425 = vmatprep.subr.bf16.mxu1 %v6065_v0 }
 0x2b6   :  { %1426 = vmatpush1.bf16.msra.mxu1 %v5683_v53 }
 0x2b7   :  { %1427 = vmatprep.subr.bf16.mxu1 %v6065_v0 }
 0x2ba   :  { %1428 = vmatpush1.bf16.msra.mxu1 %v5684_v14 }
 0x2bb   :  { %1429 = vmatprep.subr.bf16.mxu1 %v6065_v0 }
 0x2f7   :  { %v1982_v30 = vpop.permute.xlu1 %1981 }
 0x2f8   :  { %v1984_v47 = vmul.f32 %v6410_v46, %v1982_v30 }
 0x2fa   :  { %1986 = vrot.lane.b32.xlu0 %v1984_v47, %s6073_s7 }
 0x374   :  { %v5342_v59 = vpop.f32.mrb[0].mxu1 }
 0x375   :  { %v1100_v61 = vadd.f32 %v5342_v59, %v1047_v58  ;;  %v1091_v62 = vpop.f32.mrb[1].mxu1 }
 0x376   :  { %v1092_v63 = vadd.f32 %v1091_v62, %v1045_v39  ;;  %v5343_v1 = vpop.f32.mrb[2].mxu1 }
 0x377   :  { %v1110_v2 = vcombine.high %v1100_v61, %v1100_v61  ;;  %v1118_v4 = vmax.f32 %v1100_v61, 0.0  ;;  %v1094_v7 = vpop.f32.mrb[3].mxu1 }
 0x378   :  { %v1108_v36 = vcombine.high %v1092_v63, %v1092_v63  ;;  %v1114_v41 = vmax.f32 %v1092_v63, 0.0  ;;  %v1095_v8 = vadd.f32 %v1094_v7, %v1046_v60  ;;  %v1979_v7 = vmul.f32 0.0, %v6410_v46 }
 0x379   :  { %v1119_v11 = vmax.f32 %v1110_v2, 0.0  ;;  %v1139_v16 = vrot.slane %v1118_v4, 5  ;;  %v1170_v17 = vrot.slane %v1118_v4, 6 }
 0x37a   :  { %v1115_v50 = vmax.f32 %v1108_v36, 0.0  ;;  %v5109_v20 = vrot.slane %v1114_v41, 9  ;;  %v5111_v21 = vrot.slane %v1114_v41, 10  ;;  %v1109_v22 = vcombine.high %v1095_v8, %v1095_v8 }
 0x37b   :  { %v1141_v23 = vrot.slane %v1139_v16, 4  ;;  %v1142_v24 = vrot.slane %v1119_v11, 5  ;;  %v1172_v25 = vrot.slane %v1170_v17, 4  ;;  %v1173_v27 = vrot.slane %v1119_v11, 6 }
 0x37c   :  { %v1131_v28 = vrot.slane %v1115_v50, 5  ;;  %v1162_v29 = vrot.slane %v1115_v50, 6  ;;  %v1116_v49 = vmax.f32 %v1095_v8, 0.0  ;;  %v1117_v32 = vmax.f32 %v1109_v22, 0.0 }
 0x37d   :  { %v1143_v3 = vsel %vm6424_vm10, %v1141_v23, %v1142_v24  ;;  %v1144_v34 = vrot.slane %v1142_v24, 4  ;;  %v1174_v35 = vsel %vm6432_vm11, %v1172_v25, %v1173_v27  ;;  %v1175_v54 = vrot.slane %v1173_v27, 4 }
 0x37e   :  { %v1155_v38 = vadd.f32 %v1143_v3, %v1118_v4  ;;  %v1132_v5 = vsel %vm6424_vm10, %v5109_v20, %v1131_v28  ;;  %v1133_v43 = vrot.slane %v1131_v28, 4  ;;  %v1163_v44 = vsel %vm6432_vm11, %v5111_v21, %v1162_v29  ;;  %v5685_v4 = vld [vmem:[#allocation7 + $0x1b0] ss:$8 sps:$4 sm:$0xff]  }
 0x37f   :  { %v1156_v45 = vadd.f32 %v1144_v34, %v1119_v11  ;;  %v1151_v30 = vadd.f32 %v1132_v5, %v1114_v41  ;;  %v1164_v47 = vrot.slane %v1162_v29, 4  ;;  %v1134_v48 = vrot.slane %v1116_v49, 5  ;;  %1430 = vmatpush1.bf16.msra.mxu1 %v5685_v4  ;;  %v6522_v4 = vld [vmem:[#allocation7 + $0x60] ss:$8 sps:$4 sm:$0xff]  }
 0x380   :  { %v1186_v51 = vadd.f32 %v1174_v35, %v1155_v38  ;;  %v5110_v10 = vrot.slane %v1117_v32, 9  ;;  %v1165_v15 = vrot.slane %v1116_v49, 6  ;;  %v5112_v53 = vrot.slane %v1117_v32, 10  ;;  %1431 = vmatprep.subr.bf16.mxu1 %v6065_v0  ;;  %v1987_v38 = vpop.permute.xlu0 %1986 }
 0x381   :  { %v1182_v26 = vadd.f32 %v1163_v44, %v1151_v30  ;;  %v1135_v33 = vsel %vm6424_vm10, %v1133_v43, %v1134_v48  ;;  %v1136_v58 = vrot.slane %v1134_v48, 4  ;;  %v1187_v2 = vadd.f32 %v1175_v54, %v1156_v45 }
 0x382   :  { %v1192_v39 = vmul.f32 0.33333334, %v1186_v51  ;;  %v1140_v59 = vsel %vm6424_vm10, %v5110_v10, %v1139_v16  ;;  %v1152_v60 = vadd.f32 %v1135_v33, %v1115_v50  ;;  %v1166_v61 = vsel %vm6432_vm11, %v1164_v47, %v1165_v15  ;;  %v5687_v10 = vld [vmem:[#allocation7 + $0x1d0] ss:$8 sps:$4 sm:$0xff]  }
 0x383   :  { %v1188_v62 = vmul.f32 0.33333334, %v1182_v26  ;;  %v1153_v63 = vadd.f32 %v1136_v58, %v1116_v49  ;;  %v1154_v1 = vadd.f32 %v1140_v59, %v1117_v32  ;;  %v1167_v36 = vrot.slane %v1165_v15, 4  ;;  %v5686_v49 = vld [vmem:[#allocation7 + $0x1c0] ss:$8 sps:$4 sm:$0xff]   ;;  %v1956_v58 = vld [vmem:[#allocation7 + $0x30] sm:$0xff] }
 0x384   :  { %v1171_v41 = vsel %vm6432_vm11, %v5112_v53, %v1170_v17  ;;  %v1183_v8 = vadd.f32 %v1166_v61, %v1152_v60  ;;  %v1252_v16 = vrot.slane %v1192_v39, %v6404_v40  ;;  %v1276_v50 = vrot.slane %v1192_v39, %v6429_v55  ;;  %1432 = vmatpush1.bf16.msra.mxu1 %v5686_v49  ;;  %v6492_v59 = vld [vmem:[#allocation7 + $0x34] ss:$8 sps:$4 sm:$0xff]   ;;  %v6502_v60 = vld [vmem:[#allocation7 + $0x44] ss:$8 sps:$4 sm:$0xff]   ;;  %v6506_v61 = vld [vmem:[#allocation7 + $0x40] ss:$8 sps:$4 sm:$0xff]  }
 0x385   :  { %v1185_v11 = vadd.f32 %v1171_v41, %v1154_v1  ;;  %v1222_v12 = vrot.slane %v1188_v62, %v6429_v55  ;;  %v1210_v21 = vrot.slane %v1188_v62, %v6365_v31  ;;  %v1234_v22 = vrot.slane %v1188_v62, %v6441_v37  ;;  %1433 = vmatprep.subr.bf16.mxu1 %v6065_v0  ;;  %v6517_v1 = vld [vmem:[#allocation7 + $0x64] ss:$8 sps:$4 sm:$0xff]  }
 0x386   :  { %v1189_v20 = vmul.f32 0.33333334, %v1183_v8  ;;  %v1184_v23 = vadd.f32 %v1167_v36, %v1153_v63  ;;  %v1264_v17 = vrot.slane %v1192_v39, %v6365_v31  ;;  %v1288_v19 = vrot.slane %v1192_v39, %v6441_v37  ;;  %v1957_v39 = vld [vmem:[#allocation7 + $0x38] sm:$0xff]  ;;  %2303 = vmatprep.subr.bf16.mxu0 %v6492_v59 }
 0x387   :  { %v1191_v46 = vmul.f32 0.33333334, %v1185_v11  ;;  %v1193_v24 = vmul.f32 0.33333334, %v1187_v2  ;;  %v1199_v51 = vrot.slane %v1188_v62, %v6404_v40  ;;  %v6486_v15 = vadd.f32 %v1987_v38, %v1979_v7  ;;  %v6509_v62 = vld [vmem:[#allocation7 + $0x54] ss:$8 sps:$4 sm:$0xff]  }
 0x388   :  { %v1248_v25 = vrot.slane %v1189_v20, %v6404_v40  ;;  %v1272_v27 = vrot.slane %v1189_v20, %v6429_v55  ;;  %v1260_v28 = vrot.slane %v1189_v20, %v6365_v31  ;;  %v1284_v29 = vrot.slane %v1189_v20, %v6441_v37  ;;  %1434 = vmatpush1.bf16.msra.mxu1 %v5687_v10  ;;  %v6514_v63 = vld [vmem:[#allocation7 + $0x50] ss:$8 sps:$4 sm:$0xff]  }
 0x389   :  { %v1226_v32 = vrot.slane %v1191_v46, %v6429_v55  ;;  %v1214_v3 = vrot.slane %v1191_v46, %v6365_v31  ;;  %v1238_v34 = vrot.slane %v1191_v46, %v6441_v37  ;;  %v1190_v35 = vmul.f32 0.33333334, %v1184_v23  ;;  %2048 = vmatprep.subr.bf16.mxu1 %v6492_v59  ;;  %v179_v10 = vld [vmem:[%s7482_s2 + $0x10] sm:$0xff] }
 0x38a   :  { %v1253_v5 = vsel %vm1204_vm0, %v1252_v16, %v1248_v25  ;;  %v1277_v43 = vsel %vm1204_vm0, %v1276_v50, %v1272_v27  ;;  %v1265_v44 = vsel %vm1204_vm0, %v1264_v17, %v1260_v28  ;;  %v1289_v45 = vsel %vm1204_vm0, %v1288_v19, %v1284_v29 }
 0x38b   :  { %v1227_v30 = vsel %vm1204_vm0, %v1226_v32, %v1222_v12  ;;  %v1215_v47 = vsel %vm1204_vm0, %v1214_v3, %v1210_v21  ;;  %v1239_v55 = vsel %vm1204_vm0, %v1238_v34, %v1234_v22  ;;  %v1308_v48 = vrot.slane %v1190_v35, %v6365_v31 }
 0x38c   :  { %1228 = vrot.lane.b32.xlu0 %v1227_v30, %s6071_s27  ;;  %1216 = vrot.lane.b32.xlu1 %v1215_v47, %s6072_s28  ;;  %v1312_v37 = vrot.slane %v1193_v24, %v6365_v31  ;;  %v1203_v14 = vrot.slane %v1191_v46, %v6404_v40  ;;  %v1298_v53 = vrot.slane %v1190_v35, %v6404_v40  ;;  %5713 = vtanh.f32 %v6486_v15 }
 0x38d   :  { %v1302_v54 = vrot.slane %v1193_v24, %v6404_v40  ;;  %v6499_v40 = vcombine.low %v1956_v58, %v1957_v39  ;;  %v5146_v7 = vmul.f32 -1.442695, %v6374_v18  ;;  %v180_v39 = vld [vmem:[%s7482_s2 + $0x18] sm:$0xff] }
 0x38e   :  { %v1313_v26 = vsel %vm1204_vm0, %v1312_v37, %v1308_v48  ;;  %v1205_v33 = vsel %vm1204_vm0, %v1203_v14, %v1199_v51 }
 0x38f   :  { %v1303_v31 = vsel %vm1204_vm0, %v1302_v54, %v1298_v53  ;;  %2304 = vmatpush1.bf16.msra.mxu0 %v6499_v40  ;;  %5715 = vpow2.f32 %v5146_v7  ;;  %vm1326_vm0 = vcmask 916480  }
 0x390   :  { %1254 = vrot.lane.b32.xlu0 %v1253_v5, %s6073_s7  ;;  %1240 = vrot.lane.b32.xlu1 %v1239_v55, %s6068_s14 }
 0x391   :  { %2305 = vmatprep.subr.bf16.mxu0 %v6502_v60 }
 0x393   :  { %2306 = vmatpush1.bf16.msra.mxu0 %v6506_v61 }
 0x394   :  { %1278 = vrot.lane.b32.xlu0 %v1277_v43, %s6074_s10  ;;  %1266 = vrot.lane.b32.xlu1 %v1265_v44, %s6075_s11  ;;  %v1850_v44 = vadd.f32 %v6376_v56, %v6407_v42  ;;  %v67_v56 = vld [vmem:[%s7481_s1 + $0x10] sm:$0xff] }
 0x395   :  { %2307 = vmatprep.subr.bf16.mxu0 %v6509_v62 }
 0x396   :  { %v5714_v2 = vpop.eup %5713 }
 0x397   :  { %2308 = vmatpush1.bf16.msra.mxu0 %v6514_v63 }
 0x398   :  { %1290 = vrot.lane.b32.xlu0 %v1289_v45, %s6076_s12  ;;  %1314 = vrot.lane.b32.xlu1 %v1313_v26, %s6072_s28  ;;  %v1852_v45 = vadd.f32 %v6378_v57, %v6371_v13 }
 0x399   :  { %2309 = vmatprep.subr.bf16.mxu0 %v6517_v1  ;;  %v5716_v36 = vpop.eup %5715 }
 0x39a   :  { %v1973_v12 = vadd.f32 1.0, %v5716_v36 }
 0x39b   :  { %2310 = vmatpush1.bf16.msra.mxu0 %v6522_v4 }
 0x39c   :  { %1992 = vrot.lane.b32.xlu1 %v5714_v2, %s6073_s7  ;;  %2473 = vmatprep.subr.bf16.mxu0 %v6492_v59  ;;  %5717 = vrcp.f32 %v1973_v12 }
 0x3a6   :  { %v5718_v49 = vpop.eup %5717 }
 0x3fe   :  { %v1229_v41 = vpop.permute.xlu0 %1228  ;;  %v1217_v8 = vpop.permute.xlu1 %1216 }
 0x3ff   :  { %v1317_v11 = vsel %vm947_vm1, %v1205_v33, %v1217_v8 }
 0x400   :  { %v1318_v20 = vsel %vm952_vm2, %v1317_v11, %v1229_v41 }
 0x402   :  { %v1255_v16 = vpop.permute.xlu0 %1254  ;;  %v1241_v50 = vpop.permute.xlu1 %1240 }
 0x403   :  { %v1319_v21 = vsel %vm336_vm9, %v1318_v20, %v1241_v50 }
 0x404   :  { %v1321_v18 = vsel %vm1320_vm12, %v1319_v21, %v1255_v16 }
 0x406   :  { %v1279_v22 = vpop.permute.xlu0 %1278  ;;  %v1267_v23 = vpop.permute.xlu1 %1266 }
 0x407   :  { %v1323_v46 = vsel %vm1322_vm13, %v1321_v18, %v1267_v23 }
 0x408   :  { %v1325_v19 = vsel %vm1324_vm14, %v1323_v46, %v1279_v22 }
 0x40a   :  { %v1291_v17 = vpop.permute.xlu0 %1290  ;;  %v1315_v24 = vpop.permute.xlu1 %1314 }
 0x40b   :  { %v1327_v25 = vsel %vm1326_vm0, %v1325_v19, %v1291_v17  ;;  %v1328_v27 = vsel %vm947_vm1, %v1303_v31, %v1315_v24  ;;  %v68_v31 = vld [vmem:[%s7481_s1 + $0x18] sm:$0xff] }
 0x40c   :  { %v1329_v28 = vpack.c.bf16 %v1327_v25, %v1327_v25  ;;  %v1330_v29 = vpack.c.bf16 %v1328_v27, %v1328_v27 }
 0x40e   :  { %5123 = vmatprep.mubr.msk.bf16.mxu1 %vm952_vm2, %v1330_v29  ;;  %v1993_v32 = vpop.permute.xlu1 %1992 }
 0x40f   :  { %v6533_v3 = vmul.f32 %v5718_v49, %v1993_v32  ;;  %1448 = vmatmul.mubr.bf16.vlgmr.msra.gmra.mrb[4].mxu1 %v1329_v28 }
 0x410   :  { %2049 = vmatpush1.bf16.msra.mxu1 %v6499_v40  ;;  %2080 = vmatprep.mubr.bf16.mxu1 %v6065_v0 }
 0x411   :  { %1996 = vst.msk [vmem:[#allocation3] sm:$0xff] %vm952_vm2, %v6533_v3  ;;  %2050 = vmatprep.subr.bf16.mxu1 %v6502_v60  ;;  %v2002_v34 = vpack.c.bf16 %v6533_v3, %v6533_v3 }
 0x414   :  { %2051 = vmatpush1.bf16.msra.mxu1 %v6506_v61 }
 0x415   :  { %2052 = vmatprep.subr.bf16.mxu1 %v6509_v62 }
 0x418   :  { %2053 = vmatpush1.bf16.msra.mxu1 %v6514_v63 }
 0x419   :  { %2054 = vmatprep.subr.bf16.mxu1 %v6517_v1 }
 0x41c   :  { %2055 = vmatpush1.bf16.msra.mxu1 %v6522_v4 }
 0x41d   :  { %2133 = vmatprep.subr.bf16.mxu1 %v6492_v59 }
 0x41f   :  { %5155 = vmatmul.mubr.msk.bf16.vlgmr.msra.gmra.mrb[8].mxu1 %vm1320_vm12, %v2002_v34 }
 0x420   :  { %2134 = vmatpush1.bf16.msra.mxu1 %v6499_v40  ;;  %2165 = vmatprep.mubr.bf16.mxu1 %v6065_v0 }
 0x421   :  { %2135 = vmatprep.subr.bf16.mxu1 %v6502_v60 }
 0x424   :  { %2136 = vmatpush1.bf16.msra.mxu1 %v6506_v61 }
 0x425   :  { %2137 = vmatprep.subr.bf16.mxu1 %v6509_v62 }
 0x428   :  { %2138 = vmatpush1.bf16.msra.mxu1 %v6514_v63 }
 0x429   :  { %2139 = vmatprep.subr.bf16.mxu1 %v6517_v1 }
 0x42c   :  { %2140 = vmatpush1.bf16.msra.mxu1 %v6522_v4 }
 0x42d   :  { %2218 = vmatprep.subr.bf16.mxu1 %v6492_v59 }
 0x4e2   :  { %v6558_v35 = vpop.f32.mrb[4].mxu1 }
 0x4e3   :  { %v1451_v38 = vpop.f32.mrb[5].mxu1 }
 0x4e4   :  { %v1452_v5 = vpop.f32.mrb[6].mxu1 }
 0x4e5   :  { %v1453_v43 = vpop.f32.mrb[7].mxu1 }
 0x4f2   :  { %v2082_v30 = vpop.f32.mrb[8].mxu1 }
 0x4f3   :  { %v2089_v47 = vadd.f32 %v2082_v30, %v1850_v44  ;;  %v2084_v55 = vpop.f32.mrb[9].mxu1 }
 0x4f4   :  { %v2090_v48 = vadd.f32 %v2084_v55, %v1852_v45  ;;  %v2086_v37 = vpop.f32.mrb[10].mxu1 }
 0x4f5   :  { %v2087_v14 = vpop.f32.mrb[11].mxu1  ;;  %v5156_v57 = vmul.f32 -1.442695, %v2089_v47 }
 0x4f6   :  { %5719 = vtanh.f32 %v2090_v48 }
 0x4f7   :  { %5721 = vpow2.f32 %v5156_v57 }
 0x500   :  { %v5720_v51 = vpop.eup %5719 }
 0x501   :  { %2106 = vrot.lane.b32.xlu0 %v5720_v51, %s6073_s7  ;;  %v5722_v53 = vpop.eup %5721 }
 0x502   :  { %v2097_v54 = vadd.f32 1.0, %v5722_v53 }
 0x504   :  { %5723 = vrcp.f32 %v2097_v54 }
 0x505   :  { %200 = vperm.xlu0 %5514, %v179_v10  }
 0x509   :  { %88 = vperm.xlu0 %5514, %v67_v56  }
 0x50e   :  { %v5724_v26 = vpop.eup %5723 }
 0x50f   :  { %v2104_v2 = vmul.f32 %v5724_v26, %v6486_v15  ;;  %v5157_v15 = vmul.f32 -1.442695, %v2090_v48 }
 0x573   :  { %v2107_v33 = vpop.permute.xlu0 %2106 }
 0x574   :  { %v2109_v58 = vmul.f32 %v5724_v26, %v2107_v33 }
 0x576   :  { %2111 = vrot.lane.b32.xlu1 %v2109_v58, %s6073_s7 }
 0x57a   :  { %203 = vperm.xlu1 %5515, %v180_v39  }
 0x57e   :  { %91 = vperm.xlu1 %5515, %v68_v31  }
 0x584   :  { %v201_v8 = vpop.permute.xlu0 %200 }
 0x585   :  { %vm243_vm4 = vcmp.eq.s32.totalorder %v201_v8, %v6138_v6  ;;  %v187_v8 = vld [vmem:[%s7482_s2 + $0x50] sm:$0xff] }
 0x586   :  { %v5078_v12 = vsel %vm243_vm4, 1.0, %v6066_v9 }
 0x588   :  { %v89_v19 = vpop.permute.xlu0 %88 }
 0x589   :  { %vm131_vm10 = vcmp.eq.s32.totalorder %v89_v19, %v6138_v6 }
 0x58a   :  { %v5062_v28 = vsel %vm131_vm10, 1.0, %v6066_v9 }
 0x5e8   :  { %v2112_v7 = vpop.permute.xlu1 %2111 }
 0x5e9   :  { %v6579_v36 = vadd.f32 %v2112_v7, %v2104_v2  ;;  %v181_v7 = vld [vmem:[%s7482_s2 + $0x20] sm:$0xff] }
 0x5eb   :  { %5725 = vtanh.f32 %v6579_v36 }
 0x5ec   :  { %5727 = vpow2.f32 %v5157_v15 }
 0x5f5   :  { %v5726_v41 = vpop.eup %5725 }
 0x5f6   :  { %2117 = vrot.lane.b32.xlu1 %v5726_v41, %s6073_s7  ;;  %v5728_v20 = vpop.eup %5727  ;;  %v183_v41 = vld [vmem:[%s7482_s2 + $0x30] sm:$0xff] }
 0x5f7   :  { %v2098_v21 = vadd.f32 1.0, %v5728_v20 }
 0x5f9   :  { %v204_v11 = vpop.permute.xlu1 %203  ;;  %5729 = vrcp.f32 %v2098_v21 }
 0x5fa   :  { %vm244_vm6 = vcmp.eq.s32.totalorder %v204_v11, %v6138_v6  ;;  %v189_v11 = vld [vmem:[%s7482_s2 + $0x60] sm:$0xff] }
 0x5fb   :  { %v5079_v16 = vsel %vm244_vm6, 1.0, %v6066_v9 }
 0x5fc   :  { %v5581_v50 = vpack.i.bf16 %v5079_v16, %v5078_v12  ;;  %v191_v12 = vld [vmem:[%s7482_s2 + $0x70] sm:$0xff] }
 0x5fd   :  { %v92_v22 = vpop.permute.xlu1 %91 }
 0x5fe   :  { %5582 = vrot.lane.b32.xlu0 %v5581_v50, %s6067_s0  ;;  %vm132_vm11 = vcmp.eq.s32.totalorder %v92_v22, %v6138_v6 }
 0x5ff   :  { %v5063_v29 = vsel %vm132_vm11, 1.0, %v6066_v9 }
 0x603   :  { %v5730_v23 = vpop.eup %5729 }
 0x668   :  { %v2118_v18 = vpop.permute.xlu1 %2117 }
 0x669   :  { %v6588_v46 = vmul.f32 %v5730_v23, %v2118_v18 }
 0x66b   :  { %2121 = vst.msk [vmem:[#allocation3 + $0x8] sm:$0xff] %vm952_vm2, %v6588_v46  ;;  %v2127_v17 = vpack.c.bf16 %v6588_v46, %v6588_v46 }
 0x66d   :  { %5158 = vmatmul.mubr.msk.bf16.vlgmr.msra.gmra.mrb[12].mxu1 %vm1320_vm12, %v2127_v17 }
 0x66e   :  { %2219 = vmatpush1.bf16.msra.mxu1 %v6499_v40  ;;  %2250 = vmatprep.mubr.bf16.mxu1 %v6065_v0 }
 0x66f   :  { %2220 = vmatprep.subr.bf16.mxu1 %v6502_v60 }
 0x670   :  { %v5583_v24 = vpop.permute.xlu0 %5582 }
 0x671   :  { %v5585_v25 = vunpack.i.h.bf16 %v5583_v24  ;;  %v5584_v27 = vunpack.i.l.bf16 %v5583_v24 }
 0x672   :  { %2221 = vmatpush1.bf16.msra.mxu1 %v6506_v61 }
 0x673   :  { %v1718_v49 = vsel %vm331_vm8, %v5063_v29, %v5585_v25  ;;  %v1717_v32 = vsel %vm331_vm8, %v5062_v28, %v5584_v27  ;;  %2222 = vmatprep.subr.bf16.mxu1 %v6509_v62 }
 0x674   :  { %v1732_v34 = vpack.c.bf16 %v1718_v49, %v1717_v32  ;;  %v182_v32 = vld [vmem:[%s7482_s2 + $0x28] sm:$0xff] }
 0x676   :  { %5138 = vmatmul.mubr.msk.bf16.gmra.mrb[12].mxu0 %vm336_vm9, %v1732_v34  ;;  %2223 = vmatpush1.bf16.msra.mxu1 %v6514_v63  ;;  %v184_v34 = vld [vmem:[%s7482_s2 + $0x38] sm:$0xff] }
 0x677   :  { %2224 = vmatprep.subr.bf16.mxu1 %v6517_v1  ;;  %1863 = vmatprep.mubr.bf16.mxu0 %v6065_v0 }
 0x67a   :  { %2225 = vmatpush1.bf16.msra.mxu1 %v6522_v4 }
 0x67b   :  { %2388 = vmatprep.subr.bf16.mxu1 %v6492_v59 }
 0x740   :  { %v2167_v38 = vpop.f32.mrb[12].mxu1 }
 0x741   :  { %v2169_v5 = vpop.f32.mrb[13].mxu1 }
 0x742   :  { %v2171_v43 = vpop.f32.mrb[14].mxu1 }
 0x743   :  { %v2172_v44 = vpop.f32.mrb[15].mxu1  ;;  %v190_v43 = vld [vmem:[%s7482_s2 + $0x68] sm:$0xff] }
 0x744   :  { %v192_v44 = vld [vmem:[%s7482_s2 + $0x78] sm:$0xff] }
 0x749   :  { %v1855_v45 = vpop.f32.mrb[12].mxu0 }
 0x74a   :  { %v1856_v30 = vadd.f32 %v1855_v45, %v6407_v42  ;;  %v1857_v47 = vpop.f32.mrb[13].mxu0  ;;  %v69_v45 = vld [vmem:[%s7481_s1 + $0x20] sm:$0xff] }
 0x74b   :  { %v1858_v55 = vadd.f32 %v1857_v47, %v6371_v13  ;;  %v1859_v48 = vpop.f32.mrb[14].mxu0 }
 0x74c   :  { %v2174_v37 = vadd.f32 %v2167_v38, %v1856_v30  ;;  %v1861_v14 = vpop.f32.mrb[15].mxu0  ;;  %v1860_v18 = vadd.f32 %v1859_v48, %v6407_v42  ;;  %v186_v38 = vld [vmem:[%s7482_s2 + $0x48] sm:$0xff]  ;;  %v71_v30 = vld [vmem:[%s7481_s1 + $0x30] sm:$0xff] }
 0x74d   :  { %v2175_v51 = vadd.f32 %v2169_v5, %v1858_v55  ;;  %v1862_v17 = vadd.f32 %v1861_v14, %v6371_v13  ;;  %v188_v5 = vld [vmem:[%s7482_s2 + $0x58] sm:$0xff] }
 0x74e   :  { %v5159_v56 = vmul.f32 -1.442695, %v2174_v37 }
 0x74f   :  { %5731 = vtanh.f32 %v2175_v51  ;;  %v5160_v16 = vmul.f32 -1.442695, %v2175_v51 }
 0x750   :  { %5733 = vpow2.f32 %v5159_v56 }
 0x759   :  { %v5732_v10 = vpop.eup %5731 }
 0x75a   :  { %2191 = vrot.lane.b32.xlu0 %v5732_v10, %s6073_s7  ;;  %v5734_v57 = vpop.eup %5733  ;;  %v70_v10 = vld [vmem:[%s7481_s1 + $0x28] sm:$0xff] }
 0x75b   :  { %v2182_v53 = vadd.f32 1.0, %v5734_v57  ;;  %v72_v57 = vld [vmem:[%s7481_s1 + $0x38] sm:$0xff] }
 0x75d   :  { %5735 = vrcp.f32 %v2182_v53  ;;  %v73_v53 = vld [vmem:[%s7481_s1 + $0x40] sm:$0xff] }
 0x767   :  { %v5736_v54 = vpop.eup %5735 }
 0x768   :  { %v2189_v58 = vmul.f32 %v5736_v54, %v6579_v36  ;;  %v185_v36 = vld [vmem:[%s7482_s2 + $0x40] sm:$0xff] }
 0x7cc   :  { %v2192_v26 = vpop.permute.xlu0 %2191 }
 0x7cd   :  { %v2194_v33 = vmul.f32 %v5736_v54, %v2192_v26 }
 0x7cf   :  { %2196 = vrot.lane.b32.xlu1 %v2194_v33, %s6073_s7 }
 0x841   :  { %v2197_v39 = vpop.permute.xlu1 %2196 }
 0x842   :  { %v6617_v31 = vadd.f32 %v2197_v39, %v2189_v58 }
 0x844   :  { %5737 = vtanh.f32 %v6617_v31 }
 0x845   :  { %5739 = vpow2.f32 %v5160_v16 }
 0x84e   :  { %v5738_v2 = vpop.eup %5737 }
 0x84f   :  { %2202 = vrot.lane.b32.xlu0 %v5738_v2, %s6073_s7  ;;  %v5740_v50 = vpop.eup %5739 }
 0x850   :  { %v2183_v15 = vadd.f32 1.0, %v5740_v50  ;;  %v75_v50 = vld [vmem:[%s7481_s1 + $0x50] sm:$0xff] }
 0x852   :  { %5741 = vrcp.f32 %v2183_v15  ;;  %v76_v15 = vld [vmem:[%s7481_s1 + $0x58] sm:$0xff] }
 0x853   :  { %206 = vperm.xlu0 %5514, %v181_v7  }
 0x857   :  { %212 = vperm.xlu0 %5514, %v183_v41  }
 0x85b   :  { %218 = vperm.xlu0 %5514, %v185_v36  }
 0x85c   :  { %v5742_v20 = vpop.eup %5741 }
 0x85f   :  { %224 = vperm.xlu0 %5514, %v187_v8   ;;  %v74_v8 = vld [vmem:[%s7481_s1 + $0x48] sm:$0xff] }
 0x863   :  { %230 = vperm.xlu0 %5514, %v189_v11  }
 0x867   :  { %236 = vperm.xlu0 %5514, %v191_v12  }
 0x8c1   :  { %v2203_v21 = vpop.permute.xlu0 %2202 }
 0x8c2   :  { %v6639_v22 = vmul.f32 %v5742_v20, %v2203_v21 }
 0x8c4   :  { %2206 = vst.msk [vmem:[#allocation3 + $0x10] sm:$0xff] %vm952_vm2, %v6639_v22  ;;  %v2212_v23 = vpack.c.bf16 %v6639_v22, %v6639_v22 }
 0x8c6   :  { %5161 = vmatmul.mubr.msk.bf16.vlgmr.msra.gmra.mrb[16].mxu1 %vm1320_vm12, %v2212_v23 }
 0x8c7   :  { %2389 = vmatpush1.bf16.msra.mxu1 %v6499_v40  ;;  %2420 = vmatprep.mubr.bf16.mxu1 %v6065_v0 }
 0x8c8   :  { %2390 = vmatprep.subr.bf16.mxu1 %v6502_v60 }
 0x8cb   :  { %2391 = vmatpush1.bf16.msra.mxu1 %v6506_v61 }
 0x8cc   :  { %2392 = vmatprep.subr.bf16.mxu1 %v6509_v62 }
 0x8cf   :  { %2393 = vmatpush1.bf16.msra.mxu1 %v6514_v63 }
 0x8d0   :  { %2394 = vmatprep.subr.bf16.mxu1 %v6517_v1 }
 0x8d2   :  { %v207_v56 = vpop.permute.xlu0 %206 }
 0x8d3   :  { %2395 = vmatpush1.bf16.msra.mxu1 %v6522_v4  ;;  %vm245_vm13 = vcmp.eq.s32.totalorder %v207_v56, %v6138_v6 }
 0x8d4   :  { %2558 = vmatprep.subr.bf16.mxu1 %v6492_v59  ;;  %v5080_v33 = vsel %vm245_vm13, 1.0, %v6066_v9 }
 0x8d6   :  { %v213_v54 = vpop.permute.xlu0 %212 }
 0x8d7   :  { %vm247_vm0 = vcmp.eq.s32.totalorder %v213_v54, %v6138_v6 }
 0x8d8   :  { %v5082_v41 = vsel %vm247_vm0, 1.0, %v6066_v9 }
 0x8da   :  { %v219_v58 = vpop.permute.xlu0 %218 }
 0x8db   :  { %vm249_vm10 = vcmp.eq.s32.totalorder %v219_v58, %v6138_v6 }
 0x8dc   :  { %v5084_v23 = vsel %vm249_vm10, 1.0, %v6066_v9 }
 0x8de   :  { %v225_v12 = vpop.permute.xlu0 %224 }
 0x8df   :  { %vm251_vm13 = vcmp.eq.s32.totalorder %v225_v12, %v6138_v6 }
 0x999   :  { %v2252_v19 = vpop.f32.mrb[16].mxu1 }
 0x99a   :  { %v2259_v24 = vadd.f32 %v2252_v19, %v1860_v18  ;;  %v2254_v25 = vpop.f32.mrb[17].mxu1  ;;  %v231_v18 = vpop.permute.xlu0 %230 }
 0x99b   :  { %v6657_v27 = vadd.f32 %v2254_v25, %v1862_v17  ;;  %v2256_v28 = vpop.f32.mrb[18].mxu1  ;;  %v77_v17 = vld [vmem:[%s7481_s1 + $0x60] sm:$0xff] }
 0x99c   :  { %v2257_v29 = vpop.f32.mrb[19].mxu1  ;;  %v5162_v47 = vmul.f32 -1.442695, %v2259_v24  ;;  %v5086_v28 = vsel %vm251_vm13, 1.0, %v6066_v9 }
 0x99d   :  { %5743 = vtanh.f32 %v6657_v27  ;;  %v78_v29 = vld [vmem:[%s7481_s1 + $0x68] sm:$0xff] }
 0x99e   :  { %5745 = vpow2.f32 %v5162_v47 }
 0x9a7   :  { %v5744_v49 = vpop.eup %5743 }
 0x9a8   :  { %2276 = vrot.lane.b32.xlu1 %v5744_v49, %s6073_s7  ;;  %v5746_v55 = vpop.eup %5745 }
 0x9a9   :  { %v2267_v48 = vadd.f32 1.0, %v5746_v55 }
 0x9ab   :  { %5747 = vrcp.f32 %v2267_v48 }
 0x9ac   :  { %209 = vperm.xlu1 %5515, %v182_v32   ;;  %v237_v32 = vpop.permute.xlu0 %236 }
 0x9b0   :  { %215 = vperm.xlu1 %5515, %v184_v34  }
 0x9b4   :  { %221 = vperm.xlu1 %5515, %v186_v38   ;;  %v79_v38 = vld [vmem:[%s7481_s1 + $0x70] sm:$0xff] }
 0x9b5   :  { %v6685_v37 = vpop.eup %5747 }
 0x9b6   :  { %v2274_v48 = vmul.f32 %v6685_v37, %v6617_v31 }
 0x9b8   :  { %227 = vperm.xlu1 %5515, %v188_v5   ;;  %v80_v5 = vld [vmem:[%s7481_s1 + $0x78] sm:$0xff] }
 0x9bc   :  { %233 = vperm.xlu1 %5515, %v190_v43  }
 0x9c0   :  { %239 = vperm.xlu1 %5515, %v192_v44  }
 0x9c4   :  { %94 = vperm.xlu1 %5515, %v69_v45  }
 0x9c8   :  { %100 = vperm.xlu1 %5515, %v71_v30  }
 0xa1a   :  { %v2277_v14 = vpop.permute.xlu1 %2276 }
 0xa1b   :  { %v2279_v51 = vmul.f32 %v6685_v37, %v2277_v14 }
 0xa1d   :  { %2281 = vrot.lane.b32.xlu0 %v2279_v51, %s6073_s7 }
 0xa21   :  { %97 = vperm.xlu0 %5514, %v70_v10  }
 0xa25   :  { %103 = vperm.xlu0 %5514, %v72_v57  }
 0xa29   :  { %106 = vperm.xlu0 %5514, %v73_v53  }
 0xa2b   :  { %v210_v26 = vpop.permute.xlu1 %209 }
 0xa2c   :  { %vm246_vm14 = vcmp.eq.s32.totalorder %v210_v26, %v6138_v6 }
 0xa2d   :  { %v5081_v39 = vsel %vm246_vm14, 1.0, %v6066_v9 }
 0xa2e   :  { %v5586_v2 = vpack.i.bf16 %v5081_v39, %v5080_v33 }
 0xa2f   :  { %v216_v7 = vpop.permute.xlu1 %215 }
 0xa30   :  { %vm248_vm4 = vcmp.eq.s32.totalorder %v216_v7, %v6138_v6  ;;  %5587 = vrot.lane.b32.xlu1 %v5586_v2, %s6067_s0 }
 0xa31   :  { %v5083_v36 = vsel %vm248_vm4, 1.0, %v6066_v9  ;;  %vm253_vm4 = vcmp.eq.s32.totalorder %v231_v18, %v6138_v6 }
 0xa32   :  { %v5591_v11 = vpack.i.bf16 %v5083_v36, %v5082_v41  ;;  %v5088_v45 = vsel %vm253_vm4, 1.0, %v6066_v9 }
 0xa33   :  { %v222_v16 = vpop.permute.xlu1 %221 }
 0xa34   :  { %vm250_vm6 = vcmp.eq.s32.totalorder %v222_v16, %v6138_v6  ;;  %109 = vperm.xlu1 %5515, %v74_v8   ;;  %5592 = vrot.lane.b32.xlu0 %v5591_v11, %s6067_s0 }
 0xa35   :  { %v5085_v20 = vsel %vm250_vm6, 1.0, %v6066_v9  ;;  %vm255_vm6 = vcmp.eq.s32.totalorder %v237_v32, %v6138_v6 }
 0xa36   :  { %v5596_v19 = vpack.i.bf16 %v5085_v20, %v5084_v23  ;;  %v5090_v30 = vsel %vm255_vm6, 1.0, %v6066_v9 }
 0xa37   :  { %v228_v21 = vpop.permute.xlu1 %227 }
 0xa38   :  { %vm252_vm11 = vcmp.eq.s32.totalorder %v228_v21, %v6138_v6  ;;  %112 = vperm.xlu1 %5515, %v75_v50   ;;  %115 = vperm.xlu0 %5514, %v76_v15  }
 0xa39   :  { %v5087_v24 = vsel %vm252_vm11, 1.0, %v6066_v9 }
 0xa3a   :  { %v5601_v49 = vpack.i.bf16 %v5087_v24, %v5086_v28 }
 0xa3b   :  { %v234_v25 = vpop.permute.xlu1 %233 }
 0xa3c   :  { %118 = vperm.xlu0 %5514, %v77_v17   ;;  %5597 = vrot.lane.b32.xlu1 %v5596_v19, %s6067_s0  ;;  %vm254_vm14 = vcmp.eq.s32.totalorder %v234_v25, %v6138_v6 }
 0xa3d   :  { %v5089_v43 = vsel %vm254_vm14, 1.0, %v6066_v9 }
 0xa3e   :  { %v5606_v47 = vpack.i.bf16 %v5089_v43, %v5088_v45 }
 0xa3f   :  { %v240_v34 = vpop.permute.xlu1 %239 }
 0xa40   :  { %vm256_vm0 = vcmp.eq.s32.totalorder %v240_v34, %v6138_v6  ;;  %121 = vperm.xlu1 %5515, %v78_v29   ;;  %5602 = vrot.lane.b32.xlu0 %v5601_v49, %s6067_s0 }
 0xa41   :  { %v5091_v44 = vsel %vm256_vm0, 1.0, %v6066_v9 }
 0xa42   :  { %v5611_v55 = vpack.i.bf16 %v5091_v44, %v5090_v30 }
 0xa43   :  { %v95_v10 = vpop.permute.xlu1 %94 }
 0xa44   :  { %124 = vperm.xlu1 %5515, %v79_v38   ;;  %127 = vperm.xlu0 %5514, %v80_v5   ;;  %vm133_vm10 = vcmp.eq.s32.totalorder %v95_v10, %v6138_v6 }
 0xa45   :  { %v5064_v31 = vsel %vm133_vm10, 1.0, %v6066_v9 }
 0xa47   :  { %v101_v57 = vpop.permute.xlu1 %100 }
 0xa48   :  { %5607 = vrot.lane.b32.xlu1 %v5606_v47, %s6067_s0  ;;  %5612 = vrot.lane.b32.xlu0 %v5611_v55, %s6067_s0  ;;  %vm135_vm13 = vcmp.eq.s32.totalorder %v101_v57, %v6138_v6 }
 0xa49   :  { %v5066_v12 = vsel %vm135_vm13, 1.0, %v6066_v9 }
 0xa8f   :  { %v2282_v14 = vpop.permute.xlu0 %2281 }
 0xa90   :  { %v6751_v51 = vadd.f32 %v2282_v14, %v2274_v48 }
 0xa92   :  { %5749 = vtanh.f32 %v6751_v51 }
 0xa9c   :  { %v5750_v56 = vpop.eup %5749 }
 0xa9d   :  { %2287 = vrot.lane.b32.xlu1 %v5750_v56, %s6073_s7 }
 0xaa0   :  { %v98_v53 = vpop.permute.xlu0 %97 }
 0xaa1   :  { %vm134_vm11 = vcmp.eq.s32.totalorder %v98_v53, %v6138_v6 }
 0xaa2   :  { %v5588_v54 = vpop.permute.xlu1 %5587  ;;  %v5065_v37 = vsel %vm134_vm11, 1.0, %v6066_v9 }
 0xaa3   :  { %v5590_v26 = vunpack.i.h.bf16 %v5588_v54  ;;  %v5589_v33 = vunpack.i.l.bf16 %v5588_v54 }
 0xaa4   :  { %v104_v58 = vpop.permute.xlu0 %103 }
 0xaa5   :  { %v1720_v39 = vsel %vm331_vm8, %v5065_v37, %v5590_v26  ;;  %v1719_v2 = vsel %vm331_vm8, %v5064_v31, %v5589_v33  ;;  %vm136_vm14 = vcmp.eq.s32.totalorder %v104_v58, %v6138_v6 }
 0xaa6   :  { %v1733_v7 = vpack.c.bf16 %v1720_v39, %v1719_v2  ;;  %v5067_v16 = vsel %vm136_vm14, 1.0, %v6066_v9 }
 0xaa8   :  { %v107_v41 = vpop.permute.xlu0 %106  ;;  %5139 = vmatmul.mubr.msk.bf16.gmra.mrb[16].mxu0 %vm336_vm9, %v1733_v7 }
 0xaa9   :  { %1873 = vmatprep.mubr.bf16.mxu0 %v6065_v0  ;;  %vm137_vm0 = vcmp.eq.s32.totalorder %v107_v41, %v6138_v6 }
 0xaaa   :  { %v5068_v28 = vsel %vm137_vm0, 1.0, %v6066_v9 }
 0xaac   :  { %v5593_v36 = vpop.permute.xlu0 %5592 }
 0xaad   :  { %v5595_v8 = vunpack.i.h.bf16 %v5593_v36  ;;  %v5594_v11 = vunpack.i.l.bf16 %v5593_v36 }
 0xaaf   :  { %v1722_v50 = vsel %vm331_vm8, %v5067_v16, %v5595_v8  ;;  %v1721_v15 = vsel %vm331_vm8, %v5066_v12, %v5594_v11 }
 0xab0   :  { %v1734_v20 = vpack.c.bf16 %v1722_v50, %v1721_v15 }
 0xab2   :  { %5140 = vmatmul.mubr.msk.bf16.gmra.mrb[20].mxu0 %vm336_vm9, %v1734_v20 }
 0xab3   :  { %v110_v21 = vpop.permute.xlu1 %109  ;;  %1883 = vmatprep.mubr.bf16.mxu0 %v6065_v0 }
 0xab4   :  { %vm138_vm4 = vcmp.eq.s32.totalorder %v110_v21, %v6138_v6 }
 0xab5   :  { %v5069_v29 = vsel %vm138_vm4, 1.0, %v6066_v9 }
 0xab7   :  { %v116_v23 = vpop.permute.xlu0 %115  ;;  %v113_v18 = vpop.permute.xlu1 %112 }
 0xab8   :  { %vm140_vm6 = vcmp.eq.s32.totalorder %v116_v23, %v6138_v6  ;;  %vm139_vm10 = vcmp.eq.s32.totalorder %v113_v18, %v6138_v6 }
 0xab9   :  { %v5071_v45 = vsel %vm140_vm6, 1.0, %v6066_v9  ;;  %v5070_v30 = vsel %vm139_vm10, 1.0, %v6066_v9 }
 0xabb   :  { %v119_v17 = vpop.permute.xlu0 %118  ;;  %v5598_v19 = vpop.permute.xlu1 %5597 }
 0xabc   :  { %v5600_v24 = vunpack.i.h.bf16 %v5598_v19  ;;  %v5599_v25 = vunpack.i.l.bf16 %v5598_v19  ;;  %vm141_vm11 = vcmp.eq.s32.totalorder %v119_v17, %v6138_v6 }
 0xabd   :  { %v5072_v54 = vsel %vm141_vm11, 1.0, %v6066_v9 }
 0xabe   :  { %v1724_v49 = vsel %vm331_vm8, %v5069_v29, %v5600_v24  ;;  %v1723_v32 = vsel %vm331_vm8, %v5068_v28, %v5599_v25 }
 0xabf   :  { %v5603_v34 = vpop.permute.xlu0 %5602  ;;  %v122_v38 = vpop.permute.xlu1 %121  ;;  %v1735_v5 = vpack.c.bf16 %v1724_v49, %v1723_v32 }
 0xac0   :  { %v5605_v43 = vunpack.i.h.bf16 %v5603_v34  ;;  %v5604_v44 = vunpack.i.l.bf16 %v5603_v34  ;;  %vm142_vm13 = vcmp.eq.s32.totalorder %v122_v38, %v6138_v6 }
 0xac1   :  { %5141 = vmatmul.mubr.msk.bf16.gmra.mrb[24].mxu0 %vm336_vm9, %v1735_v5  ;;  %v5073_v26 = vsel %vm142_vm13, 1.0, %v6066_v9 }
 0xac2   :  { %1893 = vmatprep.mubr.bf16.mxu0 %v6065_v0  ;;  %v1726_v55 = vsel %vm331_vm8, %v5071_v45, %v5605_v43  ;;  %v1725_v48 = vsel %vm331_vm8, %v5070_v30, %v5604_v44 }
 0xac3   :  { %v125_v47 = vpop.permute.xlu1 %124  ;;  %v128_v14 = vpop.permute.xlu0 %127  ;;  %v1736_v56 = vpack.c.bf16 %v1726_v55, %v1725_v48 }
 0xac4   :  { %vm144_vm14 = vcmp.eq.s32.totalorder %v128_v14, %v6138_v6  ;;  %vm143_vm0 = vcmp.eq.s32.totalorder %v125_v47, %v6138_v6  ;;  %v5163_v6 = vmul.f32 -1.442695, %v6657_v27 }
 0xac5   :  { %v5075_v7 = vsel %vm144_vm14, 1.0, %v6066_v9  ;;  %v5074_v41 = vsel %vm143_vm0, 1.0, %v6066_v9 }
 0xac6   :  { %5751 = vpow2.f32 %v5163_v6 }
 0xac7   :  { %v5608_v10 = vpop.permute.xlu1 %5607  ;;  %v5613_v37 = vpop.permute.xlu0 %5612 }
 0xac8   :  { %v5610_v57 = vunpack.i.h.bf16 %v5608_v10  ;;  %v5609_v53 = vunpack.i.l.bf16 %v5608_v10  ;;  %v5615_v39 = vunpack.i.h.bf16 %v5613_v37  ;;  %v5614_v2 = vunpack.i.l.bf16 %v5613_v37 }
 0xac9   :  { %5142 = vmatmul.mubr.msk.bf16.gmra.mrb[28].mxu0 %vm336_vm9, %v1736_v56 }
 0xaca   :  { %1903 = vmatprep.mubr.bf16.mxu0 %v6065_v0  ;;  %v1728_v33 = vsel %vm331_vm8, %v5073_v26, %v5610_v57  ;;  %v1727_v31 = vsel %vm331_vm8, %v5072_v54, %v5609_v53  ;;  %v1730_v36 = vsel %vm331_vm8, %v5075_v7, %v5615_v39  ;;  %v1729_v8 = vsel %vm331_vm8, %v5074_v41, %v5614_v2 }
 0xacb   :  { %v1737_v58 = vpack.c.bf16 %v1728_v33, %v1727_v31  ;;  %v1738_v11 = vpack.c.bf16 %v1730_v36, %v1729_v8 }
 0xad0   :  { %v5752_v12 = vpop.eup %5751 }
 0xad1   :  { %5143 = vmatmul.mubr.msk.bf16.gmra.mrb[32].mxu0 %vm336_vm9, %v1737_v58  ;;  %v2268_v16 = vadd.f32 1.0, %v5752_v12 }
 0xad2   :  { %1913 = vmatprep.mubr.bf16.mxu0 %v6065_v0 }
 0xad3   :  { %5753 = vrcp.f32 %v2268_v16 }
 0xad9   :  { %5144 = vmatmul.mubr.msk.bf16.gmra.mrb[36].mxu0 %vm336_vm9, %v1738_v11  ;;  %vm6078_vm9 = vmmov 0  }
 0xada   :  { %2335 = vmatprep.mubr.bf16.mxu0 %v6065_v0 }
 0xadd   :  { %v5754_v50 = vpop.eup %5753 }
 0xb0f   :  { %v2288_v15 = vpop.permute.xlu1 %2287 }
 0xb10   :  { %v6804_v20 = vmul.f32 %v5754_v50, %v2288_v15 }
 0xb12   :  { %2291 = vst.msk [vmem:[#allocation3 + $0x18] sm:$0xff] %vm952_vm2, %v6804_v20  ;;  %v2297_v21 = vpack.c.bf16 %v6804_v20, %v6804_v20 }
 0xb14   :  { %5164 = vmatmul.mubr.msk.bf16.vlgmr.msra.gmra.mrb[40].mxu0 %vm1320_vm12, %v2297_v21 }
 0xb15   :  { %2474 = vmatpush1.bf16.msra.mxu0 %v6499_v40  ;;  %2505 = vmatprep.mubr.bf16.mxu0 %v6065_v0 }
 0xb16   :  { %2475 = vmatprep.subr.bf16.mxu0 %v6502_v60 }
 0xb19   :  { %2476 = vmatpush1.bf16.msra.mxu0 %v6506_v61 }
 0xb1a   :  { %2477 = vmatprep.subr.bf16.mxu0 %v6509_v62 }
 0xb1d   :  { %2478 = vmatpush1.bf16.msra.mxu0 %v6514_v63 }
 0xb1e   :  { %2479 = vmatprep.subr.bf16.mxu0 %v6517_v1 }
 0xb21   :  { %2480 = vmatpush1.bf16.msra.mxu0 %v6522_v4 }
 0xb22   :  { %2643 = vmatprep.subr.bf16.mxu0 %v6492_v59 }
 0xb7b   :  { %v1865_v27 = vpop.f32.mrb[16].mxu0 }
 0xb7c   :  { %v1867_v23 = vpop.f32.mrb[17].mxu0  ;;  %v1866_v57 = vadd.f32 %v1865_v27, %v6407_v42 }
 0xb7d   :  { %v6820_v18 = vpop.f32.mrb[18].mxu0  ;;  %v1868_v53 = vadd.f32 %v1867_v23, %v6371_v13 }
 0xb7e   :  { %v6822_v17 = vpop.f32.mrb[19].mxu0 }
 0xb85   :  { %v6824_v19 = vpop.f32.mrb[20].mxu0 }
 0xb86   :  { %v6826_v24 = vpop.f32.mrb[21].mxu0 }
 0xb87   :  { %v6828_v25 = vpop.f32.mrb[22].mxu0 }
 0xb88   :  { %v6830_v28 = vpop.f32.mrb[23].mxu0 }
 0xb94   :  { %v6832_v29 = vpop.f32.mrb[24].mxu0 }
 0xb95   :  { %v6834_v49 = vpop.f32.mrb[25].mxu0 }
 0xb96   :  { %v6836_v32 = vpop.f32.mrb[26].mxu0 }
 0xb97   :  { %v6838_v34 = vpop.f32.mrb[27].mxu0 }
 0xb9c   :  { %v6840_v38 = vpop.f32.mrb[28].mxu0 }
 0xb9d   :  { %v6842_v5 = vpop.f32.mrb[29].mxu0 }
 0xb9e   :  { %v6844_v43 = vpop.f32.mrb[30].mxu0 }
 0xb9f   :  { %v6846_v44 = vpop.f32.mrb[31].mxu0 }
 0xba4   :  { %v6848_v45 = vpop.f32.mrb[32].mxu0 }
 0xba5   :  { %v6850_v30 = vpop.f32.mrb[33].mxu0 }
 0xba6   :  { %v6852_v47 = vpop.f32.mrb[34].mxu0 }
 0xba7   :  { %v6854_v55 = vpop.f32.mrb[35].mxu0 }
 0xbac   :  { %v6856_v48 = vpop.f32.mrb[36].mxu0 }
 0xbad   :  { %v6858_v14 = vpop.f32.mrb[37].mxu0 }
 0xbae   :  { %v6860_v10 = vpop.f32.mrb[38].mxu0 }
 0xbaf   :  { %v6862_v56 = vpop.f32.mrb[39].mxu0 }
 0xbe7   :  { %v2337_v54 = vpop.f32.mrb[40].mxu0 }
 0xbe8   :  { %v2344_v26 = vadd.f32 %v2337_v54, %v1866_v57  ;;  %v2339_v33 = vpop.f32.mrb[41].mxu0  ;;  %v1870_v54 = vadd.f32 %v6820_v18, %v6407_v42 }
 0xbe9   :  { %v2345_v31 = vadd.f32 %v2339_v33, %v1868_v53  ;;  %v2341_v37 = vpop.f32.mrb[42].mxu0 }
 0xbea   :  { %v2342_v58 = vpop.f32.mrb[43].mxu0  ;;  %v5165_v2 = vmul.f32 -1.442695, %v2344_v26  ;;  %v1872_v26 = vadd.f32 %v6822_v17, %v6371_v13 }
 0xbeb   :  { %5755 = vtanh.f32 %v2345_v31  ;;  %v5166_v15 = vmul.f32 -1.442695, %v2345_v31 }
 0xbec   :  { %5757 = vpow2.f32 %v5165_v2 }
 0xbf5   :  { %v5756_v39 = vpop.eup %5755 }
 0xbf6   :  { %2361 = vrot.lane.b32.xlu0 %v5756_v39, %s6073_s7  ;;  %v5758_v7 = vpop.eup %5757 }
 0xbf7   :  { %v2352_v41 = vadd.f32 1.0, %v5758_v7 }
 0xbf9   :  { %5759 = vrcp.f32 %v2352_v41 }
 0xc03   :  { %v5760_v36 = vpop.eup %5759 }
 0xc04   :  { %v2359_v6 = vmul.f32 %v5760_v36, %v6751_v51 }
 0xc68   :  { %v2362_v8 = vpop.permute.xlu0 %2361 }
 0xc69   :  { %v2364_v11 = vmul.f32 %v5760_v36, %v2362_v8 }
 0xc6b   :  { %2366 = vrot.lane.b32.xlu1 %v2364_v11, %s6073_s7 }
 0xcdd   :  { %v2367_v12 = vpop.permute.xlu1 %2366 }
 0xcde   :  { %v2369_v16 = vadd.f32 %v2367_v12, %v2359_v6 }
 0xce0   :  { %5761 = vtanh.f32 %v2369_v16 }
 0xce1   :  { %5763 = vpow2.f32 %v5166_v15  ;;  %v6902_v15 = vld [vmem:[#allocation7 + $0x44] ss:$8 sps:$4 sm:$0xff]  }
 0xcea   :  { %v5762_v50 = vpop.eup %5761 }
 0xceb   :  { %2372 = vrot.lane.b32.xlu0 %v5762_v50, %s6073_s7  ;;  %v5764_v21 = vpop.eup %5763 }
 0xcec   :  { %v2353_v27 = vadd.f32 1.0, %v5764_v21  ;;  %v6905_v21 = vld [vmem:[#allocation7 + $0x40] ss:$8 sps:$4 sm:$0xff]  }
 0xcee   :  { %5765 = vrcp.f32 %v2353_v27  ;;  %v6908_v27 = vld [vmem:[#allocation7 + $0x54] ss:$8 sps:$4 sm:$0xff]  }
 0xcf8   :  { %v5766_v23 = vpop.eup %5765 }
 0xd5d   :  { %v2373_v57 = vpop.permute.xlu0 %2372 }
 0xd5e   :  { %v6870_v53 = vmul.f32 %v5766_v23, %v2373_v57  ;;  %v6911_v23 = vld [vmem:[#allocation7 + $0x50] ss:$8 sps:$4 sm:$0xff]   ;;  %v6914_v57 = vld [vmem:[#allocation7 + $0x64] ss:$8 sps:$4 sm:$0xff]  }
 0xd60   :  { %2376 = vst.msk [vmem:[#allocation3 + $0x20] sm:$0xff] %vm952_vm2, %v6870_v53  ;;  %v2382_v51 = vpack.c.bf16 %v6870_v53, %v6870_v53 }
 0xd62   :  { %5167 = vmatmul.mubr.msk.bf16.vlgmr.msra.gmra.mrb[20].mxu1 %vm1320_vm12, %v2382_v51  ;;  %v6917_v51 = vld [vmem:[#allocation7 + $0x60] ss:$8 sps:$4 sm:$0xff]  }
 0xd63   :  { %2559 = vmatpush1.bf16.msra.mxu1 %v6499_v40  ;;  %2590 = vmatprep.mubr.bf16.mxu1 %v6065_v0 }
 0xd64   :  { %2560 = vmatprep.subr.bf16.mxu1 %v6502_v60 }
 0xd67   :  { %2561 = vmatpush1.bf16.msra.mxu1 %v6506_v61 }
 0xd68   :  { %2562 = vmatprep.subr.bf16.mxu1 %v6509_v62 }
 0xd6b   :  { %2563 = vmatpush1.bf16.msra.mxu1 %v6514_v63 }
 0xd6c   :  { %2564 = vmatprep.subr.bf16.mxu1 %v6517_v1 }
 0xd6f   :  { %2565 = vmatpush1.bf16.msra.mxu1 %v6522_v4 }
 0xd70   :  { %2728 = vmatprep.subr.bf16.mxu1 %v6492_v59 }
 0xe35   :  { %v2422_v33 = vpop.f32.mrb[20].mxu1 }
 0xe36   :  { %v2429_v60 = vadd.f32 %v2422_v33, %v1870_v54  ;;  %v2424_v31 = vpop.f32.mrb[21].mxu1  ;;  %v6920_v54 = vld [vmem:[#allocation7 + $0x34] ss:$8 sps:$4 sm:$0xff]   ;;  %v1878_v33 = vadd.f32 %v6826_v24, %v6371_v13 }
 0xe37   :  { %v2430_v61 = vadd.f32 %v2424_v31, %v1872_v26  ;;  %v2426_v37 = vpop.f32.mrb[22].mxu1  ;;  %v1876_v26 = vadd.f32 %v6824_v19, %v6407_v42 }
 0xe38   :  { %v2427_v62 = vpop.f32.mrb[23].mxu1  ;;  %v5168_v1 = vmul.f32 -1.442695, %v2429_v60 }
 0xe39   :  { %5767 = vtanh.f32 %v2430_v61  ;;  %v5169_v36 = vmul.f32 -1.442695, %v2430_v61 }
 0xe3a   :  { %5769 = vpow2.f32 %v5168_v1 }
 0xe43   :  { %v5768_v63 = vpop.eup %5767 }
 0xe44   :  { %2446 = vrot.lane.b32.xlu1 %v5768_v63, %s6073_s7  ;;  %v5770_v4 = vpop.eup %5769 }
 0xe45   :  { %v2437_v59 = vadd.f32 1.0, %v5770_v4 }
 0xe47   :  { %5771 = vrcp.f32 %v2437_v59 }
 0xe51   :  { %v5772_v58 = vpop.eup %5771 }
 0xe52   :  { %v2444_v17 = vmul.f32 %v5772_v58, %v2369_v16 }
 0xeb6   :  { %v2447_v18 = vpop.permute.xlu1 %2446 }
 0xeb7   :  { %v2449_v39 = vmul.f32 %v5772_v58, %v2447_v18 }
 0xeb9   :  { %2451 = vrot.lane.b32.xlu0 %v2449_v39, %s6073_s7 }
 0xf2b   :  { %v2452_v2 = vpop.permute.xlu0 %2451 }
 0xf2c   :  { %v2454_v7 = vadd.f32 %v2452_v2, %v2444_v17 }
 0xf2e   :  { %5773 = vtanh.f32 %v2454_v7 }
 0xf2f   :  { %5775 = vpow2.f32 %v5169_v36 }
 0xf38   :  { %v5774_v41 = vpop.eup %5773 }
 0xf39   :  { %2457 = vrot.lane.b32.xlu1 %v5774_v41, %s6073_s7  ;;  %v5776_v8 = vpop.eup %5775 }
 0xf3a   :  { %v2438_v11 = vadd.f32 1.0, %v5776_v8 }
 0xf3c   :  { %5777 = vrcp.f32 %v2438_v11 }
 0xf46   :  { %v5778_v6 = vpop.eup %5777 }
 0xfab   :  { %v2458_v12 = vpop.permute.xlu1 %2457 }
 0xfac   :  { %v6893_v50 = vmul.f32 %v5778_v6, %v2458_v12 }
 0xfae   :  { %2461 = vst.msk [vmem:[#allocation3 + $0x28] sm:$0xff] %vm952_vm2, %v6893_v50  ;;  %v2467_v16 = vpack.c.bf16 %v6893_v50, %v6893_v50 }
 0xfb0   :  { %5170 = vmatmul.mubr.msk.bf16.vlgmr.msra.gmra.mrb[44].mxu0 %vm1320_vm12, %v2467_v16 }
 0xfb1   :  { %2644 = vmatpush1.bf16.msra.mxu0 %v6499_v40  ;;  %2675 = vmatprep.mubr.bf16.mxu0 %v6065_v0 }
 0xfb2   :  { %2645 = vmatprep.subr.bf16.mxu0 %v6902_v15 }
 0xfb5   :  { %2646 = vmatpush1.bf16.msra.mxu0 %v6905_v21 }
 0xfb6   :  { %2647 = vmatprep.subr.bf16.mxu0 %v6908_v27 }
 0xfb9   :  { %2648 = vmatpush1.bf16.msra.mxu0 %v6911_v23 }
 0xfba   :  { %2649 = vmatprep.subr.bf16.mxu0 %v6914_v57 }
 0xfbd   :  { %2650 = vmatpush1.bf16.msra.mxu0 %v6917_v51 }
 0xfbe   :  { %2813 = vmatprep.subr.bf16.mxu0 %v6920_v54 }
0x1083   :  { %v2507_v60 = vpop.f32.mrb[44].mxu0 }
0x1084   :  { %v2514_v31 = vadd.f32 %v2507_v60, %v1876_v26  ;;  %v2509_v61 = vpop.f32.mrb[45].mxu0  ;;  %v1880_v26 = vadd.f32 %v6828_v25, %v6407_v42 }
0x1085   :  { %v2515_v37 = vadd.f32 %v2509_v61, %v1878_v33  ;;  %v2511_v62 = vpop.f32.mrb[46].mxu0  ;;  %v1882_v33 = vadd.f32 %v6830_v28, %v6371_v13 }
0x1086   :  { %v2512_v63 = vpop.f32.mrb[47].mxu0  ;;  %v5171_v4 = vmul.f32 -1.442695, %v2514_v31 }
0x1087   :  { %5779 = vtanh.f32 %v2515_v37  ;;  %v5172_v36 = vmul.f32 -1.442695, %v2515_v37 }
0x1088   :  { %5781 = vpow2.f32 %v5171_v4 }
0x1091   :  { %v5780_v1 = vpop.eup %5779 }
0x1092   :  { %2531 = vrot.lane.b32.xlu0 %v5780_v1, %s6073_s7  ;;  %v5782_v59 = vpop.eup %5781 }
0x1093   :  { %v2522_v58 = vadd.f32 1.0, %v5782_v59 }
0x1095   :  { %5783 = vrcp.f32 %v2522_v58 }
0x109f   :  { %v5784_v18 = vpop.eup %5783 }
0x10a0   :  { %v2529_v24 = vmul.f32 %v5784_v18, %v2454_v7 }
0x1104   :  { %v2532_v19 = vpop.permute.xlu0 %2531 }
0x1105   :  { %v2534_v39 = vmul.f32 %v5784_v18, %v2532_v19 }
0x1107   :  { %2536 = vrot.lane.b32.xlu1 %v2534_v39, %s6073_s7 }
0x1179   :  { %v2537_v17 = vpop.permute.xlu1 %2536 }
0x117a   :  { %v2539_v2 = vadd.f32 %v2537_v17, %v2529_v24 }
0x117c   :  { %5785 = vtanh.f32 %v2539_v2 }
0x117d   :  { %5787 = vpow2.f32 %v5172_v36 }
0x1186   :  { %v5786_v41 = vpop.eup %5785 }
0x1187   :  { %2542 = vrot.lane.b32.xlu0 %v5786_v41, %s6073_s7  ;;  %v5788_v8 = vpop.eup %5787 }
0x1188   :  { %v2523_v11 = vadd.f32 1.0, %v5788_v8 }
0x118a   :  { %5789 = vrcp.f32 %v2523_v11 }
0x1194   :  { %v5790_v6 = vpop.eup %5789 }
0x11f9   :  { %v2543_v12 = vpop.permute.xlu0 %2542 }
0x11fa   :  { %v6930_v16 = vmul.f32 %v5790_v6, %v2543_v12 }
0x11fc   :  { %2546 = vst.msk [vmem:[#allocation3 + $0x30] sm:$0xff] %vm952_vm2, %v6930_v16  ;;  %v2552_v7 = vpack.c.bf16 %v6930_v16, %v6930_v16 }
0x11fe   :  { %5173 = vmatmul.mubr.msk.bf16.vlgmr.msra.gmra.mrb[24].mxu1 %vm1320_vm12, %v2552_v7  ;;  %v1886_v7 = vadd.f32 %v6832_v29, %v6407_v42 }
0x11ff   :  { %2729 = vmatpush1.bf16.msra.mxu1 %v6499_v40  ;;  %2760 = vmatprep.mubr.bf16.mxu1 %v6065_v0 }
0x1200   :  { %2730 = vmatprep.subr.bf16.mxu1 %v6902_v15 }
0x1203   :  { %2731 = vmatpush1.bf16.msra.mxu1 %v6905_v21 }
0x1204   :  { %2732 = vmatprep.subr.bf16.mxu1 %v6908_v27 }
0x1207   :  { %2733 = vmatpush1.bf16.msra.mxu1 %v6911_v23 }
0x1208   :  { %2734 = vmatprep.subr.bf16.mxu1 %v6914_v57 }
0x120b   :  { %2735 = vmatpush1.bf16.msra.mxu1 %v6917_v51 }
0x120c   :  { %2898 = vmatprep.subr.bf16.mxu1 %v6920_v54 }
0x12d1   :  { %v2592_v60 = vpop.f32.mrb[24].mxu1 }
0x12d2   :  { %v2599_v31 = vadd.f32 %v2592_v60, %v1880_v26  ;;  %v2594_v61 = vpop.f32.mrb[25].mxu1  ;;  %v1888_v26 = vadd.f32 %v6834_v49, %v6371_v13 }
0x12d3   :  { %v2600_v37 = vadd.f32 %v2594_v61, %v1882_v33  ;;  %v2596_v62 = vpop.f32.mrb[26].mxu1 }
0x12d4   :  { %v2597_v63 = vpop.f32.mrb[27].mxu1  ;;  %v5174_v4 = vmul.f32 -1.442695, %v2599_v31 }
0x12d5   :  { %5791 = vtanh.f32 %v2600_v37  ;;  %v5175_v41 = vmul.f32 -1.442695, %v2600_v37 }
0x12d6   :  { %5793 = vpow2.f32 %v5174_v4 }
0x12df   :  { %v5792_v1 = vpop.eup %5791 }
0x12e0   :  { %2616 = vrot.lane.b32.xlu1 %v5792_v1, %s6073_s7  ;;  %v5794_v59 = vpop.eup %5793 }
0x12e1   :  { %v2607_v58 = vadd.f32 1.0, %v5794_v59 }
0x12e3   :  { %5795 = vrcp.f32 %v2607_v58 }
0x12ed   :  { %v5796_v18 = vpop.eup %5795 }
0x12ee   :  { %v2614_v28 = vmul.f32 %v5796_v18, %v2539_v2 }
0x1352   :  { %v2617_v25 = vpop.permute.xlu1 %2616 }
0x1353   :  { %v2619_v19 = vmul.f32 %v5796_v18, %v2617_v25 }
0x1355   :  { %2621 = vrot.lane.b32.xlu0 %v2619_v19, %s6073_s7 }
0x13c7   :  { %v2622_v39 = vpop.permute.xlu0 %2621 }
0x13c8   :  { %v2624_v24 = vadd.f32 %v2622_v39, %v2614_v28 }
0x13ca   :  { %5797 = vtanh.f32 %v2624_v24 }
0x13cb   :  { %5799 = vpow2.f32 %v5175_v41 }
0x13d4   :  { %v5798_v17 = vpop.eup %5797 }
0x13d5   :  { %2627 = vrot.lane.b32.xlu1 %v5798_v17, %s6073_s7  ;;  %v5800_v36 = vpop.eup %5799 }
0x13d6   :  { %v2608_v8 = vadd.f32 1.0, %v5800_v36 }
0x13d8   :  { %5801 = vrcp.f32 %v2608_v8 }
0x13e2   :  { %v5802_v11 = vpop.eup %5801 }
0x1447   :  { %v2628_v6 = vpop.permute.xlu1 %2627 }
0x1448   :  { %v6953_v12 = vmul.f32 %v5802_v11, %v2628_v6  ;;  %v1890_v6 = vadd.f32 %v6836_v32, %v6407_v42 }
0x144a   :  { %2631 = vst.msk [vmem:[#allocation3 + $0x38] sm:$0xff] %vm952_vm2, %v6953_v12  ;;  %v2637_v2 = vpack.c.bf16 %v6953_v12, %v6953_v12 }
0x144c   :  { %5176 = vmatmul.mubr.msk.bf16.vlgmr.msra.gmra.mrb[48].mxu0 %vm1320_vm12, %v2637_v2  ;;  %v1892_v2 = vadd.f32 %v6838_v34, %v6371_v13 }
0x144d   :  { %2814 = vmatpush1.bf16.msra.mxu0 %v6499_v40  ;;  %2845 = vmatprep.mubr.bf16.mxu0 %v6065_v0 }
0x144e   :  { %2815 = vmatprep.subr.bf16.mxu0 %v6902_v15 }
0x1451   :  { %2816 = vmatpush1.bf16.msra.mxu0 %v6905_v21 }
0x1452   :  { %2817 = vmatprep.subr.bf16.mxu0 %v6908_v27 }
0x1455   :  { %2818 = vmatpush1.bf16.msra.mxu0 %v6911_v23 }
0x1456   :  { %2819 = vmatprep.subr.bf16.mxu0 %v6914_v57 }
0x1459   :  { %2820 = vmatpush1.bf16.msra.mxu0 %v6917_v51 }
0x145a   :  { %2983 = vmatprep.subr.bf16.mxu0 %v6920_v54 }
0x151f   :  { %v2677_v33 = vpop.f32.mrb[48].mxu0 }
0x1520   :  { %v2684_v60 = vadd.f32 %v2677_v33, %v1886_v7  ;;  %v2679_v31 = vpop.f32.mrb[49].mxu0 }
0x1521   :  { %v2685_v61 = vadd.f32 %v2679_v31, %v1888_v26  ;;  %v2681_v37 = vpop.f32.mrb[50].mxu0 }
0x1522   :  { %v2682_v62 = vpop.f32.mrb[51].mxu0  ;;  %v5177_v1 = vmul.f32 -1.442695, %v2684_v60 }
0x1523   :  { %5803 = vtanh.f32 %v2685_v61  ;;  %v5178_v39 = vmul.f32 -1.442695, %v2685_v61 }
0x1524   :  { %5805 = vpow2.f32 %v5177_v1 }
0x152d   :  { %v5804_v63 = vpop.eup %5803 }
0x152e   :  { %2701 = vrot.lane.b32.xlu0 %v5804_v63, %s6073_s7  ;;  %v5806_v4 = vpop.eup %5805 }
0x152f   :  { %v2692_v59 = vadd.f32 1.0, %v5806_v4 }
0x1531   :  { %5807 = vrcp.f32 %v2692_v59 }
0x153b   :  { %v5808_v58 = vpop.eup %5807 }
0x153c   :  { %v2699_v49 = vmul.f32 %v5808_v58, %v2624_v24 }
0x15a0   :  { %v2702_v29 = vpop.permute.xlu0 %2701 }
0x15a1   :  { %v2704_v18 = vmul.f32 %v5808_v58, %v2702_v29 }
0x15a3   :  { %2706 = vrot.lane.b32.xlu1 %v2704_v18, %s6073_s7 }
0x1615   :  { %v2707_v25 = vpop.permute.xlu1 %2706 }
0x1616   :  { %v2709_v19 = vadd.f32 %v2707_v25, %v2699_v49 }
0x1618   :  { %5809 = vtanh.f32 %v2709_v19 }
0x1619   :  { %5811 = vpow2.f32 %v5178_v39 }
0x1622   :  { %v5810_v28 = vpop.eup %5809 }
0x1623   :  { %2712 = vrot.lane.b32.xlu0 %v5810_v28, %s6073_s7  ;;  %v5812_v17 = vpop.eup %5811 }
0x1624   :  { %v2693_v41 = vadd.f32 1.0, %v5812_v17 }
0x1626   :  { %5813 = vrcp.f32 %v2693_v41 }
0x1630   :  { %v5814_v36 = vpop.eup %5813 }
0x1695   :  { %v2713_v8 = vpop.permute.xlu0 %2712 }
0x1696   :  { %v6976_v11 = vmul.f32 %v5814_v36, %v2713_v8  ;;  %v1896_v36 = vadd.f32 %v6840_v38, %v6407_v42  ;;  %v1898_v8 = vadd.f32 %v6842_v5, %v6371_v13 }
0x1698   :  { %2716 = vst.msk [vmem:[#allocation3 + $0x40] sm:$0xff] %vm952_vm2, %v6976_v11  ;;  %v2722_v24 = vpack.c.bf16 %v6976_v11, %v6976_v11 }
0x169a   :  { %5179 = vmatmul.mubr.msk.bf16.vlgmr.msra.gmra.mrb[28].mxu1 %vm1320_vm12, %v2722_v24 }
0x169b   :  { %2899 = vmatpush1.bf16.msra.mxu1 %v6499_v40  ;;  %2930 = vmatprep.mubr.bf16.mxu1 %v6065_v0 }
0x169c   :  { %2900 = vmatprep.subr.bf16.mxu1 %v6902_v15 }
0x169f   :  { %2901 = vmatpush1.bf16.msra.mxu1 %v6905_v21 }
0x16a0   :  { %2902 = vmatprep.subr.bf16.mxu1 %v6908_v27 }
0x16a3   :  { %2903 = vmatpush1.bf16.msra.mxu1 %v6911_v23 }
0x16a4   :  { %2904 = vmatprep.subr.bf16.mxu1 %v6914_v57 }
0x16a7   :  { %2905 = vmatpush1.bf16.msra.mxu1 %v6917_v51 }
0x16a8   :  { %3068 = vmatprep.subr.bf16.mxu1 %v6920_v54 }
0x176d   :  { %v2762_v7 = vpop.f32.mrb[28].mxu1 }
0x176e   :  { %v2769_v26 = vadd.f32 %v2762_v7, %v1890_v6  ;;  %v2764_v33 = vpop.f32.mrb[29].mxu1 }
0x176f   :  { %v2770_v60 = vadd.f32 %v2764_v33, %v1892_v2  ;;  %v2766_v31 = vpop.f32.mrb[30].mxu1 }
0x1770   :  { %v2767_v61 = vpop.f32.mrb[31].mxu1  ;;  %v5180_v62 = vmul.f32 -1.442695, %v2769_v26 }
0x1771   :  { %5815 = vtanh.f32 %v2770_v60  ;;  %v5181_v49 = vmul.f32 -1.442695, %v2770_v60 }
0x1772   :  { %5817 = vpow2.f32 %v5180_v62 }
0x177b   :  { %v5816_v37 = vpop.eup %5815 }
0x177c   :  { %2786 = vrot.lane.b32.xlu1 %v5816_v37, %s6073_s7  ;;  %v5818_v63 = vpop.eup %5817 }
0x177d   :  { %v2777_v1 = vadd.f32 1.0, %v5818_v63 }
0x177f   :  { %5819 = vrcp.f32 %v2777_v1 }
0x1789   :  { %v5820_v4 = vpop.eup %5819 }
0x178a   :  { %v2784_v34 = vmul.f32 %v5820_v4, %v2709_v19 }
0x17ee   :  { %v2787_v32 = vpop.permute.xlu1 %2786 }
0x17ef   :  { %v2789_v59 = vmul.f32 %v5820_v4, %v2787_v32 }
0x17f1   :  { %2791 = vrot.lane.b32.xlu0 %v2789_v59, %s6073_s7 }
0x1863   :  { %v2792_v58 = vpop.permute.xlu0 %2791 }
0x1864   :  { %v2794_v29 = vadd.f32 %v2792_v58, %v2784_v34 }
0x1866   :  { %5821 = vtanh.f32 %v2794_v29 }
0x1867   :  { %5823 = vpow2.f32 %v5181_v49 }
0x1870   :  { %v5822_v18 = vpop.eup %5821 }
0x1871   :  { %2797 = vrot.lane.b32.xlu1 %v5822_v18, %s6073_s7  ;;  %v5824_v25 = vpop.eup %5823 }
0x1872   :  { %v2778_v28 = vadd.f32 1.0, %v5824_v25 }
0x1874   :  { %5825 = vrcp.f32 %v2778_v28  ;;  %v1900_v28 = vadd.f32 %v6844_v43, %v6407_v42 }
0x187e   :  { %v5826_v39 = vpop.eup %5825 }
0x18e3   :  { %v2798_v17 = vpop.permute.xlu1 %2797 }
0x18e4   :  { %v6999_v41 = vmul.f32 %v5826_v39, %v2798_v17  ;;  %v1902_v39 = vadd.f32 %v6846_v44, %v6371_v13 }
0x18e6   :  { %2801 = vst.msk [vmem:[#allocation3 + $0x48] sm:$0xff] %vm952_vm2, %v6999_v41  ;;  %v2807_v19 = vpack.c.bf16 %v6999_v41, %v6999_v41 }
0x18e8   :  { %5182 = vmatmul.mubr.msk.bf16.vlgmr.msra.gmra.mrb[52].mxu0 %vm1320_vm12, %v2807_v19 }
0x18e9   :  { %2984 = vmatpush1.bf16.msra.mxu0 %v6499_v40  ;;  %3015 = vmatprep.mubr.bf16.mxu0 %v6065_v0 }
0x18ea   :  { %2985 = vmatprep.subr.bf16.mxu0 %v6902_v15 }
0x18ed   :  { %2986 = vmatpush1.bf16.msra.mxu0 %v6905_v21 }
0x18ee   :  { %2987 = vmatprep.subr.bf16.mxu0 %v6908_v27 }
0x18f1   :  { %2988 = vmatpush1.bf16.msra.mxu0 %v6911_v23 }
0x18f2   :  { %2989 = vmatprep.subr.bf16.mxu0 %v6914_v57 }
0x18f5   :  { %2990 = vmatpush1.bf16.msra.mxu0 %v6917_v51 }
0x18f6   :  { %3153 = vmatprep.subr.bf16.mxu0 %v6920_v54 }
0x19bb   :  { %v2847_v24 = vpop.f32.mrb[52].mxu0 }
0x19bc   :  { %v2854_v6 = vadd.f32 %v2847_v24, %v1896_v36  ;;  %v2849_v2 = vpop.f32.mrb[53].mxu0 }
0x19bd   :  { %v2855_v7 = vadd.f32 %v2849_v2, %v1898_v8  ;;  %v2851_v26 = vpop.f32.mrb[54].mxu0 }
0x19be   :  { %v2852_v33 = vpop.f32.mrb[55].mxu0  ;;  %v5183_v31 = vmul.f32 -1.442695, %v2854_v6 }
0x19bf   :  { %5827 = vtanh.f32 %v2855_v7  ;;  %v5184_v59 = vmul.f32 -1.442695, %v2855_v7 }
0x19c0   :  { %5829 = vpow2.f32 %v5183_v31 }
0x19c9   :  { %v5828_v60 = vpop.eup %5827 }
0x19ca   :  { %2871 = vrot.lane.b32.xlu0 %v5828_v60, %s6073_s7  ;;  %v5830_v61 = vpop.eup %5829 }
0x19cb   :  { %v2862_v37 = vadd.f32 1.0, %v5830_v61 }
0x19cd   :  { %5831 = vrcp.f32 %v2862_v37 }
0x19d7   :  { %v5832_v62 = vpop.eup %5831 }
0x19d8   :  { %v2869_v5 = vmul.f32 %v5832_v62, %v2794_v29 }
0x1a3c   :  { %v2872_v38 = vpop.permute.xlu0 %2871 }
0x1a3d   :  { %v2874_v63 = vmul.f32 %v5832_v62, %v2872_v38 }
0x1a3f   :  { %2876 = vrot.lane.b32.xlu1 %v2874_v63, %s6073_s7 }
0x1ab1   :  { %v2877_v1 = vpop.permute.xlu1 %2876 }
0x1ab2   :  { %v2879_v4 = vadd.f32 %v2877_v1, %v2869_v5 }
0x1ab4   :  { %5833 = vtanh.f32 %v2879_v4 }
0x1ab5   :  { %5835 = vpow2.f32 %v5184_v59  ;;  %v1906_v59 = vadd.f32 %v6848_v45, %v6407_v42 }
0x1abe   :  { %v5834_v32 = vpop.eup %5833 }
0x1abf   :  { %2882 = vrot.lane.b32.xlu0 %v5834_v32, %s6073_s7  ;;  %v5836_v34 = vpop.eup %5835 }
0x1ac0   :  { %v2863_v58 = vadd.f32 1.0, %v5836_v34  ;;  %v1908_v34 = vadd.f32 %v6850_v30, %v6371_v13 }
0x1ac2   :  { %5837 = vrcp.f32 %v2863_v58 }
0x1acc   :  { %v5838_v18 = vpop.eup %5837 }
0x1b31   :  { %v2883_v49 = vpop.permute.xlu0 %2882 }
0x1b32   :  { %v7022_v25 = vmul.f32 %v5838_v18, %v2883_v49 }
0x1b34   :  { %2886 = vst.msk [vmem:[#allocation3 + $0x50] sm:$0xff] %vm952_vm2, %v7022_v25  ;;  %v2892_v29 = vpack.c.bf16 %v7022_v25, %v7022_v25 }
0x1b36   :  { %5185 = vmatmul.mubr.msk.bf16.vlgmr.msra.gmra.mrb[32].mxu1 %vm1320_vm12, %v2892_v29 }
0x1b37   :  { %3069 = vmatpush1.bf16.msra.mxu1 %v6499_v40  ;;  %3100 = vmatprep.mubr.bf16.mxu1 %v6065_v0 }
0x1b38   :  { %3070 = vmatprep.subr.bf16.mxu1 %v6902_v15 }
0x1b3b   :  { %3071 = vmatpush1.bf16.msra.mxu1 %v6905_v21 }
0x1b3c   :  { %3072 = vmatprep.subr.bf16.mxu1 %v6908_v27 }
0x1b3f   :  { %3073 = vmatpush1.bf16.msra.mxu1 %v6911_v23 }
0x1b40   :  { %3074 = vmatprep.subr.bf16.mxu1 %v6914_v57 }
0x1b43   :  { %3075 = vmatpush1.bf16.msra.mxu1 %v6917_v51 }
0x1b44   :  { %3238 = vmatprep.subr.bf16.mxu1 %v6920_v54 }
0x1c09   :  { %v2932_v17 = vpop.f32.mrb[32].mxu1 }
0x1c0a   :  { %v2939_v19 = vadd.f32 %v2932_v17, %v1900_v28  ;;  %v2934_v36 = vpop.f32.mrb[33].mxu1 }
0x1c0b   :  { %v2940_v8 = vadd.f32 %v2934_v36, %v1902_v39  ;;  %v2936_v24 = vpop.f32.mrb[34].mxu1 }
0x1c0c   :  { %v2937_v6 = vpop.f32.mrb[35].mxu1  ;;  %v5186_v7 = vmul.f32 -1.442695, %v2939_v19 }
0x1c0d   :  { %5839 = vtanh.f32 %v2940_v8  ;;  %v5187_v62 = vmul.f32 -1.442695, %v2940_v8 }
0x1c0e   :  { %5841 = vpow2.f32 %v5186_v7 }
0x1c17   :  { %v5840_v2 = vpop.eup %5839 }
0x1c18   :  { %2956 = vrot.lane.b32.xlu1 %v5840_v2, %s6073_s7  ;;  %v5842_v26 = vpop.eup %5841 }
0x1c19   :  { %v2947_v54 = vadd.f32 1.0, %v5842_v26 }
0x1c1b   :  { %5843 = vrcp.f32 %v2947_v54 }
0x1c25   :  { %v5844_v33 = vpop.eup %5843 }
0x1c26   :  { %v2954_v44 = vmul.f32 %v5844_v33, %v2879_v4 }
0x1c8a   :  { %v2957_v43 = vpop.permute.xlu1 %2956 }
0x1c8b   :  { %v2959_v60 = vmul.f32 %v5844_v33, %v2957_v43 }
0x1c8d   :  { %2961 = vrot.lane.b32.xlu0 %v2959_v60, %s6073_s7 }
0x1cff   :  { %v2962_v31 = vpop.permute.xlu0 %2961 }
0x1d00   :  { %v2964_v61 = vadd.f32 %v2962_v31, %v2954_v44 }
0x1d02   :  { %5845 = vtanh.f32 %v2964_v61 }
0x1d03   :  { %5847 = vpow2.f32 %v5187_v62 }
0x1d0c   :  { %v5846_v37 = vpop.eup %5845 }
0x1d0d   :  { %2967 = vrot.lane.b32.xlu1 %v5846_v37, %s6073_s7  ;;  %v5848_v38 = vpop.eup %5847  ;;  %v1910_v37 = vadd.f32 %v6852_v47, %v6407_v42 }
0x1d0e   :  { %v2948_v63 = vadd.f32 1.0, %v5848_v38 }
0x1d10   :  { %5849 = vrcp.f32 %v2948_v63 }
0x1d1a   :  { %v5850_v5 = vpop.eup %5849 }
0x1d7f   :  { %v2968_v1 = vpop.permute.xlu1 %2967 }
0x1d80   :  { %v7045_v32 = vmul.f32 %v5850_v5, %v2968_v1 }
0x1d82   :  { %2971 = vst.msk [vmem:[#allocation3 + $0x58] sm:$0xff] %vm952_vm2, %v7045_v32  ;;  %v2977_v4 = vpack.c.bf16 %v7045_v32, %v7045_v32 }
0x1d84   :  { %5188 = vmatmul.mubr.msk.bf16.vlgmr.msra.gmra.mrb[56].mxu0 %vm1320_vm12, %v2977_v4 }
0x1d85   :  { %3154 = vmatpush1.bf16.msra.mxu0 %v6499_v40  ;;  %3185 = vmatprep.mubr.bf16.mxu0 %v6065_v0 }
0x1d86   :  { %3155 = vmatprep.subr.bf16.mxu0 %v6902_v15 }
0x1d89   :  { %3156 = vmatpush1.bf16.msra.mxu0 %v6905_v21 }
0x1d8a   :  { %3157 = vmatprep.subr.bf16.mxu0 %v6908_v27 }
0x1d8d   :  { %3158 = vmatpush1.bf16.msra.mxu0 %v6911_v23 }
0x1d8e   :  { %3159 = vmatprep.subr.bf16.mxu0 %v6914_v57 }
0x1d91   :  { %3160 = vmatpush1.bf16.msra.mxu0 %v6917_v51 }
0x1e57   :  { %v3017_v58 = vpop.f32.mrb[56].mxu0 }
0x1e58   :  { %v3024_v18 = vadd.f32 %v3017_v58, %v1906_v59  ;;  %v3019_v49 = vpop.f32.mrb[57].mxu0 }
0x1e59   :  { %v3025_v29 = vadd.f32 %v3019_v49, %v1908_v34  ;;  %v3021_v28 = vpop.f32.mrb[58].mxu0 }
0x1e5a   :  { %v3022_v39 = vpop.f32.mrb[59].mxu0  ;;  %v5189_v19 = vmul.f32 -1.442695, %v3024_v18 }
0x1e5b   :  { %5851 = vtanh.f32 %v3025_v29  ;;  %v5190_v54 = vmul.f32 -1.442695, %v3025_v29 }
0x1e5c   :  { %5853 = vpow2.f32 %v5189_v19  ;;  %v1916_v19 = vadd.f32 %v6856_v48, %v6407_v42 }
0x1e65   :  { %v5852_v17 = vpop.eup %5851 }
0x1e66   :  { %3041 = vrot.lane.b32.xlu0 %v5852_v17, %s6073_s7  ;;  %v5854_v36 = vpop.eup %5853 }
0x1e67   :  { %v3032_v8 = vadd.f32 1.0, %v5854_v36  ;;  %v1918_v36 = vadd.f32 %v6858_v14, %v6371_v13 }
0x1e69   :  { %5855 = vrcp.f32 %v3032_v8 }
0x1e73   :  { %v5856_v24 = vpop.eup %5855 }
0x1e74   :  { %v3039_v30 = vmul.f32 %v5856_v24, %v2964_v61 }
0x1ed8   :  { %v3042_v45 = vpop.permute.xlu0 %3041 }
0x1ed9   :  { %v3044_v6 = vmul.f32 %v5856_v24, %v3042_v45 }
0x1edb   :  { %3046 = vrot.lane.b32.xlu1 %v3044_v6, %s6073_s7 }
0x1f4d   :  { %v3047_v2 = vpop.permute.xlu1 %3046 }
0x1f4e   :  { %v3049_v7 = vadd.f32 %v3047_v2, %v3039_v30 }
0x1f50   :  { %5857 = vtanh.f32 %v3049_v7 }
0x1f51   :  { %5859 = vpow2.f32 %v5190_v54 }
0x1f5a   :  { %v5858_v26 = vpop.eup %5857 }
0x1f5b   :  { %3052 = vrot.lane.b32.xlu0 %v5858_v26, %s6073_s7  ;;  %v5860_v33 = vpop.eup %5859 }
0x1f5c   :  { %v3033_v43 = vadd.f32 1.0, %v5860_v33 }
0x1f5e   :  { %5861 = vrcp.f32 %v3033_v43 }
0x1f68   :  { %v5862_v60 = vpop.eup %5861 }
0x1fcd   :  { %v3053_v44 = vpop.permute.xlu0 %3052 }
0x1fce   :  { %v7067_v31 = vmul.f32 %v5862_v60, %v3053_v44 }
0x1fd0   :  { %3056 = vst.msk [vmem:[#allocation3 + $0x60] sm:$0xff] %vm952_vm2, %v7067_v31  ;;  %v3062_v61 = vpack.c.bf16 %v7067_v31, %v7067_v31 }
0x1fd2   :  { %5191 = vmatmul.mubr.msk.bf16.vlgmr.msra.gmra.mrb[36].mxu1 %vm1320_vm12, %v3062_v61 }
0x1fd3   :  { %3239 = vmatpush1.bf16.msra.mxu1 %v6499_v40  ;;  %3270 = vmatprep.mubr.bf16.mxu1 %v6065_v0  ;;  %v1912_v0 = vadd.f32 %v6854_v55, %v6371_v13 }
0x1fd4   :  { %3240 = vmatprep.subr.bf16.mxu1 %v6902_v15 }
0x1fd7   :  { %3241 = vmatpush1.bf16.msra.mxu1 %v6905_v21 }
0x1fd8   :  { %3242 = vmatprep.subr.bf16.mxu1 %v6908_v27 }
0x1fdb   :  { %3243 = vmatpush1.bf16.msra.mxu1 %v6911_v23 }
0x1fdc   :  { %3244 = vmatprep.subr.bf16.mxu1 %v6914_v57 }
0x1fdf   :  { %3245 = vmatpush1.bf16.msra.mxu1 %v6917_v51 }
0x1fe0   :  { %5382 = vmatprep.subr.bf16.mxu1 %v6066_v9 }
0x20a5   :  { %v3102_v40 = vpop.f32.mrb[36].mxu1 }
0x20a6   :  { %v3109_v15 = vadd.f32 %v3102_v40, %v1910_v37  ;;  %v3104_v62 = vpop.f32.mrb[37].mxu1 }
0x20a7   :  { %v3110_v21 = vadd.f32 %v3104_v62, %v1912_v0  ;;  %v3106_v38 = vpop.f32.mrb[38].mxu1 }
0x20a8   :  { %v3107_v27 = vpop.f32.mrb[39].mxu1  ;;  %v5192_v57 = vmul.f32 -1.442695, %v3109_v15 }
0x20a9   :  { %5863 = vtanh.f32 %v3110_v21  ;;  %v5193_v58 = vmul.f32 -1.442695, %v3110_v21  ;;  %v3687_v21 = vld [vmem:[#allocation7 + $0xb0] sm:$0xf] }
0x20aa   :  { %5865 = vpow2.f32 %v5192_v57 }
0x20b3   :  { %v5864_v23 = vpop.eup %5863 }
0x20b4   :  { %3126 = vrot.lane.b32.xlu1 %v5864_v23, %s6073_s7  ;;  %v5866_v51 = vpop.eup %5865  ;;  %v7105_v23 = vsel %vm639_vm7, %v3687_v21, 0 }
0x20b5   :  { %v3117_v63 = vadd.f32 1.0, %v5866_v51  ;;  %v1920_v51 = vadd.f32 %v6860_v10, %v6407_v42 }
0x20b7   :  { %5867 = vrcp.f32 %v3117_v63  ;;  %v1922_v63 = vadd.f32 %v6862_v56, %v6371_v13 }
0x20c1   :  { %v5868_v5 = vpop.eup %5867 }
0x20c2   :  { %v3124_v55 = vmul.f32 %v5868_v5, %v3049_v7 }
0x2126   :  { %v3127_v47 = vpop.permute.xlu1 %3126 }
0x2127   :  { %v3129_v1 = vmul.f32 %v5868_v5, %v3127_v47 }
0x2129   :  { %3131 = vrot.lane.b32.xlu0 %v3129_v1, %s6073_s7 }
0x219b   :  { %v3132_v4 = vpop.permute.xlu0 %3131 }
0x219c   :  { %v3134_v59 = vadd.f32 %v3132_v4, %v3124_v55 }
0x219e   :  { %5869 = vtanh.f32 %v3134_v59 }
0x219f   :  { %5871 = vpow2.f32 %v5193_v58 }
0x21a8   :  { %v5870_v34 = vpop.eup %5869 }
0x21a9   :  { %3137 = vrot.lane.b32.xlu1 %v5870_v34, %s6073_s7  ;;  %v5872_v18 = vpop.eup %5871 }
0x21aa   :  { %v3118_v49 = vadd.f32 1.0, %v5872_v18 }
0x21ac   :  { %5873 = vrcp.f32 %v3118_v49 }
0x21b6   :  { %v5874_v29 = vpop.eup %5873 }
0x221b   :  { %v3138_v28 = vpop.permute.xlu1 %3137 }
0x221c   :  { %v7090_v39 = vmul.f32 %v5874_v29, %v3138_v28 }
0x221e   :  { %3141 = vst.msk [vmem:[#allocation3 + $0x68] sm:$0xff] %vm952_vm2, %v7090_v39  ;;  %v3147_v17 = vpack.c.bf16 %v7090_v39, %v7090_v39 }
0x2220   :  { %5194 = vmatmul.mubr.msk.bf16.vlgmr.msra.gmra.mrb[60].mxu0 %vm1320_vm12, %v3147_v17 }
0x22f3   :  { %v3187_v8 = vpop.f32.mrb[60].mxu0 }
0x22f4   :  { %v3194_v24 = vadd.f32 %v3187_v8, %v1916_v19  ;;  %v3189_v45 = vpop.f32.mrb[61].mxu0 }
0x22f5   :  { %v3195_v6 = vadd.f32 %v3189_v45, %v1918_v36  ;;  %v3191_v30 = vpop.f32.mrb[62].mxu0 }
0x22f6   :  { %v3192_v2 = vpop.f32.mrb[63].mxu0  ;;  %v5195_v26 = vmul.f32 -1.442695, %v3194_v24 }
0x22f7   :  { %5875 = vtanh.f32 %v3195_v6  ;;  %v5196_v0 = vmul.f32 -1.442695, %v3195_v6  ;;  %v5699_v2 = vld [vmem:[#allocation7 + $0x70] ss:$8 sps:$4 sm:$0xff]  }
0x22f8   :  { %5877 = vpow2.f32 %v5195_v26  ;;  %5358 = vmatprep.subr.bf16.mxu0 %v5699_v2 }
0x22f9   :  { %5359 = vmatpush3.bf16.msra.mxu0 %v5699_v2 }
0x2301   :  { %v5876_v7 = vpop.eup %5875 }
0x2302   :  { %3211 = vrot.lane.b32.xlu0 %v5876_v7, %s6073_s7  ;;  %v5878_v54 = vpop.eup %5877  ;;  %v5700_v7 = vld [vmem:[#allocation7 + $0x80] ss:$8 sps:$4 sm:$0xff]  }
0x2303   :  { %v3202_v33 = vadd.f32 1.0, %v5878_v54  ;;  %5360 = vmatprep.subr.bf16.mxu0 %v5700_v7 }
0x2304   :  { %5361 = vmatpush3.bf16.msra.mxu0 %v5700_v7 }
0x2305   :  { %5879 = vrcp.f32 %v3202_v33 }
0x230f   :  { %v5880_v43 = vpop.eup %5879 }
0x2310   :  { %v3209_v14 = vmul.f32 %v5880_v43, %v3134_v59 }
0x2374   :  { %v3212_v48 = vpop.permute.xlu0 %3211 }
0x2375   :  { %v3214_v60 = vmul.f32 %v5880_v43, %v3212_v48 }
0x2377   :  { %3216 = vrot.lane.b32.xlu1 %v3214_v60, %s6073_s7 }
0x23e9   :  { %v3217_v44 = vpop.permute.xlu1 %3216 }
0x23ea   :  { %v3219_v61 = vadd.f32 %v3217_v44, %v3209_v14 }
0x23ec   :  { %5881 = vtanh.f32 %v3219_v61 }
0x23ed   :  { %5883 = vpow2.f32 %v5196_v0 }
0x23f6   :  { %v5882_v37 = vpop.eup %5881 }
0x23f7   :  { %3222 = vrot.lane.b32.xlu0 %v5882_v37, %s6073_s7  ;;  %v5884_v40 = vpop.eup %5883 }
0x23f8   :  { %v3203_v15 = vadd.f32 1.0, %v5884_v40 }
0x23fa   :  { %5885 = vrcp.f32 %v3203_v15 }
0x2404   :  { %v5886_v62 = vpop.eup %5885 }
0x2469   :  { %v3223_v38 = vpop.permute.xlu0 %3222 }
0x246a   :  { %v3225_v27 = vmul.f32 %v5886_v62, %v3223_v38 }
0x246c   :  { %3226 = vst.msk [vmem:[#allocation3 + $0x70] sm:$0xff] %vm952_vm2, %v3225_v27  ;;  %v3232_v57 = vpack.c.bf16 %v3225_v27, %v3225_v27 }
0x246e   :  { %5197 = vmatmul.mubr.msk.bf16.vlgmr.msra.gmra.mrb[40].mxu1 %vm1320_vm12, %v3232_v57 }
0x246f   :  { %5383 = vmatpush3.bf16.msra.mxu1 %v7105_v23  ;;  %5384 = vmatprep.mubr.msk.bf16.mxu1 %vm6078_vm9, %v6066_v9 }
0x2470   :  { %5388 = vmatprep.subr.bf16.mxu1 %v6066_v9 }
0x2541   :  { %v3272_v5 = vpop.f32.mrb[40].mxu1 }
0x2542   :  { %v3279_v47 = vadd.f32 %v3272_v5, %v1920_v51  ;;  %v3274_v1 = vpop.f32.mrb[41].mxu1 }
0x2543   :  { %v3280_v55 = vadd.f32 %v3274_v1, %v1922_v63  ;;  %v3276_v4 = vpop.f32.mrb[42].mxu1 }
0x2544   :  { %v3277_v59 = vpop.f32.mrb[43].mxu1  ;;  %v5198_v58 = vmul.f32 -1.442695, %v3279_v47 }
0x2545   :  { %5887 = vtanh.f32 %v3280_v55  ;;  %v5199_v36 = vmul.f32 -1.442695, %v3280_v55 }
0x2546   :  { %5889 = vpow2.f32 %v5198_v58 }
0x254f   :  { %v5888_v34 = vpop.eup %5887 }
0x2550   :  { %3296 = vrot.lane.b32.xlu1 %v5888_v34, %s6073_s7  ;;  %v5890_v18 = vpop.eup %5889 }
0x2551   :  { %v3287_v49 = vadd.f32 1.0, %v5890_v18 }
0x2553   :  { %5891 = vrcp.f32 %v3287_v49 }
0x255d   :  { %v5892_v29 = vpop.eup %5891 }
0x255e   :  { %v3294_v13 = vmul.f32 %v5892_v29, %v3219_v61 }
0x25c2   :  { %v3297_v42 = vpop.permute.xlu1 %3296 }
0x25c3   :  { %v3299_v10 = vmul.f32 %v5892_v29, %v3297_v42  ;;  %v3317_v29 = vld [vmem:[#allocation3] sm:$0xff]  ;;  %v3318_v42 = vld [vmem:[#allocation3 + $0x8] sm:$0xff] }
0x25c5   :  { %3301 = vrot.lane.b32.xlu0 %v3299_v10, %s6073_s7 }
0x25c9   :  { %3228 = vrot.lane.b32.xlu0 %v3225_v27, %s6074_s10 }
0x25cd   :  { %3058 = vrot.lane.b32.xlu0 %v7067_v31, %s6074_s10 }
0x25d1   :  { %2888 = vrot.lane.b32.xlu0 %v7022_v25, %s6074_s10 }
0x25d5   :  { %2718 = vrot.lane.b32.xlu0 %v6976_v11, %s6074_s10 }
0x25d9   :  { %2548 = vrot.lane.b32.xlu0 %v6930_v16, %s6074_s10 }
0x25dd   :  { %2378 = vrot.lane.b32.xlu0 %v6870_v53, %s6074_s10 }
0x25e1   :  { %2208 = vrot.lane.b32.xlu0 %v6639_v22, %s6074_s10 }
0x25e5   :  { %1998 = vrot.lane.b32.xlu0 %v6533_v3, %s6074_s10 }
0x2637   :  { %v3302_v56 = vpop.permute.xlu0 %3301 }
0x2638   :  { %v3304_v31 = vadd.f32 %v3302_v56, %v3294_v13 }
0x263a   :  { %5893 = vtanh.f32 %v3304_v31 }
0x263b   :  { %v3229_v25 = vpop.permute.xlu0 %3228  ;;  %5895 = vpow2.f32 %v5199_v36 }
0x263c   :  { %3231 = vst.msk [vmem:[#allocation4 + $0x8] sm:$0xff] %vm952_vm2, %v3229_v25 }
0x263f   :  { %v3059_v11 = vpop.permute.xlu0 %3058 }
0x2640   :  { %3061 = vst.msk [vmem:[#allocation4 + $0x18] sm:$0xff] %vm952_vm2, %v3059_v11 }
0x2643   :  { %v2889_v16 = vpop.permute.xlu0 %2888  ;;  %v3334_v26 = vld [vmem:[#allocation4 + $0x8] sm:$0xff] }
0x2644   :  { %v5894_v28 = vpop.eup %5893  ;;  %2891 = vst.msk [vmem:[#allocation4 + $0x28] sm:$0xff] %vm952_vm2, %v2889_v16  ;;  %v3319_v16 = vld [vmem:[#allocation3 + $0x10] sm:$0xff] }
0x2645   :  { %3307 = vrot.lane.b32.xlu1 %v5894_v28, %s6073_s7  ;;  %v5896_v8 = vpop.eup %5895  ;;  %v3320_v28 = vld [vmem:[#allocation3 + $0x18] sm:$0xff] }
0x2646   :  { %v3288_v24 = vadd.f32 1.0, %v5896_v8  ;;  %v3321_v8 = vld [vmem:[#allocation3 + $0x20] sm:$0xff] }
0x2647   :  { %v2719_v22 = vpop.permute.xlu0 %2718  ;;  %v3336_v43 = vld [vmem:[#allocation4 + $0x18] sm:$0xff] }
0x2648   :  { %2721 = vst.msk [vmem:[#allocation4 + $0x38] sm:$0xff] %vm952_vm2, %v2719_v22  ;;  %5897 = vrcp.f32 %v3288_v24  ;;  %v3322_v24 = vld [vmem:[#allocation3 + $0x28] sm:$0xff] }
0x264b   :  { %v2549_v3 = vpop.permute.xlu0 %2548  ;;  %v3338_v44 = vld [vmem:[#allocation4 + $0x28] sm:$0xff] }
0x264c   :  { %2551 = vst.msk [vmem:[#allocation4 + $0x48] sm:$0xff] %vm952_vm2, %v2549_v3 }
0x264f   :  { %v2379_v53 = vpop.permute.xlu0 %2378  ;;  %v3340_v40 = vld [vmem:[#allocation4 + $0x38] sm:$0xff] }
0x2650   :  { %2381 = vst.msk [vmem:[#allocation4 + $0x58] sm:$0xff] %vm952_vm2, %v2379_v53 }
0x2652   :  { %v5898_v45 = vpop.eup %5897 }
0x2653   :  { %v2209_v17 = vpop.permute.xlu0 %2208  ;;  %v3342_v38 = vld [vmem:[#allocation4 + $0x48] sm:$0xff] }
0x2654   :  { %2211 = vst.msk [vmem:[#allocation4 + $0x68] sm:$0xff] %vm952_vm2, %v2209_v17 }
0x2657   :  { %v1999_v19 = vpop.permute.xlu0 %1998  ;;  %v3344_v63 = vld [vmem:[#allocation4 + $0x58] sm:$0xff] }
0x2658   :  { %2001 = vst.msk [vmem:[#allocation4 + $0x78] sm:$0xff] %vm952_vm2, %v1999_v19 }
0x265b   :  { %v3346_v1 = vld [vmem:[#allocation4 + $0x68] sm:$0xff] }
0x265f   :  { %v3348_v59 = vld [vmem:[#allocation4 + $0x78] sm:$0xff] }
0x26b7   :  { %v3308_v6 = vpop.permute.xlu1 %3307 }
0x26b8   :  { %v3310_v30 = vmul.f32 %v5898_v45, %v3308_v6 }
0x26ba   :  { %3311 = vst.msk [vmem:[#allocation3 + $0x78] sm:$0xff] %vm952_vm2, %v3310_v30  ;;  %3313 = vrot.lane.b32.xlu1 %v3310_v30, %s6074_s10 }
0x26be   :  { %3143 = vrot.lane.b32.xlu1 %v7090_v39, %s6074_s10 }
0x26c2   :  { %2973 = vrot.lane.b32.xlu1 %v7045_v32, %s6074_s10 }
0x26c6   :  { %2803 = vrot.lane.b32.xlu1 %v6999_v41, %s6074_s10  ;;  %v5701_v41 = vld [vmem:[#allocation7 + $0x90] ss:$8 sps:$4 sm:$0xff]  }
0x26c7   :  { %5362 = vmatprep.subr.bf16.mxu0 %v5701_v41 }
0x26c8   :  { %5363 = vmatpush3.bf16.msra.mxu0 %v5701_v41  ;;  %v3323_v41 = vld [vmem:[#allocation3 + $0x30] sm:$0xff] }
0x26ca   :  { %2633 = vrot.lane.b32.xlu1 %v6953_v12, %s6074_s10 }
0x26ce   :  { %2463 = vrot.lane.b32.xlu1 %v6893_v50, %s6074_s10  ;;  %v5702_v50 = vld [vmem:[#allocation7 + $0xa0] ss:$8 sps:$4 sm:$0xff]  }
0x26cf   :  { %5364 = vmatprep.subr.bf16.mxu0 %v5702_v50 }
0x26d0   :  { %5365 = vmatpush3.bf16.msra.mxu0 %v5702_v50 }
0x26d1   :  { %5412 = vmatprep.subr.bf16.mxu0 %v6066_v9 }
0x26d2   :  { %2293 = vrot.lane.b32.xlu1 %v6804_v20, %s6074_s10 }
0x26d6   :  { %2123 = vrot.lane.b32.xlu1 %v6588_v46, %s6074_s10 }
0x272c   :  { %v3314_v32 = vpop.permute.xlu1 %3313 }
0x272d   :  { %3316 = vst.msk [vmem:[#allocation4] sm:$0xff] %vm952_vm2, %v3314_v32 }
0x2730   :  { %v3144_v12 = vpop.permute.xlu1 %3143 }
0x2731   :  { %3146 = vst.msk [vmem:[#allocation4 + $0x10] sm:$0xff] %vm952_vm2, %v3144_v12  ;;  %v3324_v12 = vld [vmem:[#allocation3 + $0x38] sm:$0xff] }
0x2734   :  { %v2974_v20 = vpop.permute.xlu1 %2973  ;;  %v3333_v39 = vld [vmem:[#allocation4] sm:$0xff] }
0x2735   :  { %2976 = vst.msk [vmem:[#allocation4 + $0x20] sm:$0xff] %vm952_vm2, %v2974_v20  ;;  %v5616_v46 = vpack.i.bf16 %v3334_v26, %v3333_v39 }
0x2737   :  { %5617 = vrot.lane.b32.xlu0 %v5616_v46, %s6071_s27 }
0x2738   :  { %v2804_v54 = vpop.permute.xlu1 %2803  ;;  %v3335_v33 = vld [vmem:[#allocation4 + $0x10] sm:$0xff] }
0x2739   :  { %2806 = vst.msk [vmem:[#allocation4 + $0x30] sm:$0xff] %vm952_vm2, %v2804_v54  ;;  %v5621_v48 = vpack.i.bf16 %v3336_v43, %v3335_v33  ;;  %v3325_v33 = vld [vmem:[#allocation3 + $0x40] sm:$0xff]  ;;  %v3326_v43 = vld [vmem:[#allocation3 + $0x48] sm:$0xff] }
0x273b   :  { %5622 = vrot.lane.b32.xlu1 %v5621_v48, %s6071_s27 }
0x273c   :  { %v2634_v60 = vpop.permute.xlu1 %2633  ;;  %v3337_v14 = vld [vmem:[#allocation4 + $0x20] sm:$0xff] }
0x273d   :  { %2636 = vst.msk [vmem:[#allocation4 + $0x40] sm:$0xff] %vm952_vm2, %v2634_v60  ;;  %v5626_v61 = vpack.i.bf16 %v3338_v44, %v3337_v14 }
0x273f   :  { %5627 = vrot.lane.b32.xlu0 %v5626_v61, %s6071_s27 }
0x2740   :  { %v2464_v37 = vpop.permute.xlu1 %2463  ;;  %v3339_v0 = vld [vmem:[#allocation4 + $0x30] sm:$0xff] }
0x2741   :  { %2466 = vst.msk [vmem:[#allocation4 + $0x50] sm:$0xff] %vm952_vm2, %v2464_v37  ;;  %v5631_v15 = vpack.i.bf16 %v3340_v40, %v3339_v0  ;;  %v3327_v0 = vld [vmem:[#allocation3 + $0x50] sm:$0xff]  ;;  %v3328_v40 = vld [vmem:[#allocation3 + $0x58] sm:$0xff] }
0x2743   :  { %5632 = vrot.lane.b32.xlu1 %v5631_v15, %s6071_s27 }
0x2744   :  { %v2294_v62 = vpop.permute.xlu1 %2293  ;;  %v3341_v21 = vld [vmem:[#allocation4 + $0x40] sm:$0xff] }
0x2745   :  { %2296 = vst.msk [vmem:[#allocation4 + $0x60] sm:$0xff] %vm952_vm2, %v2294_v62  ;;  %v5636_v27 = vpack.i.bf16 %v3342_v38, %v3341_v21 }
0x2747   :  { %5637 = vrot.lane.b32.xlu0 %v5636_v27, %s6071_s27 }
0x2748   :  { %v2124_v57 = vpop.permute.xlu1 %2123  ;;  %v3343_v51 = vld [vmem:[#allocation4 + $0x50] sm:$0xff] }
0x2749   :  { %2126 = vst.msk [vmem:[#allocation4 + $0x70] sm:$0xff] %vm952_vm2, %v2124_v57  ;;  %v5641_v5 = vpack.i.bf16 %v3344_v63, %v3343_v51  ;;  %v3329_v51 = vld [vmem:[#allocation3 + $0x60] sm:$0xff]  ;;  %v3330_v63 = vld [vmem:[#allocation3 + $0x68] sm:$0xff] }
0x274b   :  { %5642 = vrot.lane.b32.xlu1 %v5641_v5, %s6071_s27 }
0x274c   :  { %v3345_v47 = vld [vmem:[#allocation4 + $0x60] sm:$0xff] }
0x274d   :  { %v5646_v55 = vpack.i.bf16 %v3346_v1, %v3345_v47 }
0x274f   :  { %5647 = vrot.lane.b32.xlu0 %v5646_v55, %s6071_s27 }
0x2750   :  { %v3347_v4 = vld [vmem:[#allocation4 + $0x70] sm:$0xff] }
0x2751   :  { %v5651_v34 = vpack.i.bf16 %v3348_v59, %v3347_v4 }
0x2753   :  { %5652 = vrot.lane.b32.xlu1 %v5651_v34, %s6071_s27  ;;  %v3331_v34 = vld [vmem:[#allocation3 + $0x70] sm:$0xff]  ;;  %s6077_s27 = smov 104  }
0x27a9   :  { %v5618_v58 = vpop.permute.xlu0 %5617 }
0x27aa   :  { %v5620_v18 = vunpack.i.h.bf16 %v5618_v58  ;;  %v5619_v49 = vunpack.i.l.bf16 %v5618_v58  ;;  %v3332_v58 = vld [vmem:[#allocation3 + $0x78] sm:$0xff] }
0x27ac   :  { %v3414_v10 = vsel %vm952_vm2, %v3318_v42, %v5620_v18  ;;  %v3413_v13 = vsel %vm952_vm2, %v3317_v29, %v5619_v49  ;;  %v3445_v42 = vld [vmem:[%s7484_s4 + $0x1] ss:$0 sm:$0xff] }
0x27ad   :  { %v3429_v56 = vpack.c.bf16 %v3414_v10, %v3413_v13  ;;  %v5623_v31 = vpop.permute.xlu1 %5622 }
0x27ae   :  { %v5625_v25 = vunpack.i.h.bf16 %v5623_v31  ;;  %v5624_v11 = vunpack.i.l.bf16 %v5623_v31 }
0x27af   :  { %5366 = vmatprep.mubr.msk.bf16.mxu0 %vm1320_vm12, %v3429_v56 }
0x27b0   :  { %v3416_v22 = vsel %vm952_vm2, %v3320_v28, %v5625_v25  ;;  %v3415_v3 = vsel %vm952_vm2, %v3319_v16, %v5624_v11 }
0x27b1   :  { %v3430_v53 = vpack.c.bf16 %v3416_v22, %v3415_v3  ;;  %v5628_v17 = vpop.permute.xlu0 %5627 }
0x27b2   :  { %v5630_v19 = vunpack.i.h.bf16 %v5628_v17  ;;  %v5629_v36 = vunpack.i.l.bf16 %v5628_v17 }
0x27b3   :  { %5367 = vmatmul.mubr.msk.bf16.vlgmr.msra.gmra.mrb[64].mxu0 %vm1320_vm12, %v3430_v53 }
0x27b4   :  { %v3418_v45 = vsel %vm952_vm2, %v3322_v24, %v5630_v19  ;;  %v3417_v6 = vsel %vm952_vm2, %v3321_v8, %v5629_v36  ;;  %5413 = vmatpush3.bf16.msra.mxu0 %v7105_v23 }
0x27b5   :  { %v3431_v30 = vpack.c.bf16 %v3418_v45, %v3417_v6  ;;  %v5633_v2 = vpop.permute.xlu1 %5632  ;;  %5424 = vmatprep.subr.bf16.mxu0 %v6066_v9 }
0x27b6   :  { %v5635_v7 = vunpack.i.h.bf16 %v5633_v2  ;;  %v5634_v32 = vunpack.i.l.bf16 %v5633_v2 }
0x27b7   :  { %5370 = vmatprep.mubr.msk.bf16.mxu0 %vm1320_vm12, %v3431_v30 }
0x27b8   :  { %v3420_v50 = vsel %vm952_vm2, %v3324_v12, %v5635_v7  ;;  %v3419_v20 = vsel %vm952_vm2, %v3323_v41, %v5634_v32 }
0x27b9   :  { %v3432_v39 = vpack.c.bf16 %v3420_v50, %v3419_v20  ;;  %v5638_v26 = vpop.permute.xlu0 %5637 }
0x27ba   :  { %v5640_v46 = vunpack.i.h.bf16 %v5638_v26  ;;  %v5639_v54 = vunpack.i.l.bf16 %v5638_v26 }
0x27bb   :  { %5371 = vmatmul.mubr.msk.bf16.gmra.mrb[68].mxu0 %vm1320_vm12, %v3432_v39 }
0x27bc   :  { %v3422_v48 = vsel %vm952_vm2, %v3326_v43, %v5640_v46  ;;  %v3421_v60 = vsel %vm952_vm2, %v3325_v33, %v5639_v54 }
0x27bd   :  { %v3433_v14 = vpack.c.bf16 %v3422_v48, %v3421_v60  ;;  %v5643_v44 = vpop.permute.xlu1 %5642 }
0x27be   :  { %v5645_v61 = vunpack.i.h.bf16 %v5643_v44  ;;  %v5644_v37 = vunpack.i.l.bf16 %v5643_v44 }
0x27bf   :  { %5374 = vmatprep.mubr.msk.bf16.mxu0 %vm1320_vm12, %v3433_v14 }
0x27c0   :  { %v3424_v15 = vsel %vm952_vm2, %v3328_v40, %v5645_v61  ;;  %v3423_v62 = vsel %vm952_vm2, %v3327_v0, %v5644_v37 }
0x27c1   :  { %v3434_v21 = vpack.c.bf16 %v3424_v15, %v3423_v62  ;;  %v5648_v38 = vpop.permute.xlu0 %5647 }
0x27c2   :  { %v5650_v27 = vunpack.i.h.bf16 %v5648_v38  ;;  %v5649_v57 = vunpack.i.l.bf16 %v5648_v38 }
0x27c3   :  { %5375 = vmatmul.mubr.msk.bf16.gmra.mrb[72].mxu0 %vm1320_vm12, %v3434_v21 }
0x27c4   :  { %v3426_v5 = vsel %vm952_vm2, %v3330_v63, %v5650_v27  ;;  %v3425_v47 = vsel %vm952_vm2, %v3329_v51, %v5649_v57 }
0x27c5   :  { %v3435_v1 = vpack.c.bf16 %v3426_v5, %v3425_v47  ;;  %v5653_v55 = vpop.permute.xlu1 %5652 }
0x27c6   :  { %v5655_v4 = vunpack.i.h.bf16 %v5653_v55  ;;  %v5654_v59 = vunpack.i.l.bf16 %v5653_v55 }
0x27c7   :  { %5378 = vmatprep.mubr.msk.bf16.mxu0 %vm1320_vm12, %v3435_v1 }
0x27c8   :  { %v3427_v18 = vsel %vm952_vm2, %v3331_v34, %v5654_v59  ;;  %v3428_v49 = vsel %vm952_vm2, %v3332_v58, %v5655_v4 }
0x27c9   :  { %v3436_v29 = vpack.c.bf16 %v3428_v49, %v3427_v18 }
0x27cb   :  { %5379 = vmatmul.mubr.msk.bf16.gmra.mrb[76].mxu0 %vm1320_vm12, %v3436_v29 }
0x27cc   :  { %5414 = vmatprep.mubr.msk.bf16.mxu0 %vm6078_vm9, %v6066_v9 }
0x2886   :  { %v5368_v10 = vpop.f32.mrb[64].mxu0 }
0x2887   :  { %v7203_v13 = vadd.f32 %v5368_v10, %v3445_v42  ;;  %v3528_v56 = vpop.f32.mrb[65].mxu0 }
0x2888   :  { %v7205_v31 = vadd.f32 %v3528_v56, %v3445_v42  ;;  %v5369_v25 = vpop.f32.mrb[66].mxu0 }
0x2889   :  { %3593 = vst.msk [vmem:[#allocation5 + $0x10] sm:$0xff] %vm952_vm2, %v7203_v13  ;;  %v7209_v11 = vadd.f32 %v5369_v25, %v3445_v42  ;;  %v3531_v16 = vpop.f32.mrb[67].mxu0 }
0x288a   :  { %3591 = vst.msk [vmem:[#allocation5] sm:$0xff] %vm952_vm2, %v7205_v31  ;;  %v7213_v28 = vadd.f32 %v3531_v16, %v3445_v42 }
0x288b   :  { %3594 = vst.msk [vmem:[#allocation5 + $0x18] sm:$0xff] %vm952_vm2, %v7209_v11 }
0x288c   :  { %3592 = vst.msk [vmem:[#allocation5 + $0x8] sm:$0xff] %vm952_vm2, %v7213_v28 }
0x288e   :  { %v5372_v22 = vpop.f32.mrb[68].mxu0 }
0x288f   :  { %v7219_v3 = vadd.f32 %v5372_v22, %v3445_v42  ;;  %v3544_v53 = vpop.f32.mrb[69].mxu0 }
0x2890   :  { %v7221_v17 = vadd.f32 %v3544_v53, %v3445_v42  ;;  %v5373_v19 = vpop.f32.mrb[70].mxu0 }
0x2891   :  { %3597 = vst.msk [vmem:[#allocation5 + $0x30] sm:$0xff] %vm952_vm2, %v7219_v3  ;;  %v7225_v36 = vadd.f32 %v5373_v19, %v3445_v42  ;;  %v3547_v8 = vpop.f32.mrb[71].mxu0  ;;  %v3688_v60 = vld [vmem:[#allocation5] sm:$0xff] }
0x2892   :  { %3595 = vst.msk [vmem:[#allocation5 + $0x20] sm:$0xff] %vm952_vm2, %v7221_v17  ;;  %v7229_v24 = vadd.f32 %v3547_v8, %v3445_v42 }
0x2893   :  { %3598 = vst.msk [vmem:[#allocation5 + $0x38] sm:$0xff] %vm952_vm2, %v7225_v36  ;;  %v3717_v59 = vld [vmem:[#allocation5 + $0x8] sm:$0xff] }
0x2894   :  { %3596 = vst.msk [vmem:[#allocation5 + $0x28] sm:$0xff] %vm952_vm2, %v7229_v24 }
0x2896   :  { %v5376_v45 = vpop.f32.mrb[72].mxu0 }
0x2897   :  { %v7235_v6 = vadd.f32 %v5376_v45, %v3445_v42  ;;  %v3560_v30 = vpop.f32.mrb[73].mxu0 }
0x2898   :  { %v7237_v2 = vadd.f32 %v3560_v30, %v3445_v42  ;;  %v5377_v7 = vpop.f32.mrb[74].mxu0 }
0x2899   :  { %3601 = vst.msk [vmem:[#allocation5 + $0x50] sm:$0xff] %vm952_vm2, %v7235_v6  ;;  %v7241_v32 = vadd.f32 %v5377_v7, %v3445_v42  ;;  %v3563_v41 = vpop.f32.mrb[75].mxu0 }
0x289a   :  { %3599 = vst.msk [vmem:[#allocation5 + $0x40] sm:$0xff] %vm952_vm2, %v7237_v2  ;;  %v7245_v12 = vadd.f32 %v3563_v41, %v3445_v42 }
0x289b   :  { %3602 = vst.msk [vmem:[#allocation5 + $0x58] sm:$0xff] %vm952_vm2, %v7241_v32 }
0x289c   :  { %3600 = vst.msk [vmem:[#allocation5 + $0x48] sm:$0xff] %vm952_vm2, %v7245_v12 }
0x289e   :  { %v5380_v50 = vpop.f32.mrb[76].mxu0 }
0x289f   :  { %v3585_v20 = vadd.f32 %v5380_v50, %v3445_v42  ;;  %v3576_v39 = vpop.f32.mrb[77].mxu0 }
0x28a0   :  { %v7251_v26 = vadd.f32 %v3576_v39, %v3445_v42  ;;  %v5381_v46 = vpop.f32.mrb[78].mxu0 }
0x28a1   :  { %3605 = vst.msk [vmem:[#allocation5 + $0x70] sm:$0xff] %vm952_vm2, %v3585_v20  ;;  %v3588_v54 = vadd.f32 %v5381_v46, %v3445_v42  ;;  %v3579_v33 = vpop.f32.mrb[79].mxu0 }
0x28a2   :  { %3603 = vst.msk [vmem:[#allocation5 + $0x60] sm:$0xff] %vm952_vm2, %v7251_v26  ;;  %v7256_v43 = vadd.f32 %v3579_v33, %v3445_v42  ;;  %v3796_v33 = vld [vmem:[#allocation5 + $0x10] sm:$0xff] }
0x28a3   :  { %3606 = vst.msk [vmem:[#allocation5 + $0x78] sm:$0xff] %vm952_vm2, %v3588_v54  ;;  %3653 = vrot.lane.b32.xlu0 %v3588_v54, %s6074_s10 }
0x28a4   :  { %3604 = vst.msk [vmem:[#allocation5 + $0x68] sm:$0xff] %vm952_vm2, %v7256_v43 }
0x2915   :  { %v3654_v48 = vpop.permute.xlu0 %3653 }
0x2916   :  { %3686 = vst.msk [vmem:[#allocation6 + $0x78] sm:$0xff] %vm952_vm2, %v3654_v48 }
0x291d   :  { %v3689_v14 = vld [vmem:[#allocation6 + $0x78] sm:$0xff] }
0x291e   :  { %v3690_v44 = vadd.f32 %v3689_v14, %v3688_v60 }
0x2920   :  { %5899 = vtanh.f32 %v3690_v44  ;;  %v5212_v37 = vmul.f32 -1.442695, %v3690_v44 }
0x2922   :  { %5901 = vpow2.f32 %v5212_v37 }
0x292a   :  { %v5900_v61 = vpop.eup %5899 }
0x292b   :  { %3700 = vrot.lane.b32.xlu1 %v5900_v61, %s6077_s27 }
0x292c   :  { %v5902_v0 = vpop.eup %5901 }
0x292d   :  { %v3694_v40 = vadd.f32 1.0, %v5902_v0 }
0x292f   :  { %5903 = vrcp.f32 %v3694_v40 }
0x2939   :  { %v5904_v15 = vpop.eup %5903 }
0x293a   :  { %v3698_v38 = vmul.f32 0.0, %v5904_v15 }
0x299d   :  { %v3701_v62 = vpop.permute.xlu1 %3700 }
0x299e   :  { %v3703_v21 = vmul.f32 %v5904_v15, %v3701_v62 }
0x29a0   :  { %3705 = vrot.lane.b32.xlu0 %v3703_v21, %s6064_s29 }
0x2a12   :  { %v3706_v27 = vpop.permute.xlu0 %3705 }
0x2a13   :  { %v3708_v57 = vadd.f32 %v3706_v27, %v3698_v38 }
0x2a15   :  { %5905 = vtanh.f32 %v3708_v57 }
0x2a1f   :  { %v5906_v51 = vpop.eup %5905 }
0x2a20   :  { %3711 = vrot.lane.b32.xlu1 %v5906_v51, %s6064_s29 }
0x2a24   :  { %3651 = vrot.lane.b32.xlu1 %v3585_v20, %s6074_s10 }
0x2a92   :  { %v3712_v63 = vpop.permute.xlu1 %3711 }
0x2a93   :  { %v7271_v5 = vmul.f32 %v5904_v15, %v3712_v63 }
0x2a95   :  { %v3716_v47 = vpack.c.bf16 %v7271_v5, %v7271_v5 }
0x2a96   :  { %v3652_v1 = vpop.permute.xlu1 %3651 }
0x2a97   :  { %3685 = vst.msk [vmem:[#allocation6 + $0x70] sm:$0xff] %vm952_vm2, %v3652_v1  ;;  %3721 = vrot.lane.b32.xlu0 %v3716_v47, %s6076_s12 }
0x2a9e   :  { %v3718_v4 = vld [vmem:[#allocation6 + $0x70] sm:$0xff] }
0x2a9f   :  { %v3719_v34 = vadd.f32 %v3718_v4, %v3717_v59 }
0x2b09   :  { %v3722_v55 = vpop.permute.xlu0 %3721 }
0x2b0a   :  { %5385 = vmatmul.mubr.msk.bf16.vlgmr.msra.gmra.mrb[44].mxu1 %vm1630_vm15, %v3722_v55 }
0x2b0b   :  { %5389 = vmatpush3.bf16.msra.mxu1 %v7105_v23  ;;  %5390 = vmatprep.mubr.msk.bf16.mxu1 %vm6078_vm9, %v6066_v9 }
0x2b0c   :  { %5394 = vmatprep.subr.bf16.mxu1 %v6066_v9 }
0x2bdd   :  { %v3763_v58 = vpop.f32.mrb[44].mxu1 }
0x2bde   :  { %v3769_v18 = vadd.f32 %v3763_v58, %v3719_v34  ;;  %v5386_v49 = vpop.f32.mrb[45].mxu1 }
0x2bdf   :  { %v3766_v29 = vpop.f32.mrb[46].mxu1 }
0x2be0   :  { %5907 = vtanh.f32 %v3769_v18  ;;  %v5387_v42 = vpop.f32.mrb[47].mxu1  ;;  %v5214_v56 = vmul.f32 -1.442695, %v3769_v18 }
0x2be2   :  { %5909 = vpow2.f32 %v5214_v56 }
0x2bea   :  { %v5908_v10 = vpop.eup %5907 }
0x2beb   :  { %3779 = vrot.lane.b32.xlu0 %v5908_v10, %s6077_s27 }
0x2bec   :  { %v5910_v25 = vpop.eup %5909 }
0x2bed   :  { %v3773_v16 = vadd.f32 1.0, %v5910_v25 }
0x2bef   :  { %5911 = vrcp.f32 %v3773_v16 }
0x2bf9   :  { %v5912_v22 = vpop.eup %5911 }
0x2bfa   :  { %v3777_v8 = vmul.f32 %v5912_v22, %v3708_v57 }
0x2c5d   :  { %v3780_v53 = vpop.permute.xlu0 %3779 }
0x2c5e   :  { %v3782_v19 = vmul.f32 %v5912_v22, %v3780_v53 }
0x2c60   :  { %3784 = vrot.lane.b32.xlu1 %v3782_v19, %s6064_s29 }
0x2cd2   :  { %v3785_v45 = vpop.permute.xlu1 %3784 }
0x2cd3   :  { %v3787_v30 = vadd.f32 %v3785_v45, %v3777_v8 }
0x2cd5   :  { %5913 = vtanh.f32 %v3787_v30 }
0x2cdf   :  { %v5914_v7 = vpop.eup %5913 }
0x2ce0   :  { %3790 = vrot.lane.b32.xlu0 %v5914_v7, %s6064_s29 }
0x2ce4   :  { %3649 = vrot.lane.b32.xlu0 %v7256_v43, %s6074_s10 }
0x2d52   :  { %v3791_v41 = vpop.permute.xlu0 %3790 }
0x2d53   :  { %v3793_v50 = vmul.f32 %v5912_v22, %v3791_v41 }
0x2d55   :  { %v3795_v20 = vpack.c.bf16 %v3793_v50, %v3793_v50  ;;  %v3794_v1 = vadd.f32 %v3793_v50, %v7271_v5  ;;  %v3872_v5 = vld [vmem:[#allocation5 + $0x18] sm:$0xff] }
0x2d56   :  { %v3650_v39 = vpop.permute.xlu0 %3649 }
0x2d57   :  { %3684 = vst.msk [vmem:[#allocation6 + $0x68] sm:$0xff] %vm952_vm2, %v3650_v39  ;;  %3800 = vrot.lane.b32.xlu1 %v3795_v20, %s6076_s12 }
0x2d5e   :  { %v3797_v54 = vld [vmem:[#allocation6 + $0x68] sm:$0xff] }
0x2d5f   :  { %v3798_v43 = vadd.f32 %v3797_v54, %v3796_v33 }
0x2dc9   :  { %v3801_v46 = vpop.permute.xlu1 %3800 }
0x2dca   :  { %5391 = vmatmul.mubr.msk.bf16.vlgmr.msra.gmra.mrb[48].mxu1 %vm1630_vm15, %v3801_v46 }
0x2dcb   :  { %5395 = vmatpush3.bf16.msra.mxu1 %v7105_v23  ;;  %5396 = vmatprep.mubr.msk.bf16.mxu1 %vm6078_vm9, %v6066_v9 }
0x2dcc   :  { %5400 = vmatprep.subr.bf16.mxu1 %v6066_v9 }
0x2e9d   :  { %v3839_v48 = vpop.f32.mrb[48].mxu1 }
0x2e9e   :  { %v3845_v60 = vadd.f32 %v3839_v48, %v3798_v43  ;;  %v5392_v14 = vpop.f32.mrb[49].mxu1  ;;  %v3948_v48 = vld [vmem:[#allocation5 + $0x20] sm:$0xff] }
0x2e9f   :  { %v3842_v44 = vpop.f32.mrb[50].mxu1 }
0x2ea0   :  { %5915 = vtanh.f32 %v3845_v60  ;;  %v5393_v61 = vpop.f32.mrb[51].mxu1  ;;  %v5216_v0 = vmul.f32 -1.442695, %v3845_v60 }
0x2ea2   :  { %5917 = vpow2.f32 %v5216_v0 }
0x2eaa   :  { %v5916_v37 = vpop.eup %5915 }
0x2eab   :  { %3855 = vrot.lane.b32.xlu1 %v5916_v37, %s6077_s27 }
0x2eac   :  { %v5918_v40 = vpop.eup %5917 }
0x2ead   :  { %v3849_v15 = vadd.f32 1.0, %v5918_v40 }
0x2eaf   :  { %5919 = vrcp.f32 %v3849_v15 }
0x2eb9   :  { %v5920_v62 = vpop.eup %5919 }
0x2eba   :  { %v3853_v27 = vmul.f32 %v5920_v62, %v3787_v30 }
0x2f1d   :  { %v3856_v21 = vpop.permute.xlu1 %3855 }
0x2f1e   :  { %v3858_v38 = vmul.f32 %v5920_v62, %v3856_v21 }
0x2f20   :  { %3860 = vrot.lane.b32.xlu0 %v3858_v38, %s6064_s29 }
0x2f92   :  { %v3861_v57 = vpop.permute.xlu0 %3860 }
0x2f93   :  { %v3863_v51 = vadd.f32 %v3861_v57, %v3853_v27 }
0x2f95   :  { %5921 = vtanh.f32 %v3863_v51 }
0x2f9f   :  { %v5922_v63 = vpop.eup %5921 }
0x2fa0   :  { %3866 = vrot.lane.b32.xlu1 %v5922_v63, %s6064_s29 }
0x2fa4   :  { %3647 = vrot.lane.b32.xlu1 %v7251_v26, %s6074_s10 }
0x3012   :  { %v3867_v47 = vpop.permute.xlu1 %3866 }
0x3013   :  { %v3869_v55 = vmul.f32 %v5920_v62, %v3867_v47 }
0x3015   :  { %v3870_v4 = vadd.f32 %v3869_v55, %v3794_v1  ;;  %v3871_v59 = vpack.c.bf16 %v3869_v55, %v3869_v55 }
0x3016   :  { %v3648_v34 = vpop.permute.xlu1 %3647 }
0x3017   :  { %3683 = vst.msk [vmem:[#allocation6 + $0x60] sm:$0xff] %vm952_vm2, %v3648_v34  ;;  %3876 = vrot.lane.b32.xlu0 %v3871_v59, %s6076_s12 }
0x301e   :  { %v3873_v26 = vld [vmem:[#allocation6 + $0x60] sm:$0xff] }
0x301f   :  { %v3874_v18 = vadd.f32 %v3873_v26, %v3872_v5  ;;  %v4024_v5 = vld [vmem:[#allocation5 + $0x28] sm:$0xff] }
0x3089   :  { %v3877_v58 = vpop.permute.xlu0 %3876 }
0x308a   :  { %5397 = vmatmul.mubr.msk.bf16.vlgmr.msra.gmra.mrb[52].mxu1 %vm1630_vm15, %v3877_v58 }
0x308b   :  { %5401 = vmatpush3.bf16.msra.mxu1 %v7105_v23  ;;  %5402 = vmatprep.mubr.msk.bf16.mxu1 %vm6078_vm9, %v6066_v9 }
0x308c   :  { %5406 = vmatprep.subr.bf16.mxu1 %v6066_v9 }
0x315d   :  { %v3915_v49 = vpop.f32.mrb[52].mxu1 }
0x315e   :  { %v3921_v29 = vadd.f32 %v3915_v49, %v3874_v18  ;;  %v5398_v42 = vpop.f32.mrb[53].mxu1 }
0x315f   :  { %v3918_v10 = vpop.f32.mrb[54].mxu1 }
0x3160   :  { %5923 = vtanh.f32 %v3921_v29  ;;  %v5399_v56 = vpop.f32.mrb[55].mxu1  ;;  %v5218_v16 = vmul.f32 -1.442695, %v3921_v29 }
0x3162   :  { %5925 = vpow2.f32 %v5218_v16 }
0x316a   :  { %v5924_v25 = vpop.eup %5923 }
0x316b   :  { %3931 = vrot.lane.b32.xlu0 %v5924_v25, %s6077_s27 }
0x316c   :  { %v5926_v22 = vpop.eup %5925 }
0x316d   :  { %v3925_v53 = vadd.f32 1.0, %v5926_v22 }
0x316f   :  { %5927 = vrcp.f32 %v3925_v53 }
0x3179   :  { %v5928_v19 = vpop.eup %5927 }
0x317a   :  { %v3929_v30 = vmul.f32 %v5928_v19, %v3863_v51 }
0x31dd   :  { %v3932_v8 = vpop.permute.xlu0 %3931 }
0x31de   :  { %v3934_v45 = vmul.f32 %v5928_v19, %v3932_v8 }
0x31e0   :  { %3936 = vrot.lane.b32.xlu1 %v3934_v45, %s6064_s29 }
0x3252   :  { %v3937_v7 = vpop.permute.xlu1 %3936 }
0x3253   :  { %v3939_v41 = vadd.f32 %v3937_v7, %v3929_v30 }
0x3255   :  { %5929 = vtanh.f32 %v3939_v41 }
0x325f   :  { %v5930_v50 = vpop.eup %5929 }
0x3260   :  { %3942 = vrot.lane.b32.xlu0 %v5930_v50, %s6064_s29 }
0x3264   :  { %3645 = vrot.lane.b32.xlu0 %v7241_v32, %s6074_s10 }
0x32d2   :  { %v3943_v20 = vpop.permute.xlu0 %3942 }
0x32d3   :  { %v3945_v39 = vmul.f32 %v5928_v19, %v3943_v20 }
0x32d5   :  { %v3946_v46 = vadd.f32 %v3945_v39, %v3870_v4  ;;  %v3947_v54 = vpack.c.bf16 %v3945_v39, %v3945_v39 }
0x32d6   :  { %v3646_v33 = vpop.permute.xlu0 %3645 }
0x32d7   :  { %3682 = vst.msk [vmem:[#allocation6 + $0x58] sm:$0xff] %vm952_vm2, %v3646_v33  ;;  %3952 = vrot.lane.b32.xlu1 %v3947_v54, %s6076_s12 }
0x32de   :  { %v3949_v32 = vld [vmem:[#allocation6 + $0x58] sm:$0xff] }
0x32df   :  { %v3950_v60 = vadd.f32 %v3949_v32, %v3948_v48  ;;  %v4100_v32 = vld [vmem:[#allocation5 + $0x30] sm:$0xff] }
0x3349   :  { %v3953_v43 = vpop.permute.xlu1 %3952 }
0x334a   :  { %5403 = vmatmul.mubr.msk.bf16.vlgmr.msra.gmra.mrb[56].mxu1 %vm1630_vm15, %v3953_v43 }
0x334b   :  { %5407 = vmatpush3.bf16.msra.mxu1 %v7105_v23  ;;  %5408 = vmatprep.mubr.msk.bf16.mxu1 %vm6078_vm9, %v6066_v9 }
0x334c   :  { %5418 = vmatprep.subr.bf16.mxu1 %v6066_v9 }
0x341d   :  { %v3991_v14 = vpop.f32.mrb[56].mxu1 }
0x341e   :  { %v3997_v44 = vadd.f32 %v3991_v14, %v3950_v60  ;;  %v5404_v61 = vpop.f32.mrb[57].mxu1 }
0x341f   :  { %v3994_v37 = vpop.f32.mrb[58].mxu1 }
0x3420   :  { %5931 = vtanh.f32 %v3997_v44  ;;  %v5405_v0 = vpop.f32.mrb[59].mxu1  ;;  %v5220_v15 = vmul.f32 -1.442695, %v3997_v44 }
0x3422   :  { %5933 = vpow2.f32 %v5220_v15 }
0x342a   :  { %v5932_v40 = vpop.eup %5931 }
0x342b   :  { %4007 = vrot.lane.b32.xlu1 %v5932_v40, %s6077_s27 }
0x342c   :  { %v5934_v62 = vpop.eup %5933 }
0x342d   :  { %v4001_v21 = vadd.f32 1.0, %v5934_v62 }
0x342f   :  { %5935 = vrcp.f32 %v4001_v21 }
0x3439   :  { %v5936_v38 = vpop.eup %5935 }
0x343a   :  { %v4005_v51 = vmul.f32 %v5936_v38, %v3939_v41 }
0x349d   :  { %v4008_v27 = vpop.permute.xlu1 %4007 }
0x349e   :  { %v4010_v57 = vmul.f32 %v5936_v38, %v4008_v27 }
0x34a0   :  { %4012 = vrot.lane.b32.xlu0 %v4010_v57, %s6064_s29 }
0x3512   :  { %v4013_v63 = vpop.permute.xlu0 %4012 }
0x3513   :  { %v4015_v47 = vadd.f32 %v4013_v63, %v4005_v51 }
0x3515   :  { %5937 = vtanh.f32 %v4015_v47 }
0x351f   :  { %v5938_v1 = vpop.eup %5937 }
0x3520   :  { %4018 = vrot.lane.b32.xlu1 %v5938_v1, %s6064_s29 }
0x3524   :  { %3643 = vrot.lane.b32.xlu1 %v7235_v6, %s6074_s10 }
0x3592   :  { %v4019_v55 = vpop.permute.xlu1 %4018 }
0x3593   :  { %v4021_v4 = vmul.f32 %v5936_v38, %v4019_v55 }
0x3595   :  { %v4022_v59 = vadd.f32 %v4021_v4, %v3946_v46  ;;  %v4023_v34 = vpack.c.bf16 %v4021_v4, %v4021_v4 }
0x3596   :  { %v3644_v58 = vpop.permute.xlu1 %3643 }
0x3597   :  { %3681 = vst.msk [vmem:[#allocation6 + $0x50] sm:$0xff] %vm952_vm2, %v3644_v58  ;;  %4028 = vrot.lane.b32.xlu0 %v4023_v34, %s6076_s12 }
0x359e   :  { %v4025_v6 = vld [vmem:[#allocation6 + $0x50] sm:$0xff] }
0x359f   :  { %v4026_v18 = vadd.f32 %v4025_v6, %v4024_v5 }
0x3609   :  { %v4029_v26 = vpop.permute.xlu0 %4028 }
0x360a   :  { %5409 = vmatmul.mubr.msk.bf16.vlgmr.msra.gmra.mrb[60].mxu1 %vm1630_vm15, %v4029_v26  ;;  %v4176_v26 = vld [vmem:[#allocation5 + $0x38] sm:$0xff] }
0x360b   :  { %5419 = vmatpush3.bf16.msra.mxu1 %v7105_v23  ;;  %5420 = vmatprep.mubr.msk.bf16.mxu1 %vm6078_vm9, %v6066_v9 }
0x360c   :  { %5430 = vmatprep.subr.bf16.mxu1 %v6066_v9 }
0x36dd   :  { %v4067_v49 = vpop.f32.mrb[60].mxu1 }
0x36de   :  { %v4073_v29 = vadd.f32 %v4067_v49, %v4026_v18  ;;  %v5410_v42 = vpop.f32.mrb[61].mxu1 }
0x36df   :  { %v4070_v10 = vpop.f32.mrb[62].mxu1 }
0x36e0   :  { %5939 = vtanh.f32 %v4073_v29  ;;  %v5411_v56 = vpop.f32.mrb[63].mxu1  ;;  %v5222_v16 = vmul.f32 -1.442695, %v4073_v29 }
0x36e2   :  { %5941 = vpow2.f32 %v5222_v16 }
0x36ea   :  { %v5940_v25 = vpop.eup %5939 }
0x36eb   :  { %4083 = vrot.lane.b32.xlu0 %v5940_v25, %s6077_s27 }
0x36ec   :  { %v5942_v22 = vpop.eup %5941 }
0x36ed   :  { %v4077_v53 = vadd.f32 1.0, %v5942_v22 }
0x36ef   :  { %5943 = vrcp.f32 %v4077_v53 }
0x36f9   :  { %v5944_v19 = vpop.eup %5943 }
0x36fa   :  { %v4081_v30 = vmul.f32 %v5944_v19, %v4015_v47 }
0x375d   :  { %v4084_v8 = vpop.permute.xlu0 %4083 }
0x375e   :  { %v4086_v45 = vmul.f32 %v5944_v19, %v4084_v8 }
0x3760   :  { %4088 = vrot.lane.b32.xlu1 %v4086_v45, %s6064_s29 }
0x37d2   :  { %v4089_v7 = vpop.permute.xlu1 %4088 }
0x37d3   :  { %v4091_v41 = vadd.f32 %v4089_v7, %v4081_v30 }
0x37d5   :  { %5945 = vtanh.f32 %v4091_v41 }
0x37df   :  { %v5946_v50 = vpop.eup %5945 }
0x37e0   :  { %4094 = vrot.lane.b32.xlu0 %v5946_v50, %s6064_s29 }
0x37e4   :  { %3641 = vrot.lane.b32.xlu0 %v7245_v12, %s6074_s10 }
0x3852   :  { %v4095_v20 = vpop.permute.xlu0 %4094 }
0x3853   :  { %v4097_v39 = vmul.f32 %v5944_v19, %v4095_v20 }
0x3855   :  { %v4098_v46 = vadd.f32 %v4097_v39, %v4022_v59  ;;  %v4099_v54 = vpack.c.bf16 %v4097_v39, %v4097_v39 }
0x3856   :  { %v3642_v33 = vpop.permute.xlu0 %3641 }
0x3857   :  { %3680 = vst.msk [vmem:[#allocation6 + $0x48] sm:$0xff] %vm952_vm2, %v3642_v33  ;;  %4104 = vrot.lane.b32.xlu1 %v4099_v54, %s6076_s12  ;;  %v4252_v33 = vld [vmem:[#allocation5 + $0x40] sm:$0xff] }
0x385e   :  { %v4101_v12 = vld [vmem:[#allocation6 + $0x48] sm:$0xff] }
0x385f   :  { %v4102_v48 = vadd.f32 %v4101_v12, %v4100_v32 }
0x38c9   :  { %v4105_v43 = vpop.permute.xlu1 %4104 }
0x38ca   :  { %5415 = vmatmul.mubr.msk.bf16.vlgmr.msra.gmra.mrb[80].mxu0 %vm1630_vm15, %v4105_v43 }
0x38cb   :  { %5425 = vmatpush3.bf16.msra.mxu0 %v7105_v23  ;;  %5426 = vmatprep.mubr.msk.bf16.mxu0 %vm6078_vm9, %v6066_v9 }
0x38cc   :  { %5436 = vmatprep.subr.bf16.mxu0 %v6066_v9 }
0x399d   :  { %v4143_v60 = vpop.f32.mrb[80].mxu0 }
0x399e   :  { %v4149_v14 = vadd.f32 %v4143_v60, %v4102_v48  ;;  %v5416_v44 = vpop.f32.mrb[81].mxu0 }
0x399f   :  { %v4146_v61 = vpop.f32.mrb[82].mxu0 }
0x39a0   :  { %5947 = vtanh.f32 %v4149_v14  ;;  %v5417_v37 = vpop.f32.mrb[83].mxu0  ;;  %v5224_v40 = vmul.f32 -1.442695, %v4149_v14 }
0x39a2   :  { %5949 = vpow2.f32 %v5224_v40 }
0x39aa   :  { %v5948_v0 = vpop.eup %5947 }
0x39ab   :  { %4159 = vrot.lane.b32.xlu1 %v5948_v0, %s6077_s27 }
0x39ac   :  { %v5950_v15 = vpop.eup %5949 }
0x39ad   :  { %v4153_v62 = vadd.f32 1.0, %v5950_v15 }
0x39af   :  { %5951 = vrcp.f32 %v4153_v62 }
0x39b9   :  { %v5952_v21 = vpop.eup %5951 }
0x39ba   :  { %v4157_v57 = vmul.f32 %v5952_v21, %v4091_v41 }
0x3a1d   :  { %v4160_v38 = vpop.permute.xlu1 %4159 }
0x3a1e   :  { %v4162_v27 = vmul.f32 %v5952_v21, %v4160_v38 }
0x3a20   :  { %4164 = vrot.lane.b32.xlu0 %v4162_v27, %s6064_s29 }
0x3a92   :  { %v4165_v51 = vpop.permute.xlu0 %4164 }
0x3a93   :  { %v4167_v63 = vadd.f32 %v4165_v51, %v4157_v57 }
0x3a95   :  { %5953 = vtanh.f32 %v4167_v63 }
0x3a9f   :  { %v5954_v47 = vpop.eup %5953 }
0x3aa0   :  { %4170 = vrot.lane.b32.xlu1 %v5954_v47, %s6064_s29 }
0x3aa4   :  { %3639 = vrot.lane.b32.xlu1 %v7237_v2, %s6074_s10 }
0x3b12   :  { %v4171_v1 = vpop.permute.xlu1 %4170 }
0x3b13   :  { %v4173_v55 = vmul.f32 %v5952_v21, %v4171_v1 }
0x3b15   :  { %v4174_v4 = vadd.f32 %v4173_v55, %v4098_v46  ;;  %v4175_v59 = vpack.c.bf16 %v4173_v55, %v4173_v55 }
0x3b16   :  { %v3640_v34 = vpop.permute.xlu1 %3639 }
0x3b17   :  { %3679 = vst.msk [vmem:[#allocation6 + $0x40] sm:$0xff] %vm952_vm2, %v3640_v34  ;;  %4180 = vrot.lane.b32.xlu0 %v4175_v59, %s6076_s12  ;;  %v4328_v59 = vld [vmem:[#allocation5 + $0x48] sm:$0xff] }
0x3b1e   :  { %v4177_v2 = vld [vmem:[#allocation6 + $0x40] sm:$0xff] }
0x3b1f   :  { %v4178_v6 = vadd.f32 %v4177_v2, %v4176_v26 }
0x3b89   :  { %v4181_v58 = vpop.permute.xlu0 %4180 }
0x3b8a   :  { %5421 = vmatmul.mubr.msk.bf16.vlgmr.msra.gmra.mrb[64].mxu1 %vm1630_vm15, %v4181_v58 }
0x3b8b   :  { %5431 = vmatpush3.bf16.msra.mxu1 %v7105_v23  ;;  %5432 = vmatprep.mubr.msk.bf16.mxu1 %vm6078_vm9, %v6066_v9 }
0x3b8c   :  { %5442 = vmatprep.subr.bf16.mxu1 %v6066_v9 }
0x3c5d   :  { %v4219_v5 = vpop.f32.mrb[64].mxu1 }
0x3c5e   :  { %v4225_v18 = vadd.f32 %v4219_v5, %v4178_v6  ;;  %v5422_v49 = vpop.f32.mrb[65].mxu1 }
0x3c5f   :  { %v4222_v29 = vpop.f32.mrb[66].mxu1 }
0x3c60   :  { %5955 = vtanh.f32 %v4225_v18  ;;  %v5423_v42 = vpop.f32.mrb[67].mxu1  ;;  %v5226_v56 = vmul.f32 -1.442695, %v4225_v18 }
0x3c62   :  { %5957 = vpow2.f32 %v5226_v56 }
0x3c6a   :  { %v5956_v10 = vpop.eup %5955 }
0x3c6b   :  { %4235 = vrot.lane.b32.xlu0 %v5956_v10, %s6077_s27 }
0x3c6c   :  { %v5958_v25 = vpop.eup %5957 }
0x3c6d   :  { %v4229_v16 = vadd.f32 1.0, %v5958_v25 }
0x3c6f   :  { %5959 = vrcp.f32 %v4229_v16 }
0x3c79   :  { %v5960_v22 = vpop.eup %5959 }
0x3c7a   :  { %v4233_v8 = vmul.f32 %v5960_v22, %v4167_v63 }
0x3cdd   :  { %v4236_v53 = vpop.permute.xlu0 %4235 }
0x3cde   :  { %v4238_v19 = vmul.f32 %v5960_v22, %v4236_v53 }
0x3ce0   :  { %4240 = vrot.lane.b32.xlu1 %v4238_v19, %s6064_s29 }
0x3d52   :  { %v4241_v45 = vpop.permute.xlu1 %4240 }
0x3d53   :  { %v4243_v30 = vadd.f32 %v4241_v45, %v4233_v8 }
0x3d55   :  { %5961 = vtanh.f32 %v4243_v30 }
0x3d5f   :  { %v5962_v7 = vpop.eup %5961 }
0x3d60   :  { %4246 = vrot.lane.b32.xlu0 %v5962_v7, %s6064_s29 }
0x3d64   :  { %3637 = vrot.lane.b32.xlu0 %v7225_v36, %s6074_s10 }
0x3dd2   :  { %v4247_v41 = vpop.permute.xlu0 %4246 }
0x3dd3   :  { %v4249_v50 = vmul.f32 %v5960_v22, %v4247_v41 }
0x3dd5   :  { %v4250_v20 = vadd.f32 %v4249_v50, %v4174_v4  ;;  %v4251_v39 = vpack.c.bf16 %v4249_v50, %v4249_v50 }
0x3dd6   :  { %v3638_v46 = vpop.permute.xlu0 %3637 }
0x3dd7   :  { %3678 = vst.msk [vmem:[#allocation6 + $0x38] sm:$0xff] %vm952_vm2, %v3638_v46  ;;  %4256 = vrot.lane.b32.xlu1 %v4251_v39, %s6076_s12 }
0x3dde   :  { %v4253_v36 = vld [vmem:[#allocation6 + $0x38] sm:$0xff] }
0x3ddf   :  { %v4254_v43 = vadd.f32 %v4253_v36, %v4252_v33 }
0x3e49   :  { %v4257_v54 = vpop.permute.xlu1 %4256 }
0x3e4a   :  { %5427 = vmatmul.mubr.msk.bf16.vlgmr.msra.gmra.mrb[84].mxu0 %vm1630_vm15, %v4257_v54 }
0x3e4b   :  { %5437 = vmatpush3.bf16.msra.mxu0 %v7105_v23  ;;  %5438 = vmatprep.mubr.msk.bf16.mxu0 %vm6078_vm9, %v6066_v9 }
0x3e4c   :  { %5448 = vmatprep.subr.bf16.mxu0 %v6066_v9 }
0x3f1d   :  { %v4295_v12 = vpop.f32.mrb[84].mxu0 }
0x3f1e   :  { %v4301_v32 = vadd.f32 %v4295_v12, %v4254_v43  ;;  %v5428_v48 = vpop.f32.mrb[85].mxu0 }
0x3f1f   :  { %v4298_v60 = vpop.f32.mrb[86].mxu0 }
0x3f20   :  { %5963 = vtanh.f32 %v4301_v32  ;;  %v5429_v14 = vpop.f32.mrb[87].mxu0  ;;  %v5228_v61 = vmul.f32 -1.442695, %v4301_v32 }
0x3f22   :  { %5965 = vpow2.f32 %v5228_v61 }
0x3f2a   :  { %v5964_v44 = vpop.eup %5963 }
0x3f2b   :  { %4311 = vrot.lane.b32.xlu1 %v5964_v44, %s6077_s27 }
0x3f2c   :  { %v5966_v37 = vpop.eup %5965 }
0x3f2d   :  { %v4305_v0 = vadd.f32 1.0, %v5966_v37 }
0x3f2f   :  { %5967 = vrcp.f32 %v4305_v0 }
0x3f39   :  { %v5968_v40 = vpop.eup %5967 }
0x3f3a   :  { %v4309_v21 = vmul.f32 %v5968_v40, %v4243_v30 }
0x3f9d   :  { %v4312_v15 = vpop.permute.xlu1 %4311 }
0x3f9e   :  { %v4314_v62 = vmul.f32 %v5968_v40, %v4312_v15 }
0x3fa0   :  { %4316 = vrot.lane.b32.xlu0 %v4314_v62, %s6064_s29 }
0x4012   :  { %v4317_v38 = vpop.permute.xlu0 %4316 }
0x4013   :  { %v4319_v27 = vadd.f32 %v4317_v38, %v4309_v21 }
0x4015   :  { %5969 = vtanh.f32 %v4319_v27 }
0x401f   :  { %v5970_v57 = vpop.eup %5969 }
0x4020   :  { %4322 = vrot.lane.b32.xlu1 %v5970_v57, %s6064_s29 }
0x4024   :  { %3635 = vrot.lane.b32.xlu1 %v7219_v3, %s6074_s10 }
0x4092   :  { %v4323_v51 = vpop.permute.xlu1 %4322 }
0x4093   :  { %v4325_v63 = vmul.f32 %v5968_v40, %v4323_v51 }
0x4095   :  { %v4326_v47 = vadd.f32 %v4325_v63, %v4250_v20  ;;  %v4327_v1 = vpack.c.bf16 %v4325_v63, %v4325_v63  ;;  %v4404_v20 = vld [vmem:[#allocation5 + $0x50] sm:$0xff]  ;;  %v4480_v63 = vld [vmem:[#allocation5 + $0x58] sm:$0xff] }
0x4096   :  { %v3636_v55 = vpop.permute.xlu1 %3635 }
0x4097   :  { %3677 = vst.msk [vmem:[#allocation6 + $0x30] sm:$0xff] %vm952_vm2, %v3636_v55  ;;  %4332 = vrot.lane.b32.xlu0 %v4327_v1, %s6076_s12 }
0x409e   :  { %v4329_v3 = vld [vmem:[#allocation6 + $0x30] sm:$0xff] }
0x409f   :  { %v4330_v34 = vadd.f32 %v4329_v3, %v4328_v59 }
0x4109   :  { %v4333_v4 = vpop.permute.xlu0 %4332 }
0x410a   :  { %5433 = vmatmul.mubr.msk.bf16.vlgmr.msra.gmra.mrb[68].mxu1 %vm1630_vm15, %v4333_v4 }
0x410b   :  { %5443 = vmatpush3.bf16.msra.mxu1 %v7105_v23  ;;  %5444 = vmatprep.mubr.msk.bf16.mxu1 %vm6078_vm9, %v6066_v9 }
0x410c   :  { %5454 = vmatprep.subr.bf16.mxu1 %v6066_v9 }
0x41dd   :  { %v4371_v58 = vpop.f32.mrb[68].mxu1 }
0x41de   :  { %v4377_v2 = vadd.f32 %v4371_v58, %v4330_v34  ;;  %v5434_v26 = vpop.f32.mrb[69].mxu1 }
0x41df   :  { %v4374_v6 = vpop.f32.mrb[70].mxu1 }
0x41e0   :  { %5971 = vtanh.f32 %v4377_v2  ;;  %v5435_v5 = vpop.f32.mrb[71].mxu1  ;;  %v5230_v49 = vmul.f32 -1.442695, %v4377_v2 }
0x41e2   :  { %5973 = vpow2.f32 %v5230_v49 }
0x41ea   :  { %v5972_v18 = vpop.eup %5971 }
0x41eb   :  { %4387 = vrot.lane.b32.xlu0 %v5972_v18, %s6077_s27 }
0x41ec   :  { %v5974_v29 = vpop.eup %5973 }
0x41ed   :  { %v4381_v42 = vadd.f32 1.0, %v5974_v29 }
0x41ef   :  { %5975 = vrcp.f32 %v4381_v42 }
0x41f9   :  { %v5976_v10 = vpop.eup %5975 }
0x41fa   :  { %v4385_v16 = vmul.f32 %v5976_v10, %v4319_v27 }
0x425d   :  { %v4388_v56 = vpop.permute.xlu0 %4387 }
0x425e   :  { %v4390_v25 = vmul.f32 %v5976_v10, %v4388_v56 }
0x4260   :  { %4392 = vrot.lane.b32.xlu1 %v4390_v25, %s6064_s29 }
0x42d2   :  { %v4393_v22 = vpop.permute.xlu1 %4392 }
0x42d3   :  { %v4395_v53 = vadd.f32 %v4393_v22, %v4385_v16 }
0x42d5   :  { %5977 = vtanh.f32 %v4395_v53 }
0x42df   :  { %v5978_v19 = vpop.eup %5977 }
0x42e0   :  { %4398 = vrot.lane.b32.xlu0 %v5978_v19, %s6064_s29 }
0x42e4   :  { %3633 = vrot.lane.b32.xlu0 %v7229_v24, %s6074_s10 }
0x4352   :  { %v4399_v8 = vpop.permute.xlu0 %4398 }
0x4353   :  { %v4401_v45 = vmul.f32 %v5976_v10, %v4399_v8  ;;  %v4556_v8 = vld [vmem:[#allocation5 + $0x60] sm:$0xff] }
0x4355   :  { %v4402_v30 = vadd.f32 %v4401_v45, %v4326_v47  ;;  %v4403_v7 = vpack.c.bf16 %v4401_v45, %v4401_v45 }
0x4356   :  { %v3634_v41 = vpop.permute.xlu0 %3633 }
0x4357   :  { %3676 = vst.msk [vmem:[#allocation6 + $0x28] sm:$0xff] %vm952_vm2, %v3634_v41  ;;  %4408 = vrot.lane.b32.xlu1 %v4403_v7, %s6076_s12 }
0x435e   :  { %v4405_v24 = vld [vmem:[#allocation6 + $0x28] sm:$0xff] }
0x435f   :  { %v4406_v39 = vadd.f32 %v4405_v24, %v4404_v20 }
0x43c9   :  { %v4409_v50 = vpop.permute.xlu1 %4408 }
0x43ca   :  { %5439 = vmatmul.mubr.msk.bf16.vlgmr.msra.gmra.mrb[88].mxu0 %vm1630_vm15, %v4409_v50 }
0x43cb   :  { %5449 = vmatpush3.bf16.msra.mxu0 %v7105_v23  ;;  %5450 = vmatprep.mubr.msk.bf16.mxu0 %vm6078_vm9, %v6066_v9 }
0x43cc   :  { %5460 = vmatprep.subr.bf16.mxu0 %v6066_v9 }
0x449d   :  { %v4447_v46 = vpop.f32.mrb[88].mxu0 }
0x449e   :  { %v4453_v54 = vadd.f32 %v4447_v46, %v4406_v39  ;;  %v5440_v36 = vpop.f32.mrb[89].mxu0 }
0x449f   :  { %v4450_v33 = vpop.f32.mrb[90].mxu0 }
0x44a0   :  { %5979 = vtanh.f32 %v4453_v54  ;;  %v5441_v43 = vpop.f32.mrb[91].mxu0  ;;  %v5232_v32 = vmul.f32 -1.442695, %v4453_v54 }
0x44a2   :  { %5981 = vpow2.f32 %v5232_v32 }
0x44aa   :  { %v5980_v12 = vpop.eup %5979 }
0x44ab   :  { %4463 = vrot.lane.b32.xlu1 %v5980_v12, %s6077_s27 }
0x44ac   :  { %v5982_v48 = vpop.eup %5981 }
0x44ad   :  { %v4457_v60 = vadd.f32 1.0, %v5982_v48 }
0x44af   :  { %5983 = vrcp.f32 %v4457_v60 }
0x44b9   :  { %v5984_v14 = vpop.eup %5983 }
0x44ba   :  { %v4461_v37 = vmul.f32 %v5984_v14, %v4395_v53 }
0x451d   :  { %v4464_v44 = vpop.permute.xlu1 %4463 }
0x451e   :  { %v4466_v61 = vmul.f32 %v5984_v14, %v4464_v44 }
0x4520   :  { %4468 = vrot.lane.b32.xlu0 %v4466_v61, %s6064_s29 }
0x4592   :  { %v4469_v0 = vpop.permute.xlu0 %4468 }
0x4593   :  { %v4471_v40 = vadd.f32 %v4469_v0, %v4461_v37 }
0x4595   :  { %5985 = vtanh.f32 %v4471_v40 }
0x459f   :  { %v5986_v15 = vpop.eup %5985 }
0x45a0   :  { %4474 = vrot.lane.b32.xlu1 %v5986_v15, %s6064_s29  ;;  %v4632_v15 = vld [vmem:[#allocation5 + $0x68] sm:$0xff] }
0x45a4   :  { %3631 = vrot.lane.b32.xlu1 %v7221_v17, %s6074_s10 }
0x4612   :  { %v4475_v62 = vpop.permute.xlu1 %4474 }
0x4613   :  { %v4477_v21 = vmul.f32 %v5984_v14, %v4475_v62 }
0x4615   :  { %v4478_v38 = vadd.f32 %v4477_v21, %v4402_v30  ;;  %v4479_v27 = vpack.c.bf16 %v4477_v21, %v4477_v21 }
0x4616   :  { %v3632_v57 = vpop.permute.xlu1 %3631 }
0x4617   :  { %3675 = vst.msk [vmem:[#allocation6 + $0x20] sm:$0xff] %vm952_vm2, %v3632_v57  ;;  %4484 = vrot.lane.b32.xlu0 %v4479_v27, %s6076_s12 }
0x461e   :  { %v4481_v17 = vld [vmem:[#allocation6 + $0x20] sm:$0xff] }
0x461f   :  { %v4482_v47 = vadd.f32 %v4481_v17, %v4480_v63 }
0x4689   :  { %v4485_v51 = vpop.permute.xlu0 %4484 }
0x468a   :  { %5445 = vmatmul.mubr.msk.bf16.vlgmr.msra.gmra.mrb[72].mxu1 %vm1630_vm15, %v4485_v51 }
0x468b   :  { %5455 = vmatpush3.bf16.msra.mxu1 %v7105_v23  ;;  %5456 = vmatprep.mubr.msk.bf16.mxu1 %vm6078_vm9, %v6066_v9 }
0x468c   :  { %5466 = vmatprep.subr.bf16.mxu1 %v6066_v9 }
0x475d   :  { %v4523_v1 = vpop.f32.mrb[72].mxu1 }
0x475e   :  { %v4529_v55 = vadd.f32 %v4523_v1, %v4482_v47  ;;  %v5446_v4 = vpop.f32.mrb[73].mxu1 }
0x475f   :  { %v4526_v3 = vpop.f32.mrb[74].mxu1 }
0x4760   :  { %5987 = vtanh.f32 %v4529_v55  ;;  %v5447_v59 = vpop.f32.mrb[75].mxu1  ;;  %v5234_v58 = vmul.f32 -1.442695, %v4529_v55 }
0x4762   :  { %5989 = vpow2.f32 %v5234_v58 }
0x476a   :  { %v5988_v34 = vpop.eup %5987 }
0x476b   :  { %4539 = vrot.lane.b32.xlu0 %v5988_v34, %s6077_s27 }
0x476c   :  { %v5990_v2 = vpop.eup %5989 }
0x476d   :  { %v4533_v26 = vadd.f32 1.0, %v5990_v2 }
0x476f   :  { %5991 = vrcp.f32 %v4533_v26 }
0x4779   :  { %v5992_v6 = vpop.eup %5991 }
0x477a   :  { %v4537_v49 = vmul.f32 %v5992_v6, %v4471_v40 }
0x47dd   :  { %v4540_v5 = vpop.permute.xlu0 %4539 }
0x47de   :  { %v4542_v18 = vmul.f32 %v5992_v6, %v4540_v5 }
0x47e0   :  { %4544 = vrot.lane.b32.xlu1 %v4542_v18, %s6064_s29 }
0x4852   :  { %v4545_v29 = vpop.permute.xlu1 %4544 }
0x4853   :  { %v4547_v42 = vadd.f32 %v4545_v29, %v4537_v49 }
0x4855   :  { %5993 = vtanh.f32 %v4547_v42 }
0x485f   :  { %v5994_v10 = vpop.eup %5993 }
0x4860   :  { %4550 = vrot.lane.b32.xlu0 %v5994_v10, %s6064_s29 }
0x4864   :  { %3629 = vrot.lane.b32.xlu0 %v7209_v11, %s6074_s10 }
0x48d2   :  { %v4551_v56 = vpop.permute.xlu0 %4550 }
0x48d3   :  { %v4553_v25 = vmul.f32 %v5992_v6, %v4551_v56 }
0x48d5   :  { %v4554_v16 = vadd.f32 %v4553_v25, %v4478_v38  ;;  %v4555_v22 = vpack.c.bf16 %v4553_v25, %v4553_v25 }
0x48d6   :  { %v3630_v53 = vpop.permute.xlu0 %3629 }
0x48d7   :  { %3674 = vst.msk [vmem:[#allocation6 + $0x18] sm:$0xff] %vm952_vm2, %v3630_v53  ;;  %4560 = vrot.lane.b32.xlu1 %v4555_v22, %s6076_s12 }
0x48de   :  { %v4557_v11 = vld [vmem:[#allocation6 + $0x18] sm:$0xff] }
0x48df   :  { %v4558_v45 = vadd.f32 %v4557_v11, %v4556_v8 }
0x4949   :  { %v4561_v19 = vpop.permute.xlu1 %4560 }
0x494a   :  { %5451 = vmatmul.mubr.msk.bf16.vlgmr.msra.gmra.mrb[92].mxu0 %vm1630_vm15, %v4561_v19 }
0x494b   :  { %5461 = vmatpush3.bf16.msra.mxu0 %v7105_v23  ;;  %5462 = vmatprep.mubr.msk.bf16.mxu0 %vm6078_vm9, %v6066_v9 }
0x494c   :  { %5472 = vmatprep.subr.bf16.mxu0 %v6066_v9 }
0x4a1d   :  { %v4599_v30 = vpop.f32.mrb[92].mxu0 }
0x4a1e   :  { %v4605_v7 = vadd.f32 %v4599_v30, %v4558_v45  ;;  %v5452_v41 = vpop.f32.mrb[93].mxu0 }
0x4a1f   :  { %v4602_v50 = vpop.f32.mrb[94].mxu0 }
0x4a20   :  { %5995 = vtanh.f32 %v4605_v7  ;;  %v5453_v24 = vpop.f32.mrb[95].mxu0  ;;  %v5236_v39 = vmul.f32 -1.442695, %v4605_v7 }
0x4a22   :  { %5997 = vpow2.f32 %v5236_v39 }
0x4a2a   :  { %v5996_v20 = vpop.eup %5995 }
0x4a2b   :  { %4615 = vrot.lane.b32.xlu1 %v5996_v20, %s6077_s27 }
0x4a2c   :  { %v5998_v46 = vpop.eup %5997 }
0x4a2d   :  { %v4609_v54 = vadd.f32 1.0, %v5998_v46 }
0x4a2f   :  { %5999 = vrcp.f32 %v4609_v54 }
0x4a39   :  { %v6000_v36 = vpop.eup %5999 }
0x4a3a   :  { %v4613_v12 = vmul.f32 %v6000_v36, %v4547_v42  ;;  %v4708_v42 = vld [vmem:[#allocation5 + $0x70] sm:$0xff] }
0x4a9d   :  { %v4616_v33 = vpop.permute.xlu1 %4615 }
0x4a9e   :  { %v4618_v43 = vmul.f32 %v6000_v36, %v4616_v33 }
0x4aa0   :  { %4620 = vrot.lane.b32.xlu0 %v4618_v43, %s6064_s29 }
0x4b12   :  { %v4621_v32 = vpop.permute.xlu0 %4620 }
0x4b13   :  { %v4623_v48 = vadd.f32 %v4621_v32, %v4613_v12  ;;  %v4784_v32 = vld [vmem:[#allocation5 + $0x78] sm:$0xff] }
0x4b15   :  { %6001 = vtanh.f32 %v4623_v48 }
0x4b1f   :  { %v6002_v60 = vpop.eup %6001 }
0x4b20   :  { %4626 = vrot.lane.b32.xlu1 %v6002_v60, %s6064_s29 }
0x4b24   :  { %3627 = vrot.lane.b32.xlu1 %v7203_v13, %s6074_s10 }
0x4b92   :  { %v4627_v14 = vpop.permute.xlu1 %4626 }
0x4b93   :  { %v4629_v44 = vmul.f32 %v6000_v36, %v4627_v14 }
0x4b95   :  { %v4630_v61 = vadd.f32 %v4629_v44, %v4554_v16  ;;  %v4631_v37 = vpack.c.bf16 %v4629_v44, %v4629_v44 }
0x4b96   :  { %v3628_v0 = vpop.permute.xlu1 %3627 }
0x4b97   :  { %3673 = vst.msk [vmem:[#allocation6 + $0x10] sm:$0xff] %vm952_vm2, %v3628_v0  ;;  %4636 = vrot.lane.b32.xlu0 %v4631_v37, %s6076_s12 }
0x4b9e   :  { %v4633_v13 = vld [vmem:[#allocation6 + $0x10] sm:$0xff] }
0x4b9f   :  { %v4634_v62 = vadd.f32 %v4633_v13, %v4632_v15 }
0x4c09   :  { %v4637_v40 = vpop.permute.xlu0 %4636 }
0x4c0a   :  { %5457 = vmatmul.mubr.msk.bf16.vlgmr.msra.gmra.mrb[76].mxu1 %vm1630_vm15, %v4637_v40 }
0x4c0b   :  { %5467 = vmatpush3.bf16.msra.mxu1 %v7105_v23  ;;  %5468 = vmatprep.mubr.msk.bf16.mxu1 %vm6078_vm9, %v6066_v9 }
0x4c0c   :  { %5480 = vmatprep.subr.bf16.mxu1 %v6066_v9 }
0x4cdd   :  { %v4675_v21 = vpop.f32.mrb[76].mxu1 }
0x4cde   :  { %v4681_v38 = vadd.f32 %v4675_v21, %v4634_v62  ;;  %v5458_v27 = vpop.f32.mrb[77].mxu1 }
0x4cdf   :  { %v4678_v57 = vpop.f32.mrb[78].mxu1 }
0x4ce0   :  { %6003 = vtanh.f32 %v4681_v38  ;;  %v5459_v51 = vpop.f32.mrb[79].mxu1  ;;  %v5238_v63 = vmul.f32 -1.442695, %v4681_v38 }
0x4ce1   :  { %v5703_v51 = vld [vmem:[#allocation7 + $0x230] ss:$8 sps:$4 sm:$0xff]  }
0x4ce2   :  { %6005 = vpow2.f32 %v5238_v63 }
0x4cea   :  { %v6004_v17 = vpop.eup %6003 }
0x4ceb   :  { %4691 = vrot.lane.b32.xlu0 %v6004_v17, %s6077_s27  ;;  %v5704_v17 = vld [vmem:[#allocation7 + $0x240] ss:$0 sps:$4 sm:$0xff]  }
0x4cec   :  { %v6006_v23 = vpop.eup %6005  ;;  %v4886_v63 = vsel %vm639_vm7, %v5704_v17, 0  ;;  %vm4994_vm7 = vcmask 39936  }
0x4ced   :  { %v4685_v47 = vadd.f32 1.0, %v6006_v23  ;;  %v5705_v23 = vld [vmem:[#allocation7 + $0x250] ss:$8 sps:$4 sm:$0xff]  }
0x4cef   :  { %6007 = vrcp.f32 %v4685_v47 }
0x4cf9   :  { %v6008_v1 = vpop.eup %6007 }
0x4cfa   :  { %v4689_v3 = vmul.f32 %v6008_v1, %v4623_v48 }
0x4d5d   :  { %v4692_v55 = vpop.permute.xlu0 %4691 }
0x4d5e   :  { %v4694_v4 = vmul.f32 %v6008_v1, %v4692_v55 }
0x4d60   :  { %4696 = vrot.lane.b32.xlu1 %v4694_v4, %s6064_s29 }
0x4dd2   :  { %v4697_v59 = vpop.permute.xlu1 %4696 }
0x4dd3   :  { %v4699_v34 = vadd.f32 %v4697_v59, %v4689_v3 }
0x4dd5   :  { %6009 = vtanh.f32 %v4699_v34 }
0x4ddf   :  { %v6010_v58 = vpop.eup %6009 }
0x4de0   :  { %4702 = vrot.lane.b32.xlu0 %v6010_v58, %s6064_s29 }
0x4de4   :  { %3625 = vrot.lane.b32.xlu0 %v7213_v28, %s6074_s10 }
0x4e52   :  { %v4703_v2 = vpop.permute.xlu0 %4702 }
0x4e53   :  { %v4705_v26 = vmul.f32 %v6008_v1, %v4703_v2 }
0x4e55   :  { %v4706_v6 = vadd.f32 %v4705_v26, %v4630_v61  ;;  %v4707_v5 = vpack.c.bf16 %v4705_v26, %v4705_v26 }
0x4e56   :  { %v3626_v18 = vpop.permute.xlu0 %3625 }
0x4e57   :  { %3672 = vst.msk [vmem:[#allocation6 + $0x8] sm:$0xff] %vm952_vm2, %v3626_v18  ;;  %4712 = vrot.lane.b32.xlu1 %v4707_v5, %s6076_s12  ;;  %v5706_v5 = vld [vmem:[#allocation7 + $0x260] ss:$8 sps:$4 sm:$0xff]   ;;  %v4992_v18 = vld [vmem:[#allocation7 + $0x270] sm:$0x7] }
0x4e5e   :  { %v4709_v29 = vld [vmem:[#allocation6 + $0x8] sm:$0xff] }
0x4e5f   :  { %v4710_v10 = vadd.f32 %v4709_v29, %v4708_v42 }
0x4ec9   :  { %v4713_v49 = vpop.permute.xlu1 %4712 }
0x4eca   :  { %5463 = vmatmul.mubr.msk.bf16.vlgmr.msra.gmra.mrb[96].mxu0 %vm1630_vm15, %v4713_v49 }
0x4ecb   :  { %5476 = vmatprep.mubr.msk.bf16.mxu0 %vm6078_vm9, %v6066_v9  ;;  %5473 = vmatpush3.bf16.msra.mxu0 %v5703_v51 }
0x4ecc   :  { %5474 = vmatprep.subr.bf16.mxu0 %v6066_v9 }
0x4ecf   :  { %5475 = vmatpush3.bf16.msra.mxu0 %v4886_v63 }
0x4ed0   :  { %5488 = vmatprep.subr.bf16.mxu0 %v6066_v9 }
0x4f9d   :  { %v4751_v56 = vpop.f32.mrb[96].mxu0 }
0x4f9e   :  { %v4757_v28 = vadd.f32 %v4751_v56, %v4710_v10  ;;  %v5464_v25 = vpop.f32.mrb[97].mxu0  ;;  %v4872_v10 = vld [vmem:[%s7484_s4 + $0x6] ss:$0 sm:$0xff] }
0x4f9f   :  { %v4754_v16 = vpop.f32.mrb[98].mxu0 }
0x4fa0   :  { %6011 = vtanh.f32 %v4757_v28  ;;  %v5465_v22 = vpop.f32.mrb[99].mxu0  ;;  %v5240_v19 = vmul.f32 -1.442695, %v4757_v28 }
0x4fa2   :  { %6013 = vpow2.f32 %v5240_v19  ;;  %v4934_v19 = vld [vmem:[%s7484_s4 + $0x7] ss:$0 sm:$0xff] }
0x4faa   :  { %v6012_v53 = vpop.eup %6011 }
0x4fab   :  { %4767 = vrot.lane.b32.xlu1 %v6012_v53, %s6077_s27 }
0x4fac   :  { %v6014_v11 = vpop.eup %6013 }
0x4fad   :  { %v4761_v8 = vadd.f32 1.0, %v6014_v11 }
0x4faf   :  { %6015 = vrcp.f32 %v4761_v8 }
0x4fb9   :  { %v6016_v45 = vpop.eup %6015 }
0x4fba   :  { %v4765_v41 = vmul.f32 %v6016_v45, %v4699_v34 }
0x501d   :  { %v4768_v30 = vpop.permute.xlu1 %4767 }
0x501e   :  { %v4770_v7 = vmul.f32 %v6016_v45, %v4768_v30 }
0x5020   :  { %4772 = vrot.lane.b32.xlu0 %v4770_v7, %s6064_s29 }
0x5092   :  { %v4773_v50 = vpop.permute.xlu0 %4772 }
0x5093   :  { %v4775_v24 = vadd.f32 %v4773_v50, %v4765_v41 }
0x5095   :  { %6017 = vtanh.f32 %v4775_v24 }
0x509f   :  { %v6018_v20 = vpop.eup %6017 }
0x50a0   :  { %4778 = vrot.lane.b32.xlu1 %v6018_v20, %s6064_s29 }
0x50a4   :  { %3623 = vrot.lane.b32.xlu1 %v7205_v31, %s6074_s10 }
0x5112   :  { %v4779_v39 = vpop.permute.xlu1 %4778 }
0x5113   :  { %v4781_v46 = vmul.f32 %v6016_v45, %v4779_v39 }
0x5115   :  { %v4782_v54 = vadd.f32 %v4781_v46, %v4706_v6  ;;  %v4783_v36 = vpack.c.bf16 %v4781_v46, %v4781_v46 }
0x5116   :  { %v3624_v33 = vpop.permute.xlu1 %3623 }
0x5117   :  { %3671 = vst.msk [vmem:[#allocation6] sm:$0xff] %vm952_vm2, %v3624_v33  ;;  %4788 = vrot.lane.b32.xlu0 %v4783_v36, %s6076_s12 }
0x511e   :  { %v4785_v12 = vld [vmem:[#allocation6] sm:$0xff] }
0x511f   :  { %v4786_v48 = vadd.f32 %v4785_v12, %v4784_v32 }
0x5189   :  { %v4789_v43 = vpop.permute.xlu0 %4788 }
0x518a   :  { %5469 = vmatmul.mubr.msk.bf16.vlgmr.msra.gmra.mrb[80].mxu1 %vm1630_vm15, %v4789_v43 }
0x518b   :  { %5484 = vmatprep.mubr.msk.bf16.mxu1 %vm6078_vm9, %v6066_v9  ;;  %5481 = vmatpush3.bf16.msra.mxu1 %v5705_v23 }
0x518c   :  { %5482 = vmatprep.subr.bf16.mxu1 %v6066_v9 }
0x518f   :  { %5483 = vmatpush3.bf16.msra.mxu1 %v5706_v5 }
0x525d   :  { %v4827_v60 = vpop.f32.mrb[80].mxu1 }
0x525e   :  { %v4833_v31 = vadd.f32 %v4827_v60, %v4786_v48  ;;  %v5470_v14 = vpop.f32.mrb[81].mxu1 }
0x525f   :  { %v4830_v44 = vpop.f32.mrb[82].mxu1 }
0x5260   :  { %6019 = vtanh.f32 %v4833_v31  ;;  %v5471_v61 = vpop.f32.mrb[83].mxu1  ;;  %v5242_v0 = vmul.f32 -1.442695, %v4833_v31 }
0x5262   :  { %6021 = vpow2.f32 %v5242_v0 }
0x526a   :  { %v6020_v37 = vpop.eup %6019 }
0x526b   :  { %4843 = vrot.lane.b32.xlu0 %v6020_v37, %s6077_s27 }
0x526c   :  { %v6022_v40 = vpop.eup %6021 }
0x526d   :  { %v4837_v13 = vadd.f32 1.0, %v6022_v40 }
0x526f   :  { %6023 = vrcp.f32 %v4837_v13 }
0x5279   :  { %v6024_v15 = vpop.eup %6023 }
0x527a   :  { %v4841_v38 = vmul.f32 %v6024_v15, %v4775_v24  ;;  %v4993_v24 = vld [vmem:[%s7484_s4 + $0x10] ss:$0 sm:$0xff] }
0x52dd   :  { %v4844_v62 = vpop.permute.xlu0 %4843 }
0x52de   :  { %v4846_v21 = vmul.f32 %v6024_v15, %v4844_v62 }
0x52e0   :  { %4848 = vrot.lane.b32.xlu1 %v4846_v21, %s6064_s29 }
0x52e4   :  { %4863 = vrot.lane.b32.xlu1 %v6362_v52, %s6064_s29  ;;  %v1351_v52 = vld [vmem:[%s7484_s4 + $0x4] ss:$0 sm:$0xff] }
0x52e5   :  { %v1450_v1 = vadd.f32 %v6558_v35, %v1351_v52  ;;  %v6079_v35 = vmov 65535  }
0x52e6   :  { %v4998_v49 = vsel %vm1157_vm5, 4294967295, %v6079_v35 }
0x52e7   :  { %v1455_v34 = vmax.f32 %v1450_v1, 0.0  ;;  %v4999_v29 = vsel %vm1126_vm3, %v4998_v49, 0 }
0x52e8   :  { %v5001_v42 = vand.u32 %v4999_v29, %v4992_v18 }
0x5352   :  { %v4849_v27 = vpop.permute.xlu1 %4848 }
0x5353   :  { %v4851_v57 = vadd.f32 %v4849_v27, %v4841_v38 }
0x5355   :  { %6025 = vtanh.f32 %v4851_v57 }
0x5356   :  { %v4864_v3 = vpop.permute.xlu1 %4863 }
0x5357   :  { %v4866_v2 = vsel %vm1630_vm15, %v1455_v34, %v4864_v3 }
0x535f   :  { %v6026_v47 = vpop.eup %6025 }
0x5360   :  { %4854 = vrot.lane.b32.xlu0 %v6026_v47, %s6064_s29 }
0x53d2   :  { %v4855_v55 = vpop.permute.xlu0 %4854 }
0x53d3   :  { %v4857_v4 = vmul.f32 %v6024_v15, %v4855_v55 }
0x53d5   :  { %v4858_v59 = vadd.f32 %v4857_v4, %v4782_v54 }
0x53d7   :  { %v4859_v58 = vmul.f32 0.0625, %v4858_v59 }
0x53d9   :  { %v4867_v26 = vsel %vm947_vm1, %v4866_v2, %v4859_v58 }
0x53da   :  { %v4868_v6 = vpack.c.bf16 %v4867_v26, %v4867_v26 }
0x53dc   :  { %5477 = vmatmul.mubr.msk.bf16.vlgmr.msra.gmra.mrb[100].mxu0 %vm331_vm8, %v4868_v6  ;;  %vm5049_vm8 = vcmask 1024  }
0x53dd   :  { %5490 = vmatprep.mubr.msk.bf16.mxu0 %vm6078_vm9, %v6066_v9  ;;  %5489 = vmatpush3.bf16.msra.mxu0 %v5001_v42 }
0x54af   :  { %v4922_v56 = vpop.f32.mrb[100].mxu0 }
0x54b0   :  { %v4923_v28 = vadd.f32 %v4922_v56, %v4872_v10  ;;  %v5478_v25 = vpop.f32.mrb[101].mxu0 }
0x54b1   :  { %v4925_v16 = vpop.f32.mrb[102].mxu0 }
0x54b2   :  { %v4928_v22 = vmax.f32 %v4923_v28, 0.0  ;;  %v5479_v9 = vpop.f32.mrb[103].mxu0 }
0x54b4   :  { %v4929_v53 = vpack.c.bf16 %v4928_v22, %v4928_v22 }
0x54b6   :  { %5485 = vmatmul.mubr.msk.bf16.vlgmr.msra.gmra.mrb[84].mxu1 %vm952_vm2, %v4929_v53 }
0x5589   :  { %v4984_v11 = vpop.f32.mrb[84].mxu1 }
0x558a   :  { %v4985_v8 = vadd.f32 %v4984_v11, %v4934_v19  ;;  %v5486_v45 = vpop.f32.mrb[85].mxu1 }
0x558b   :  { %v4987_v30 = vpop.f32.mrb[86].mxu1 }
0x558c   :  { %v4990_v7 = vmax.f32 %v4985_v8, 0.0  ;;  %v5487_v41 = vpop.f32.mrb[87].mxu1 }
0x558e   :  { %v4991_v50 = vpack.c.bf16 %v4990_v7, %v4990_v7 }
0x5590   :  { %5491 = vmatmul.mubr.msk.bf16.vlgmr.msra.gmra.mrb[104].mxu0 %vm4994_vm7, %v4991_v50 }
0x5663   :  { %v5037_v20 = vpop.f32.mrb[104].mxu0 }
0x5664   :  { %v5038_v39 = vadd.f32 %v5037_v20, %v4993_v24  ;;  %v5492_v46 = vpop.f32.mrb[105].mxu0 }
0x5665   :  { %v5040_v54 = vpop.f32.mrb[106].mxu0 }
0x5666   :  { %v5250_v36 = vmul.f32 -1.442695, %v5038_v39  ;;  %v5493_v33 = vpop.f32.mrb[107].mxu0 }
0x5668   :  { %6027 = vpow2.f32 %v5250_v36 }
0x5672   :  { %v6028_v43 = vpop.eup %6027 }
0x5673   :  { %v5046_v12 = vadd.f32 1.0, %v6028_v43 }
0x5675   :  { %6029 = vrcp.f32 %v5046_v12 }
0x567f   :  { %v6030_v32 = vpop.eup %6029 }
0x5680   :  { %5050 = vst.msk [vmem:[%s7485_s5] sm:$0x3] %vm5049_vm8, %v6030_v32 }
0x5681   :  { %5055 = vsyncpa [#allocation8], 1 }

</bundles_post_ra>
